<compile_context>
chip_gen: v7x
topology: tpu7x:2x2x1
jax: 0.10.0
libtpu: 0.0.40
codegen_flags: <defaults>
</compile_context>

<pallas_src>
import functools

import jax
import jax.numpy as jnp
from jax.experimental import pallas as pl
from jax.experimental.pallas import tpu as pltpu


# ============================================================================
# Fused GRIL recurrence kernel (both directions, whole sequence)
# ============================================================================
def _make_gril_kernel(*, Cx, H, NL, K, NS, Lp):
    n_fixed = 14  # x, m, supp, fs_w/b, lin_in_w/b, gc_w/b, lin_out_w/b, read_out_w/b, prelu

    def kernel(*refs):
        n_in = n_fixed + 4 * NL + NL
        (x_ref, m_ref, supp_ref,
         fs_w_ref, fs_b_ref,
         li_w_ref, li_b_ref,
         gc_w_ref, gc_b_ref,
         lo_w_ref, lo_b_ref,
         ro_w_ref, ro_b_ref,
         pa_ref) = refs[:n_fixed]
        cell_refs = refs[n_fixed:n_fixed + 4 * NL]
        h0_refs = refs[n_fixed + 4 * NL:n_in]
        imp_ref, pred_ref, repr_ref = refs[n_in:n_in + 3]
        h_scr = refs[n_in + 3:]

        t = pl.program_id(1)

        @pl.when(t == 0)
        def _init():
            for l in range(NL):
                h_scr[l][...] = h0_refs[l][0]

        supports = [supp_ref[s] for s in range(NS)]      # bf16 (Lp, Lp) block-diag A^T

        def mm(w, v):
            # channel-mixing 1x1 conv on the MXU: bf16 x bf16 -> f32 accumulate
            return jnp.dot(w, v.astype(jnp.bfloat16),
                           preferred_element_type=jnp.float32)

        def diffuse(v, a):
            # graph diffusion einsum('ncv,wv->ncw') as lane-dense (C, Lp) @ blockdiag(A^T)
            return jnp.dot(v.astype(jnp.bfloat16), a,
                           preferred_element_type=jnp.float32)

        def diff_chain(v, order):
            outs = []
            for s in range(NS):
                cur = v
                for _ in range(order):
                    cur = diffuse(cur, supports[s])
                    outs.append(cur)
            return outs

        def gconv(pieces, chains, w, b, order, include_self):
            # SpatialConvOrderK "concat over diffusion blocks then 1x1 conv",
            # done as column-block accumulation (no concat buffer).
            blocks = []
            if include_self:
                blocks.append(pieces)
            for j in range(NS * order):
                blocks.append([ch[j] for ch in chains])
            out = None
            col = 0
            for blk in blocks:
                for p in blk:
                    ci = p.shape[0]
                    term = mm(w[:, col:col + ci], p)
                    out = term if out is None else out + term
                    col += ci
            return out + b

        x_s = x_ref[0, 0]                  # (Cx, Lp) f32
        m_s = m_ref[0, 0]
        m_b = m_s > 0.5
        h_last = h_scr[NL - 1][...]        # (H, Lp) f32

        # ---- first stage: xs_hat_1 = Conv1d(hidden -> input)(h) ----
        xs_hat_1 = mm(fs_w_ref[0], h_last) + fs_b_ref[0]
        x1 = jnp.where(m_b, x_s, xs_hat_1)

        # ---- spatial decoder (order=1, attention_block=False, u=None) ----
        li_w = li_w_ref[0]
        dec_in = (mm(li_w[:, :Cx], x1)
                  + mm(li_w[:, Cx:2 * Cx], m_s)
                  + mm(li_w[:, 2 * Cx:], h_last)
                  + li_b_ref[0])
        gc_w = gc_w_ref[0]
        g = None
        for s in range(NS):
            term = mm(gc_w[:, s * H:(s + 1) * H], diffuse(dec_in, supports[s]))
            g = term if g is None else g + term
        g = g + gc_b_ref[0]
        lo_w = lo_w_ref[0]
        lo = mm(lo_w[:, :H], g) + mm(lo_w[:, H:], h_last) + lo_b_ref[0]
        alpha = pa_ref[0]                  # (1, 1) shared PReLU slope
        lo = jnp.where(lo >= 0.0, lo, alpha * lo)
        ro_w = ro_w_ref[0]
        xs_hat_2 = mm(ro_w[:, :H], lo) + mm(ro_w[:, H:], h_last) + ro_b_ref[0]

        x2 = jnp.where(m_b, x1, xs_hat_2)

        # ---- GCGRU stack (fused r|u gate; diffusion chains of shared pieces reused) ----
        rnn_pieces = [x2, m_s]
        rnn_chains = [diff_chain(x2, K), diff_chain(m_s, K)]
        for l in range(NL):
            ruw_ref, rub_ref, cgw_ref, cgb_ref = cell_refs[4 * l:4 * l + 4]
            h_l = h_scr[l][...]
            h_ch = diff_chain(h_l, K)
            ru = jax.nn.sigmoid(gconv(rnn_pieces + [h_l], rnn_chains + [h_ch],
                                      ruw_ref[0], rub_ref[0], K, True))
            r = ru[:H]
            u = ru[H:]
            rh = r * h_l
            c = jnp.tanh(gconv(rnn_pieces + [rh], rnn_chains + [diff_chain(rh, K)],
                               cgw_ref[0], cgb_ref[0], K, True))
            h_new = u * h_l + (1.0 - u) * c
            h_scr[l][...] = h_new
            if l + 1 < NL:
                rnn_pieces = [h_new]
                rnn_chains = [diff_chain(h_new, K)]

        # ---- per-step outputs ----
        pred_ref[0, 0] = xs_hat_1
        imp_ref[0, 0] = xs_hat_2
        repr_ref[0, 0, :H, :] = lo
        repr_ref[0, 0, H:, :] = h_last

    return kernel


# ============================================================================
# Fused merge MLP kernel: Conv2d(1x1) -> ReLU -> Conv2d(1x1) on lane-dense B*N*S
# ============================================================================
def _make_merge_kernel(*, Cx, H, E):
    c_repr = 2 * H

    def kernel(p_fwd_ref, p_bwd_ref, p_mask_ref, p_emb_ref,
               w1_ref, b1_ref, w2_ref, b2_ref, o_ref):
        def mm(w, v):
            return jnp.dot(w, v.astype(jnp.bfloat16),
                           preferred_element_type=jnp.float32)

        w1 = w1_ref[...]
        o0 = c_repr
        o1 = 2 * c_repr
        o2 = o1 + Cx
        acc = (mm(w1[:, :o0], p_fwd_ref[...])
               + mm(w1[:, o0:o1], p_bwd_ref[...])
               + mm(w1[:, o1:o2], p_mask_ref[...])
               + mm(w1[:, o2:], p_emb_ref[...])
               + b1_ref[...])
        hmid = jnp.maximum(acc, 0.0)                  # ReLU; ff dropout is identity in eval
        o_ref[...] = mm(w2_ref[...], hmid) + b2_ref[...]

    return kernel


# ============================================================================
# BiGRIL forward (merge='mlp')
# ============================================================================
def bigril_forward(params, x, adj, mask, *, cfg):
    Cx = cfg["input_size"]
    H = cfg["hidden"]
    NL = cfg["n_layers"]
    K = cfg["kernel_size"]
    E = cfg["embedding_size"]
    NS = 2                                   # compute_support -> [A_fwd, A_bwd]
    B, _, N, S = x.shape
    BN = B * N
    Lp = pl.cdiv(BN, 128) * 128              # lane-padded batch*nodes

    x32 = x.astype(jnp.float32)
    m32 = mask.astype(jnp.float32)

    # ---- supports (SpatialConvOrderK.compute_support), pre-transposed + block-diagonal ----
    adj = adj.astype(jnp.float32)
    adj_fwd = adj / (adj.sum(1, keepdims=True) + 1e-8)
    adj_bwd = adj.T / (adj.T.sum(1, keepdims=True) + 1e-8)
    eye_b = jnp.eye(B, dtype=jnp.float32)

    def block_diag_t(a):
        m = jnp.kron(eye_b, a.T)             # x @ m == einsum('cv,wv->cw') per batch block
        return jnp.pad(m, ((0, Lp - BN), (0, Lp - BN))).astype(jnp.bfloat16)

    supp_bd = jnp.stack([block_diag_t(adj_fwd), block_diag_t(adj_bwd)])

    # ---- sequence tensors -> (direction, S, C, Lp); direction 1 is time-reversed ----
    def to_seq(a):                           # (B, C, N, S) -> (S, C, Lp)
        C = a.shape[1]
        seq = jnp.transpose(a, (3, 1, 0, 2)).reshape(S, C, BN)
        return jnp.pad(seq, ((0, 0), (0, 0), (0, Lp - BN)))

    def from_seq(seq, C):                    # (S, C, Lp) -> (B, C, N, S)
        out = seq[:, :, :BN].reshape(S, C, B, N)
        return jnp.transpose(out, (2, 1, 3, 0))

    x_seq_f = to_seq(x32)
    m_seq_f = to_seq(m32)
    x_seq = jnp.stack([x_seq_f, x_seq_f[::-1]])
    m_seq = jnp.stack([m_seq_f, m_seq_f[::-1]])

    # ---- stack fwd/bwd params on a leading direction axis (bf16 weights, f32 biases) ----
    def stk_w(get):
        return jnp.stack([get(params["fwd"]), get(params["bwd"])]).astype(jnp.bfloat16)

    def stk_b(get):
        return jnp.stack([get(params["fwd"]), get(params["bwd"])]).astype(jnp.float32)[..., None]

    inputs = [
        x_seq, m_seq, supp_bd,
        stk_w(lambda p: p["fs_w"]), stk_b(lambda p: p["fs_b"]),
        stk_w(lambda p: p["dec"]["lin_in_w"]), stk_b(lambda p: p["dec"]["lin_in_b"]),
        stk_w(lambda p: p["dec"]["gc_w"]), stk_b(lambda p: p["dec"]["gc_b"]),
        stk_w(lambda p: p["dec"]["lin_out_w"]), stk_b(lambda p: p["dec"]["lin_out_b"]),
        stk_w(lambda p: p["dec"]["read_out_w"]), stk_b(lambda p: p["dec"]["read_out_b"]),
        jnp.stack([params["fwd"]["dec"]["prelu_a"],
                   params["bwd"]["dec"]["prelu_a"]]).reshape(2, 1, 1).astype(jnp.float32),
    ]
    for l in range(NL):
        inputs.append(stk_w(lambda p: jnp.concatenate(            # fused reset|update gate
            [p["cells"][l]["fg_w"], p["cells"][l]["ug_w"]], axis=0)))
        inputs.append(stk_b(lambda p: jnp.concatenate(
            [p["cells"][l]["fg_b"], p["cells"][l]["ug_b"]], axis=0)))
        inputs.append(stk_w(lambda p: p["cells"][l]["cg_w"]))
        inputs.append(stk_b(lambda p: p["cells"][l]["cg_b"]))
    for l in range(NL):
        def h0_packed(p):
            h0 = p["h0"][l]                                        # (H, N)
            return jnp.pad(jnp.tile(h0, (1, B)), ((0, 0), (0, Lp - BN)))
        inputs.append(jnp.stack([h0_packed(params["fwd"]),
                                 h0_packed(params["bwd"])]).astype(jnp.float32))

    in_specs = [
        pl.BlockSpec((1, 1, Cx, Lp), lambda d, t: (d, t, 0, 0)),
        pl.BlockSpec((1, 1, Cx, Lp), lambda d, t: (d, t, 0, 0)),
        pl.BlockSpec((NS, Lp, Lp), lambda d, t: (0, 0, 0)),
    ]
    for arr in inputs[3:]:
        in_specs.append(pl.BlockSpec(
            (1,) + arr.shape[1:],
            lambda d, t, nrest=arr.ndim - 1: (d,) + (0,) * nrest))

    out_shape = (
        jax.ShapeDtypeStruct((2, S, Cx, Lp), jnp.float32),        # imputations  (xs_hat_2)
        jax.ShapeDtypeStruct((2, S, Cx, Lp), jnp.float32),        # predictions (xs_hat_1)
        jax.ShapeDtypeStruct((2, S, 2 * H, Lp), jnp.float32),     # representations
    )
    out_specs = (
        pl.BlockSpec((1, 1, Cx, Lp), lambda d, t: (d, t, 0, 0)),
        pl.BlockSpec((1, 1, Cx, Lp), lambda d, t: (d, t, 0, 0)),
        pl.BlockSpec((1, 1, 2 * H, Lp), lambda d, t: (d, t, 0, 0)),
    )

    kernel = _make_gril_kernel(Cx=Cx, H=H, NL=NL, K=K, NS=NS, Lp=Lp)
    imp, pred, repr_ = pl.pallas_call(
        kernel,
        out_shape=out_shape,
        grid=(2, S),
        in_specs=in_specs,
        out_specs=out_specs,
        scratch_shapes=[pltpu.VMEM((H, Lp), jnp.float32) for _ in range(NL)],
        compiler_params=pltpu.CompilerParams(
            dimension_semantics=("parallel", "arbitrary")),        # fwd/bwd on 2 TCs on v7x
    )(*inputs)

    fwd_out = from_seq(imp[0], Cx)
    fwd_pred = from_seq(pred[0], Cx)
    bwd_out = from_seq(imp[1], Cx)[..., ::-1]
    bwd_pred = from_seq(pred[1], Cx)[..., ::-1]

    # ---- merge MLP on lane-dense (C, B*N*S) ----
    Lm = pl.cdiv(BN * S, 128) * 128

    def flat_lane(a4):                        # (C, B, N, S) -> (C, Lm)
        C = a4.shape[0]
        f = a4.reshape(C, BN * S)
        return jnp.pad(f, ((0, 0), (0, Lm - BN * S)))

    def repr_to_cbns(rseq):                   # (S, 2H, Lp) -> (2H, B, N, S)
        r = rseq[:, :, :BN].reshape(S, 2 * H, B, N)
        return jnp.transpose(r, (1, 2, 3, 0))

    p_fwd = flat_lane(repr_to_cbns(repr_[0]))
    p_bwd = flat_lane(repr_to_cbns(repr_[1][::-1]))
    p_mask = flat_lane(jnp.transpose(m32, (1, 0, 2, 3)))
    p_emb = flat_lane(jnp.broadcast_to(
        params["emb"].astype(jnp.float32)[:, None, :, None], (E, B, N, S)))

    w1 = params["out1_w"].astype(jnp.bfloat16)
    b1 = params["out1_b"].astype(jnp.float32)[:, None]
    w2 = params["out2_w"].astype(jnp.bfloat16)
    b2 = params["out2_b"].astype(jnp.float32)[:, None]

    TL = 128
    merge_kernel = _make_merge_kernel(Cx=Cx, H=H, E=E)
    imp_flat = pl.pallas_call(
        merge_kernel,
        out_shape=jax.ShapeDtypeStruct((Cx, Lm), jnp.float32),
        grid=(Lm // TL,),
        in_specs=[
            pl.BlockSpec((2 * H, TL), lambda j: (0, j)),
            pl.BlockSpec((2 * H, TL), lambda j: (0, j)),
            pl.BlockSpec((Cx, TL), lambda j: (0, j)),
            pl.BlockSpec((E, TL), lambda j: (0, j)),
            pl.BlockSpec(w1.shape, lambda j: (0, 0)),
            pl.BlockSpec(b1.shape, lambda j: (0, 0)),
            pl.BlockSpec(w2.shape, lambda j: (0, 0)),
            pl.BlockSpec(b2.shape, lambda j: (0, 0)),
        ],
        out_specs=pl.BlockSpec((Cx, TL), lambda j: (0, j)),
        compiler_params=pltpu.CompilerParams(dimension_semantics=("parallel",)),
    )(p_fwd, p_bwd, p_mask, p_emb, w1, b1, w2, b2)

    imputation = jnp.transpose(
        imp_flat[:, :BN * S].reshape(Cx, B, N, S), (1, 0, 2, 3))
    predictions = jnp.stack([fwd_out, bwd_out, fwd_pred, bwd_pred], axis=0)
    return imputation, predictions


# ============================================================================
# Deterministic parameter initialisation (shapes follow the PyTorch __init__)
# ============================================================================
def _dense(key, cout, cin, scale=0.1):
    kw, kb = jax.random.split(key)
    w = scale * jax.random.normal(kw, (cout, cin), jnp.float32)
    b = scale * jax.random.normal(kb, (cout,), jnp.float32)
    return w, b


def init_gril_params(key, input_size, hidden, u_size, n_layers, kernel_size,
                     support_len, n_nodes):
    rnn_in = 2 * input_size + u_size
    keys = iter(jax.random.split(key, 64))
    p = {"cells": [], "h0": []}
    for layer in range(n_layers):
        d_in = rnn_in if layer == 0 else hidden
        gate_cin = (kernel_size * support_len + 1) * (d_in + hidden)   # include_self=True
        fg_w, fg_b = _dense(next(keys), hidden, gate_cin)
        ug_w, ug_b = _dense(next(keys), hidden, gate_cin)
        cg_w, cg_b = _dense(next(keys), hidden, gate_cin)
        p["cells"].append(dict(fg_w=fg_w, fg_b=fg_b, ug_w=ug_w, ug_b=ug_b,
                               cg_w=cg_w, cg_b=cg_b))
        std = 1.0 / jnp.sqrt(jnp.float32(hidden))
        p["h0"].append(std * jax.random.normal(next(keys), (hidden, n_nodes), jnp.float32))

    p["fs_w"], p["fs_b"] = _dense(next(keys), input_size, hidden)       # first_stage Conv1d

    # SpatialDecoder(d_in=rnn_in+hidden, d_model=hidden, d_out=input_size,
    #                support_len=2, order=1, attention_block=False)
    d_dec_in = rnn_in + hidden
    lin_in_w, lin_in_b = _dense(next(keys), hidden, d_dec_in)
    gc_w, gc_b = _dense(next(keys), hidden, 2 * hidden)
    lin_out_w, lin_out_b = _dense(next(keys), hidden, 2 * hidden)
    read_out_w, read_out_b = _dense(next(keys), input_size, 2 * hidden)
    p["dec"] = dict(lin_in_w=lin_in_w, lin_in_b=lin_in_b,
                    gc_w=gc_w, gc_b=gc_b,
                    lin_out_w=lin_out_w, lin_out_b=lin_out_b,
                    read_out_w=read_out_w, read_out_b=read_out_b,
                    prelu_a=jnp.float32(0.25))
    return p


def init_bigril_params(key, input_size, hidden, ff_size, n_layers, kernel_size,
                       support_len, n_nodes, u_size, embedding_size):
    kf, kb, ke, ko1, ko2 = jax.random.split(key, 5)
    params = {
        "fwd": init_gril_params(kf, input_size, hidden, u_size, n_layers,
                                kernel_size, support_len, n_nodes),
        "bwd": init_gril_params(kb, input_size, hidden, u_size, n_layers,
                                kernel_size, support_len, n_nodes),
    }
    std = jnp.sqrt(2.0 / n_nodes)                                   # kaiming-normal-like
    params["emb"] = std * jax.random.normal(ke, (embedding_size, n_nodes), jnp.float32)
    merge_cin = 4 * hidden + input_size + embedding_size
    params["out1_w"], params["out1_b"] = _dense(ko1, ff_size, merge_cin)
    params["out2_w"], params["out2_b"] = _dense(ko2, input_size, ff_size)
    return params


# TODO(synk): global_att=True (SpatialAttention), layer_norm=True, dropout>0 and exogenous u
# inputs are not implemented; BiGRIL defaults (global_att=False, layer_norm=False, dropout=0,
# u_size=0) make those branches dead in this forward pass.
if __name__ == "__main__":
    B, INPUT, N, S = 2, 1, 16, 8
    HIDDEN, FF, EMB = 32, 32, 8
    N_LAYERS, KERNEL, SUPPORT_LEN, U_SIZE = 1, 2, 2, 0

    # Static hyper-parameters (never traced by jit).
    CFG = dict(input_size=INPUT, hidden=HIDDEN, n_layers=N_LAYERS,
               kernel_size=KERNEL, embedding_size=EMB)

    key = jax.random.PRNGKey(0)
    kp, kx, km, ka = jax.random.split(key, 4)

    params = init_bigril_params(kp, INPUT, HIDDEN, FF, N_LAYERS, KERNEL,
                                SUPPORT_LEN, N, U_SIZE, EMB)

    x = jax.random.normal(kx, (B, INPUT, N, S), jnp.float32)
    mask = (jax.random.uniform(km, (B, INPUT, N, S)) > 0.2).astype(jnp.float32)
    adj = jax.random.uniform(ka, (N, N), jnp.float32)

    fwd_fn = jax.jit(functools.partial(bigril_forward, cfg=CFG))
    imputation, predictions = fwd_fn(params, x, adj, mask)
    jax.block_until_ready((imputation, predictions))

    assert imputation.shape == (B, INPUT, N, S)
    assert predictions.shape == (4, B, INPUT, N, S)
    assert bool(jnp.all(jnp.isfinite(imputation)))
    print("KERNEL_OK")
</pallas_src>

<mosaic_0001>
module attributes {stable_mosaic.version = 11 : i64} {
  func.func @kernel(%arg0: i32, %arg1: i32, %arg2: memref<1x1x1x128xf32, #tpu.memory_space<vmem>>, %arg3: memref<1x1x1x128xf32, #tpu.memory_space<vmem>>, %arg4: memref<2x128x128xbf16, #tpu.memory_space<vmem>>, %arg5: memref<1x1x32xbf16, #tpu.memory_space<vmem>>, %arg6: memref<1x1x1xf32, #tpu.memory_space<vmem>>, %arg7: memref<1x32x34xbf16, #tpu.memory_space<vmem>>, %arg8: memref<1x32x1xf32, #tpu.memory_space<vmem>>, %arg9: memref<1x32x64xbf16, #tpu.memory_space<vmem>>, %arg10: memref<1x32x1xf32, #tpu.memory_space<vmem>>, %arg11: memref<1x32x64xbf16, #tpu.memory_space<vmem>>, %arg12: memref<1x32x1xf32, #tpu.memory_space<vmem>>, %arg13: memref<1x1x64xbf16, #tpu.memory_space<vmem>>, %arg14: memref<1x1x1xf32, #tpu.memory_space<vmem>>, %arg15: memref<1x1x1xf32, #tpu.memory_space<vmem>>, %arg16: memref<1x64x170xbf16, #tpu.memory_space<vmem>>, %arg17: memref<1x64x1xf32, #tpu.memory_space<vmem>>, %arg18: memref<1x32x170xbf16, #tpu.memory_space<vmem>>, %arg19: memref<1x32x1xf32, #tpu.memory_space<vmem>>, %arg20: memref<1x32x128xf32, #tpu.memory_space<vmem>>, %arg21: memref<1x1x1x128xf32, #tpu.memory_space<vmem>>, %arg22: memref<1x1x1x128xf32, #tpu.memory_space<vmem>>, %arg23: memref<1x1x64x128xf32, #tpu.memory_space<vmem>>, %arg24: memref<32x128xf32, #tpu.memory_space<vmem>>) attributes {dimension_semantics = [#tpu.dimension_semantics<parallel>, #tpu.dimension_semantics<arbitrary>], iteration_bounds = array<i64: 2, 8>, scalar_prefetch = 0 : i64, scratch_operands = 1 : i64, tpu.core_type = #tpu.core_type<tc>, window_params = [{transform_indices = @transform_0, window_bounds = array<i64: 1, 1, 1, 128>}, {transform_indices = @transform_1, window_bounds = array<i64: 1, 1, 1, 128>}, {pipeline_mode = #tpu.pipeline_mode<synchronous>, transform_indices = @transform_2, window_bounds = array<i64: 2, 128, 128>}, {transform_indices = @transform_3, window_bounds = array<i64: 1, 1, 32>}, {transform_indices = @transform_4, window_bounds = array<i64: 1, 1, 1>}, {transform_indices = @transform_5, window_bounds = array<i64: 1, 32, 34>}, {transform_indices = @transform_6, window_bounds = array<i64: 1, 32, 1>}, {transform_indices = @transform_7, window_bounds = array<i64: 1, 32, 64>}, {transform_indices = @transform_8, window_bounds = array<i64: 1, 32, 1>}, {transform_indices = @transform_9, window_bounds = array<i64: 1, 32, 64>}, {transform_indices = @transform_10, window_bounds = array<i64: 1, 32, 1>}, {transform_indices = @transform_11, window_bounds = array<i64: 1, 1, 64>}, {transform_indices = @transform_12, window_bounds = array<i64: 1, 1, 1>}, {transform_indices = @transform_13, window_bounds = array<i64: 1, 1, 1>}, {transform_indices = @transform_14, window_bounds = array<i64: 1, 64, 170>}, {transform_indices = @transform_15, window_bounds = array<i64: 1, 64, 1>}, {transform_indices = @transform_16, window_bounds = array<i64: 1, 32, 170>}, {transform_indices = @transform_17, window_bounds = array<i64: 1, 32, 1>}, {transform_indices = @transform_18, window_bounds = array<i64: 1, 32, 128>}, {transform_indices = @transform_19, window_bounds = array<i64: 1, 1, 1, 128>}, {transform_indices = @transform_20, window_bounds = array<i64: 1, 1, 1, 128>}, {transform_indices = @transform_21, window_bounds = array<i64: 1, 1, 64, 128>}]} {
    %c0_i32 = arith.constant 0 : i32
    %0 = arith.cmpi eq, %arg1, %c0_i32 : i32
    %1 = arith.extui %0 : i1 to i32
    %c0_i32_0 = arith.constant 0 : i32
    %2 = arith.cmpi ne, %1, %c0_i32_0 : i32
    scf.if %2 {
      %c0_140 = arith.constant 0 : index
      %c0_141 = arith.constant 0 : index
      %c0_142 = arith.constant 0 : index
      %281 = vector.load %arg20[%c0_140, %c0_141, %c0_142] : memref<1x32x128xf32, #tpu.memory_space<vmem>>, vector<1x32x128xf32>
      %282 = vector.shape_cast %281 : vector<1x32x128xf32> to vector<32x128xf32>
      %c0_143 = arith.constant 0 : index
      %c0_144 = arith.constant 0 : index
      %283 = vector.load %arg24[%c0_143, %c0_144] : memref<32x128xf32, #tpu.memory_space<vmem>>, vector<32x128xf32>
      tpu.vector_store %arg24[%c0_143, %c0_144], %282 {strides = array<i32>} : memref<32x128xf32, #tpu.memory_space<vmem>>, vector<32x128xf32>,
    } else {
    }
    %c0 = arith.constant 0 : index
    %c0_1 = arith.constant 0 : index
    %c0_2 = arith.constant 0 : index
    %3 = vector.load %arg4[%c0, %c0_1, %c0_2] : memref<2x128x128xbf16, #tpu.memory_space<vmem>>, vector<1x128x128xbf16>
    %4 = vector.shape_cast %3 : vector<1x128x128xbf16> to vector<128x128xbf16>
    %c1 = arith.constant 1 : index
    %c0_3 = arith.constant 0 : index
    %c0_4 = arith.constant 0 : index
    %5 = vector.load %arg4[%c1, %c0_3, %c0_4] : memref<2x128x128xbf16, #tpu.memory_space<vmem>>, vector<1x128x128xbf16>
    %6 = vector.shape_cast %5 : vector<1x128x128xbf16> to vector<128x128xbf16>
    %c0_5 = arith.constant 0 : index
    %c0_6 = arith.constant 0 : index
    %c0_7 = arith.constant 0 : index
    %c0_8 = arith.constant 0 : index
    %7 = vector.load %arg2[%c0_5, %c0_6, %c0_7, %c0_8] : memref<1x1x1x128xf32, #tpu.memory_space<vmem>>, vector<1x1x1x128xf32>
    %8 = vector.shape_cast %7 : vector<1x1x1x128xf32> to vector<1x128xf32>
    %c0_9 = arith.constant 0 : index
    %c0_10 = arith.constant 0 : index
    %c0_11 = arith.constant 0 : index
    %c0_12 = arith.constant 0 : index
    %9 = vector.load %arg3[%c0_9, %c0_10, %c0_11, %c0_12] : memref<1x1x1x128xf32, #tpu.memory_space<vmem>>, vector<1x1x1x128xf32>
    %10 = vector.shape_cast %9 : vector<1x1x1x128xf32> to vector<1x128xf32>
    %cst = arith.constant 5.000000e-01 : f32
    %11 = vector.broadcast %cst : f32 to vector<1x128xf32>
    %12 = arith.cmpf ogt, %10, %11 : vector<1x128xf32>
    %c0_13 = arith.constant 0 : index
    %c0_14 = arith.constant 0 : index
    %13 = vector.load %arg24[%c0_13, %c0_14] : memref<32x128xf32, #tpu.memory_space<vmem>>, vector<32x128xf32>
    %c0_15 = arith.constant 0 : index
    %c0_16 = arith.constant 0 : index
    %c0_17 = arith.constant 0 : index
    %14 = vector.load %arg5[%c0_15, %c0_16, %c0_17] : memref<1x1x32xbf16, #tpu.memory_space<vmem>>, vector<1x1x32xbf16>
    %15 = vector.shape_cast %14 : vector<1x1x32xbf16> to vector<1x32xbf16>
    %16 = arith.truncf %13 : vector<32x128xf32> to vector<32x128xbf16>
    %cst_18 = arith.constant dense<0.000000e+00> : vector<1x128xf32>
    %17 = tpu.matmul %15, %16, %cst_18 {dimension_numbers = #tpu.dot_dimension_numbers<[1], [0], [0], [1], [0, 0, 1, 1], [], []>} : vector<1x32xbf16>, vector<32x128xbf16>, vector<1x128xf32> -> vector<1x128xf32>
    %c0_19 = arith.constant 0 : index
    %c0_20 = arith.constant 0 : index
    %c0_21 = arith.constant 0 : index
    %18 = vector.load %arg6[%c0_19, %c0_20, %c0_21] : memref<1x1x1xf32, #tpu.memory_space<vmem>>, vector<1x1x1xf32>
    %19 = vector.shape_cast %18 : vector<1x1x1xf32> to vector<1x1xf32>
    %20 = vector.broadcast %19 : vector<1x1xf32> to vector<1x128xf32>
    %21 = arith.addf %17, %20 : vector<1x128xf32>
    %22 = arith.select %12, %8, %21 : vector<1x128xi1>, vector<1x128xf32>
    %c0_22 = arith.constant 0 : index
    %c0_23 = arith.constant 0 : index
    %c0_24 = arith.constant 0 : index
    %23 = vector.load %arg7[%c0_22, %c0_23, %c0_24] : memref<1x32x34xbf16, #tpu.memory_space<vmem>>, vector<1x32x34xbf16>
    %24 = vector.shape_cast %23 : vector<1x32x34xbf16> to vector<32x34xbf16>
    %25 = vector.extract_strided_slice %24 {offsets = [0, 0], sizes = [32, 1], strides = [1, 1]} : vector<32x34xbf16> to vector<32x1xbf16>
    %26 = arith.truncf %22 : vector<1x128xf32> to vector<1x128xbf16>
    %cst_25 = arith.constant dense<0.000000e+00> : vector<32x128xf32>
    %27 = tpu.matmul %25, %26, %cst_25 {dimension_numbers = #tpu.dot_dimension_numbers<[1], [0], [0], [1], [0, 0, 1, 1], [], []>} : vector<32x1xbf16>, vector<1x128xbf16>, vector<32x128xf32> -> vector<32x128xf32>
    %28 = vector.extract_strided_slice %24 {offsets = [0, 1], sizes = [32, 1], strides = [1, 1]} : vector<32x34xbf16> to vector<32x1xbf16>
    %29 = arith.truncf %10 : vector<1x128xf32> to vector<1x128xbf16>
    %cst_26 = arith.constant dense<0.000000e+00> : vector<32x128xf32>
    %30 = tpu.matmul %28, %29, %cst_26 {dimension_numbers = #tpu.dot_dimension_numbers<[1], [0], [0], [1], [0, 0, 1, 1], [], []>} : vector<32x1xbf16>, vector<1x128xbf16>, vector<32x128xf32> -> vector<32x128xf32>
    %31 = arith.addf %27, %30 : vector<32x128xf32>
    %32 = vector.extract_strided_slice %24 {offsets = [0, 2], sizes = [32, 32], strides = [1, 1]} : vector<32x34xbf16> to vector<32x32xbf16>
    %33 = arith.truncf %13 : vector<32x128xf32> to vector<32x128xbf16>
    %cst_27 = arith.constant dense<0.000000e+00> : vector<32x128xf32>
    %34 = tpu.matmul %32, %33, %cst_27 {dimension_numbers = #tpu.dot_dimension_numbers<[1], [0], [0], [1], [0, 0, 1, 1], [], []>} : vector<32x32xbf16>, vector<32x128xbf16>, vector<32x128xf32> -> vector<32x128xf32>
    %35 = arith.addf %31, %34 : vector<32x128xf32>
    %c0_28 = arith.constant 0 : index
    %c0_29 = arith.constant 0 : index
    %c0_30 = arith.constant 0 : index
    %36 = vector.load %arg8[%c0_28, %c0_29, %c0_30] : memref<1x32x1xf32, #tpu.memory_space<vmem>>, vector<1x32x1xf32>
    %37 = vector.shape_cast %36 : vector<1x32x1xf32> to vector<32x1xf32>
    %38 = vector.broadcast %37 : vector<32x1xf32> to vector<32x128xf32>
    %39 = arith.addf %35, %38 : vector<32x128xf32>
    %c0_31 = arith.constant 0 : index
    %c0_32 = arith.constant 0 : index
    %c0_33 = arith.constant 0 : index
    %40 = vector.load %arg9[%c0_31, %c0_32, %c0_33] : memref<1x32x64xbf16, #tpu.memory_space<vmem>>, vector<1x32x64xbf16>
    %41 = vector.shape_cast %40 : vector<1x32x64xbf16> to vector<32x64xbf16>
    %42 = vector.extract_strided_slice %41 {offsets = [0, 0], sizes = [32, 32], strides = [1, 1]} : vector<32x64xbf16> to vector<32x32xbf16>
    %43 = arith.truncf %39 : vector<32x128xf32> to vector<32x128xbf16>
    %cst_34 = arith.constant dense<0.000000e+00> : vector<32x128xf32>
    %44 = tpu.matmul %43, %4, %cst_34 {dimension_numbers = #tpu.dot_dimension_numbers<[1], [0], [0], [1], [0, 0, 1, 1], [], []>} : vector<32x128xbf16>, vector<128x128xbf16>, vector<32x128xf32> -> vector<32x128xf32>
    %45 = arith.truncf %44 : vector<32x128xf32> to vector<32x128xbf16>
    %cst_35 = arith.constant dense<0.000000e+00> : vector<32x128xf32>
    %46 = tpu.matmul %42, %45, %cst_35 {dimension_numbers = #tpu.dot_dimension_numbers<[1], [0], [0], [1], [0, 0, 1, 1], [], []>} : vector<32x32xbf16>, vector<32x128xbf16>, vector<32x128xf32> -> vector<32x128xf32>
    %47 = vector.extract_strided_slice %41 {offsets = [0, 32], sizes = [32, 32], strides = [1, 1]} : vector<32x64xbf16> to vector<32x32xbf16>
    %48 = arith.truncf %39 : vector<32x128xf32> to vector<32x128xbf16>
    %cst_36 = arith.constant dense<0.000000e+00> : vector<32x128xf32>
    %49 = tpu.matmul %48, %6, %cst_36 {dimension_numbers = #tpu.dot_dimension_numbers<[1], [0], [0], [1], [0, 0, 1, 1], [], []>} : vector<32x128xbf16>, vector<128x128xbf16>, vector<32x128xf32> -> vector<32x128xf32>
    %50 = arith.truncf %49 : vector<32x128xf32> to vector<32x128xbf16>
    %cst_37 = arith.constant dense<0.000000e+00> : vector<32x128xf32>
    %51 = tpu.matmul %47, %50, %cst_37 {dimension_numbers = #tpu.dot_dimension_numbers<[1], [0], [0], [1], [0, 0, 1, 1], [], []>} : vector<32x32xbf16>, vector<32x128xbf16>, vector<32x128xf32> -> vector<32x128xf32>
    %52 = arith.addf %46, %51 : vector<32x128xf32>
    %c0_38 = arith.constant 0 : index
    %c0_39 = arith.constant 0 : index
    %c0_40 = arith.constant 0 : index
    %53 = vector.load %arg10[%c0_38, %c0_39, %c0_40] : memref<1x32x1xf32, #tpu.memory_space<vmem>>, vector<1x32x1xf32>
    %54 = vector.shape_cast %53 : vector<1x32x1xf32> to vector<32x1xf32>
    %55 = vector.broadcast %54 : vector<32x1xf32> to vector<32x128xf32>
    %56 = arith.addf %52, %55 : vector<32x128xf32>
    %c0_41 = arith.constant 0 : index
    %c0_42 = arith.constant 0 : index
    %c0_43 = arith.constant 0 : index
    %57 = vector.load %arg11[%c0_41, %c0_42, %c0_43] : memref<1x32x64xbf16, #tpu.memory_space<vmem>>, vector<1x32x64xbf16>
    %58 = vector.shape_cast %57 : vector<1x32x64xbf16> to vector<32x64xbf16>
    %59 = vector.extract_strided_slice %58 {offsets = [0, 0], sizes = [32, 32], strides = [1, 1]} : vector<32x64xbf16> to vector<32x32xbf16>
    %60 = arith.truncf %56 : vector<32x128xf32> to vector<32x128xbf16>
    %cst_44 = arith.constant dense<0.000000e+00> : vector<32x128xf32>
    %61 = tpu.matmul %59, %60, %cst_44 {dimension_numbers = #tpu.dot_dimension_numbers<[1], [0], [0], [1], [0, 0, 1, 1], [], []>} : vector<32x32xbf16>, vector<32x128xbf16>, vector<32x128xf32> -> vector<32x128xf32>
    %62 = vector.extract_strided_slice %58 {offsets = [0, 32], sizes = [32, 32], strides = [1, 1]} : vector<32x64xbf16> to vector<32x32xbf16>
    %63 = arith.truncf %13 : vector<32x128xf32> to vector<32x128xbf16>
    %cst_45 = arith.constant dense<0.000000e+00> : vector<32x128xf32>
    %64 = tpu.matmul %62, %63, %cst_45 {dimension_numbers = #tpu.dot_dimension_numbers<[1], [0], [0], [1], [0, 0, 1, 1], [], []>} : vector<32x32xbf16>, vector<32x128xbf16>, vector<32x128xf32> -> vector<32x128xf32>
    %65 = arith.addf %61, %64 : vector<32x128xf32>
    %c0_46 = arith.constant 0 : index
    %c0_47 = arith.constant 0 : index
    %c0_48 = arith.constant 0 : index
    %66 = vector.load %arg12[%c0_46, %c0_47, %c0_48] : memref<1x32x1xf32, #tpu.memory_space<vmem>>, vector<1x32x1xf32>
    %67 = vector.shape_cast %66 : vector<1x32x1xf32> to vector<32x1xf32>
    %68 = vector.broadcast %67 : vector<32x1xf32> to vector<32x128xf32>
    %69 = arith.addf %65, %68 : vector<32x128xf32>
    %c0_49 = arith.constant 0 : index
    %c0_50 = arith.constant 0 : index
    %c0_51 = arith.constant 0 : index
    %70 = vector.load %arg15[%c0_49, %c0_50, %c0_51] : memref<1x1x1xf32, #tpu.memory_space<vmem>>, vector<1x1x1xf32>
    %71 = vector.shape_cast %70 : vector<1x1x1xf32> to vector<1x1xf32>
    %cst_52 = arith.constant 0.000000e+00 : f32
    %72 = vector.broadcast %cst_52 : f32 to vector<32x128xf32>
    %73 = arith.cmpf oge, %69, %72 : vector<32x128xf32>
    %74 = vector.broadcast %71 : vector<1x1xf32> to vector<32x128xf32>
    %75 = arith.mulf %74, %69 : vector<32x128xf32>
    %76 = arith.select %73, %69, %75 : vector<32x128xi1>, vector<32x128xf32>
    %c0_53 = arith.constant 0 : index
    %c0_54 = arith.constant 0 : index
    %c0_55 = arith.constant 0 : index
    %77 = vector.load %arg13[%c0_53, %c0_54, %c0_55] : memref<1x1x64xbf16, #tpu.memory_space<vmem>>, vector<1x1x64xbf16>
    %78 = vector.shape_cast %77 : vector<1x1x64xbf16> to vector<1x64xbf16>
    %79 = vector.extract_strided_slice %78 {offsets = [0, 0], sizes = [1, 32], strides = [1, 1]} : vector<1x64xbf16> to vector<1x32xbf16>
    %80 = arith.truncf %76 : vector<32x128xf32> to vector<32x128xbf16>
    %cst_56 = arith.constant dense<0.000000e+00> : vector<1x128xf32>
    %81 = tpu.matmul %79, %80, %cst_56 {dimension_numbers = #tpu.dot_dimension_numbers<[1], [0], [0], [1], [0, 0, 1, 1], [], []>} : vector<1x32xbf16>, vector<32x128xbf16>, vector<1x128xf32> -> vector<1x128xf32>
    %82 = vector.extract_strided_slice %78 {offsets = [0, 32], sizes = [1, 32], strides = [1, 1]} : vector<1x64xbf16> to vector<1x32xbf16>
    %83 = arith.truncf %13 : vector<32x128xf32> to vector<32x128xbf16>
    %cst_57 = arith.constant dense<0.000000e+00> : vector<1x128xf32>
    %84 = tpu.matmul %82, %83, %cst_57 {dimension_numbers = #tpu.dot_dimension_numbers<[1], [0], [0], [1], [0, 0, 1, 1], [], []>} : vector<1x32xbf16>, vector<32x128xbf16>, vector<1x128xf32> -> vector<1x128xf32>
    %85 = arith.addf %81, %84 : vector<1x128xf32>
    %c0_58 = arith.constant 0 : index
    %c0_59 = arith.constant 0 : index
    %c0_60 = arith.constant 0 : index
    %86 = vector.load %arg14[%c0_58, %c0_59, %c0_60] : memref<1x1x1xf32, #tpu.memory_space<vmem>>, vector<1x1x1xf32>
    %87 = vector.shape_cast %86 : vector<1x1x1xf32> to vector<1x1xf32>
    %88 = vector.broadcast %87 : vector<1x1xf32> to vector<1x128xf32>
    %89 = arith.addf %85, %88 : vector<1x128xf32>
    %90 = arith.select %12, %22, %89 : vector<1x128xi1>, vector<1x128xf32>
    %91 = arith.truncf %90 : vector<1x128xf32> to vector<1x128xbf16>
    %cst_61 = arith.constant dense<0.000000e+00> : vector<1x128xf32>
    %92 = tpu.matmul %91, %4, %cst_61 {dimension_numbers = #tpu.dot_dimension_numbers<[1], [0], [0], [1], [0, 0, 1, 1], [], []>} : vector<1x128xbf16>, vector<128x128xbf16>, vector<1x128xf32> -> vector<1x128xf32>
    %93 = arith.truncf %92 : vector<1x128xf32> to vector<1x128xbf16>
    %cst_62 = arith.constant dense<0.000000e+00> : vector<1x128xf32>
    %94 = tpu.matmul %93, %4, %cst_62 {dimension_numbers = #tpu.dot_dimension_numbers<[1], [0], [0], [1], [0, 0, 1, 1], [], []>} : vector<1x128xbf16>, vector<128x128xbf16>, vector<1x128xf32> -> vector<1x128xf32>
    %95 = arith.truncf %90 : vector<1x128xf32> to vector<1x128xbf16>
    %cst_63 = arith.constant dense<0.000000e+00> : vector<1x128xf32>
    %96 = tpu.matmul %95, %6, %cst_63 {dimension_numbers = #tpu.dot_dimension_numbers<[1], [0], [0], [1], [0, 0, 1, 1], [], []>} : vector<1x128xbf16>, vector<128x128xbf16>, vector<1x128xf32> -> vector<1x128xf32>
    %97 = arith.truncf %96 : vector<1x128xf32> to vector<1x128xbf16>
    %cst_64 = arith.constant dense<0.000000e+00> : vector<1x128xf32>
    %98 = tpu.matmul %97, %6, %cst_64 {dimension_numbers = #tpu.dot_dimension_numbers<[1], [0], [0], [1], [0, 0, 1, 1], [], []>} : vector<1x128xbf16>, vector<128x128xbf16>, vector<1x128xf32> -> vector<1x128xf32>
    %99 = arith.truncf %10 : vector<1x128xf32> to vector<1x128xbf16>
    %cst_65 = arith.constant dense<0.000000e+00> : vector<1x128xf32>
    %100 = tpu.matmul %99, %4, %cst_65 {dimension_numbers = #tpu.dot_dimension_numbers<[1], [0], [0], [1], [0, 0, 1, 1], [], []>} : vector<1x128xbf16>, vector<128x128xbf16>, vector<1x128xf32> -> vector<1x128xf32>
    %101 = arith.truncf %100 : vector<1x128xf32> to vector<1x128xbf16>
    %cst_66 = arith.constant dense<0.000000e+00> : vector<1x128xf32>
    %102 = tpu.matmul %101, %4, %cst_66 {dimension_numbers = #tpu.dot_dimension_numbers<[1], [0], [0], [1], [0, 0, 1, 1], [], []>} : vector<1x128xbf16>, vector<128x128xbf16>, vector<1x128xf32> -> vector<1x128xf32>
    %103 = arith.truncf %10 : vector<1x128xf32> to vector<1x128xbf16>
    %cst_67 = arith.constant dense<0.000000e+00> : vector<1x128xf32>
    %104 = tpu.matmul %103, %6, %cst_67 {dimension_numbers = #tpu.dot_dimension_numbers<[1], [0], [0], [1], [0, 0, 1, 1], [], []>} : vector<1x128xbf16>, vector<128x128xbf16>, vector<1x128xf32> -> vector<1x128xf32>
    %105 = arith.truncf %104 : vector<1x128xf32> to vector<1x128xbf16>
    %cst_68 = arith.constant dense<0.000000e+00> : vector<1x128xf32>
    %106 = tpu.matmul %105, %6, %cst_68 {dimension_numbers = #tpu.dot_dimension_numbers<[1], [0], [0], [1], [0, 0, 1, 1], [], []>} : vector<1x128xbf16>, vector<128x128xbf16>, vector<1x128xf32> -> vector<1x128xf32>
    %c0_69 = arith.constant 0 : index
    %c0_70 = arith.constant 0 : index
    %107 = vector.load %arg24[%c0_69, %c0_70] : memref<32x128xf32, #tpu.memory_space<vmem>>, vector<32x128xf32>
    %108 = arith.truncf %107 : vector<32x128xf32> to vector<32x128xbf16>
    %cst_71 = arith.constant dense<0.000000e+00> : vector<32x128xf32>
    %109 = tpu.matmul %108, %4, %cst_71 {dimension_numbers = #tpu.dot_dimension_numbers<[1], [0], [0], [1], [0, 0, 1, 1], [], []>} : vector<32x128xbf16>, vector<128x128xbf16>, vector<32x128xf32> -> vector<32x128xf32>
    %110 = arith.truncf %109 : vector<32x128xf32> to vector<32x128xbf16>
    %cst_72 = arith.constant dense<0.000000e+00> : vector<32x128xf32>
    %111 = tpu.matmul %110, %4, %cst_72 {dimension_numbers = #tpu.dot_dimension_numbers<[1], [0], [0], [1], [0, 0, 1, 1], [], []>} : vector<32x128xbf16>, vector<128x128xbf16>, vector<32x128xf32> -> vector<32x128xf32>
    %112 = arith.truncf %107 : vector<32x128xf32> to vector<32x128xbf16>
    %cst_73 = arith.constant dense<0.000000e+00> : vector<32x128xf32>
    %113 = tpu.matmul %112, %6, %cst_73 {dimension_numbers = #tpu.dot_dimension_numbers<[1], [0], [0], [1], [0, 0, 1, 1], [], []>} : vector<32x128xbf16>, vector<128x128xbf16>, vector<32x128xf32> -> vector<32x128xf32>
    %114 = arith.truncf %113 : vector<32x128xf32> to vector<32x128xbf16>
    %cst_74 = arith.constant dense<0.000000e+00> : vector<32x128xf32>
    %115 = tpu.matmul %114, %6, %cst_74 {dimension_numbers = #tpu.dot_dimension_numbers<[1], [0], [0], [1], [0, 0, 1, 1], [], []>} : vector<32x128xbf16>, vector<128x128xbf16>, vector<32x128xf32> -> vector<32x128xf32>
    %c0_75 = arith.constant 0 : index
    %c0_76 = arith.constant 0 : index
    %c0_77 = arith.constant 0 : index
    %116 = vector.load %arg16[%c0_75, %c0_76, %c0_77] : memref<1x64x170xbf16, #tpu.memory_space<vmem>>, vector<1x64x170xbf16>
    %117 = vector.shape_cast %116 : vector<1x64x170xbf16> to vector<64x170xbf16>
    %c0_78 = arith.constant 0 : index
    %c0_79 = arith.constant 0 : index
    %c0_80 = arith.constant 0 : index
    %118 = vector.load %arg17[%c0_78, %c0_79, %c0_80] : memref<1x64x1xf32, #tpu.memory_space<vmem>>, vector<1x64x1xf32>
    %119 = vector.shape_cast %118 : vector<1x64x1xf32> to vector<64x1xf32>
    %120 = vector.extract_strided_slice %117 {offsets = [0, 0], sizes = [64, 1], strides = [1, 1]} : vector<64x170xbf16> to vector<64x1xbf16>
    %121 = arith.truncf %90 : vector<1x128xf32> to vector<1x128xbf16>
    %cst_81 = arith.constant dense<0.000000e+00> : vector<64x128xf32>
    %122 = tpu.matmul %120, %121, %cst_81 {dimension_numbers = #tpu.dot_dimension_numbers<[1], [0], [0], [1], [0, 0, 1, 1], [], []>} : vector<64x1xbf16>, vector<1x128xbf16>, vector<64x128xf32> -> vector<64x128xf32>
    %123 = vector.extract_strided_slice %117 {offsets = [0, 1], sizes = [64, 1], strides = [1, 1]} : vector<64x170xbf16> to vector<64x1xbf16>
    %124 = arith.truncf %10 : vector<1x128xf32> to vector<1x128xbf16>
    %cst_82 = arith.constant dense<0.000000e+00> : vector<64x128xf32>
    %125 = tpu.matmul %123, %124, %cst_82 {dimension_numbers = #tpu.dot_dimension_numbers<[1], [0], [0], [1], [0, 0, 1, 1], [], []>} : vector<64x1xbf16>, vector<1x128xbf16>, vector<64x128xf32> -> vector<64x128xf32>
    %126 = arith.addf %122, %125 : vector<64x128xf32>
    %127 = vector.extract_strided_slice %117 {offsets = [0, 2], sizes = [64, 32], strides = [1, 1]} : vector<64x170xbf16> to vector<64x32xbf16>
    %128 = arith.truncf %107 : vector<32x128xf32> to vector<32x128xbf16>
    %cst_83 = arith.constant dense<0.000000e+00> : vector<64x128xf32>
    %129 = tpu.matmul %127, %128, %cst_83 {dimension_numbers = #tpu.dot_dimension_numbers<[1], [0], [0], [1], [0, 0, 1, 1], [], []>} : vector<64x32xbf16>, vector<32x128xbf16>, vector<64x128xf32> -> vector<64x128xf32>
    %130 = arith.addf %126, %129 : vector<64x128xf32>
    %131 = vector.extract_strided_slice %117 {offsets = [0, 34], sizes = [64, 1], strides = [1, 1]} : vector<64x170xbf16> to vector<64x1xbf16>
    %132 = arith.truncf %92 : vector<1x128xf32> to vector<1x128xbf16>
    %cst_84 = arith.constant dense<0.000000e+00> : vector<64x128xf32>
    %133 = tpu.matmul %131, %132, %cst_84 {dimension_numbers = #tpu.dot_dimension_numbers<[1], [0], [0], [1], [0, 0, 1, 1], [], []>} : vector<64x1xbf16>, vector<1x128xbf16>, vector<64x128xf32> -> vector<64x128xf32>
    %134 = arith.addf %130, %133 : vector<64x128xf32>
    %135 = vector.extract_strided_slice %117 {offsets = [0, 35], sizes = [64, 1], strides = [1, 1]} : vector<64x170xbf16> to vector<64x1xbf16>
    %136 = arith.truncf %100 : vector<1x128xf32> to vector<1x128xbf16>
    %cst_85 = arith.constant dense<0.000000e+00> : vector<64x128xf32>
    %137 = tpu.matmul %135, %136, %cst_85 {dimension_numbers = #tpu.dot_dimension_numbers<[1], [0], [0], [1], [0, 0, 1, 1], [], []>} : vector<64x1xbf16>, vector<1x128xbf16>, vector<64x128xf32> -> vector<64x128xf32>
    %138 = arith.addf %134, %137 : vector<64x128xf32>
    %139 = vector.extract_strided_slice %117 {offsets = [0, 36], sizes = [64, 32], strides = [1, 1]} : vector<64x170xbf16> to vector<64x32xbf16>
    %140 = arith.truncf %109 : vector<32x128xf32> to vector<32x128xbf16>
    %cst_86 = arith.constant dense<0.000000e+00> : vector<64x128xf32>
    %141 = tpu.matmul %139, %140, %cst_86 {dimension_numbers = #tpu.dot_dimension_numbers<[1], [0], [0], [1], [0, 0, 1, 1], [], []>} : vector<64x32xbf16>, vector<32x128xbf16>, vector<64x128xf32> -> vector<64x128xf32>
    %142 = arith.addf %138, %141 : vector<64x128xf32>
    %143 = vector.extract_strided_slice %117 {offsets = [0, 68], sizes = [64, 1], strides = [1, 1]} : vector<64x170xbf16> to vector<64x1xbf16>
    %144 = arith.truncf %94 : vector<1x128xf32> to vector<1x128xbf16>
    %cst_87 = arith.constant dense<0.000000e+00> : vector<64x128xf32>
    %145 = tpu.matmul %143, %144, %cst_87 {dimension_numbers = #tpu.dot_dimension_numbers<[1], [0], [0], [1], [0, 0, 1, 1], [], []>} : vector<64x1xbf16>, vector<1x128xbf16>, vector<64x128xf32> -> vector<64x128xf32>
    %146 = arith.addf %142, %145 : vector<64x128xf32>
    %147 = vector.extract_strided_slice %117 {offsets = [0, 69], sizes = [64, 1], strides = [1, 1]} : vector<64x170xbf16> to vector<64x1xbf16>
    %148 = arith.truncf %102 : vector<1x128xf32> to vector<1x128xbf16>
    %cst_88 = arith.constant dense<0.000000e+00> : vector<64x128xf32>
    %149 = tpu.matmul %147, %148, %cst_88 {dimension_numbers = #tpu.dot_dimension_numbers<[1], [0], [0], [1], [0, 0, 1, 1], [], []>} : vector<64x1xbf16>, vector<1x128xbf16>, vector<64x128xf32> -> vector<64x128xf32>
    %150 = arith.addf %146, %149 : vector<64x128xf32>
    %151 = vector.extract_strided_slice %117 {offsets = [0, 70], sizes = [64, 32], strides = [1, 1]} : vector<64x170xbf16> to vector<64x32xbf16>
    %152 = arith.truncf %111 : vector<32x128xf32> to vector<32x128xbf16>
    %cst_89 = arith.constant dense<0.000000e+00> : vector<64x128xf32>
    %153 = tpu.matmul %151, %152, %cst_89 {dimension_numbers = #tpu.dot_dimension_numbers<[1], [0], [0], [1], [0, 0, 1, 1], [], []>} : vector<64x32xbf16>, vector<32x128xbf16>, vector<64x128xf32> -> vector<64x128xf32>
    %154 = arith.addf %150, %153 : vector<64x128xf32>
    %155 = vector.extract_strided_slice %117 {offsets = [0, 102], sizes = [64, 1], strides = [1, 1]} : vector<64x170xbf16> to vector<64x1xbf16>
    %156 = arith.truncf %96 : vector<1x128xf32> to vector<1x128xbf16>
    %cst_90 = arith.constant dense<0.000000e+00> : vector<64x128xf32>
    %157 = tpu.matmul %155, %156, %cst_90 {dimension_numbers = #tpu.dot_dimension_numbers<[1], [0], [0], [1], [0, 0, 1, 1], [], []>} : vector<64x1xbf16>, vector<1x128xbf16>, vector<64x128xf32> -> vector<64x128xf32>
    %158 = arith.addf %154, %157 : vector<64x128xf32>
    %159 = vector.extract_strided_slice %117 {offsets = [0, 103], sizes = [64, 1], strides = [1, 1]} : vector<64x170xbf16> to vector<64x1xbf16>
    %160 = arith.truncf %104 : vector<1x128xf32> to vector<1x128xbf16>
    %cst_91 = arith.constant dense<0.000000e+00> : vector<64x128xf32>
    %161 = tpu.matmul %159, %160, %cst_91 {dimension_numbers = #tpu.dot_dimension_numbers<[1], [0], [0], [1], [0, 0, 1, 1], [], []>} : vector<64x1xbf16>, vector<1x128xbf16>, vector<64x128xf32> -> vector<64x128xf32>
    %162 = arith.addf %158, %161 : vector<64x128xf32>
    %163 = vector.extract_strided_slice %117 {offsets = [0, 104], sizes = [64, 32], strides = [1, 1]} : vector<64x170xbf16> to vector<64x32xbf16>
    %164 = arith.truncf %113 : vector<32x128xf32> to vector<32x128xbf16>
    %cst_92 = arith.constant dense<0.000000e+00> : vector<64x128xf32>
    %165 = tpu.matmul %163, %164, %cst_92 {dimension_numbers = #tpu.dot_dimension_numbers<[1], [0], [0], [1], [0, 0, 1, 1], [], []>} : vector<64x32xbf16>, vector<32x128xbf16>, vector<64x128xf32> -> vector<64x128xf32>
    %166 = arith.addf %162, %165 : vector<64x128xf32>
    %167 = vector.extract_strided_slice %117 {offsets = [0, 136], sizes = [64, 1], strides = [1, 1]} : vector<64x170xbf16> to vector<64x1xbf16>
    %168 = arith.truncf %98 : vector<1x128xf32> to vector<1x128xbf16>
    %cst_93 = arith.constant dense<0.000000e+00> : vector<64x128xf32>
    %169 = tpu.matmul %167, %168, %cst_93 {dimension_numbers = #tpu.dot_dimension_numbers<[1], [0], [0], [1], [0, 0, 1, 1], [], []>} : vector<64x1xbf16>, vector<1x128xbf16>, vector<64x128xf32> -> vector<64x128xf32>
    %170 = arith.addf %166, %169 : vector<64x128xf32>
    %171 = vector.extract_strided_slice %117 {offsets = [0, 137], sizes = [64, 1], strides = [1, 1]} : vector<64x170xbf16> to vector<64x1xbf16>
    %172 = arith.truncf %106 : vector<1x128xf32> to vector<1x128xbf16>
    %cst_94 = arith.constant dense<0.000000e+00> : vector<64x128xf32>
    %173 = tpu.matmul %171, %172, %cst_94 {dimension_numbers = #tpu.dot_dimension_numbers<[1], [0], [0], [1], [0, 0, 1, 1], [], []>} : vector<64x1xbf16>, vector<1x128xbf16>, vector<64x128xf32> -> vector<64x128xf32>
    %174 = arith.addf %170, %173 : vector<64x128xf32>
    %175 = vector.extract_strided_slice %117 {offsets = [0, 138], sizes = [64, 32], strides = [1, 1]} : vector<64x170xbf16> to vector<64x32xbf16>
    %176 = arith.truncf %115 : vector<32x128xf32> to vector<32x128xbf16>
    %cst_95 = arith.constant dense<0.000000e+00> : vector<64x128xf32>
    %177 = tpu.matmul %175, %176, %cst_95 {dimension_numbers = #tpu.dot_dimension_numbers<[1], [0], [0], [1], [0, 0, 1, 1], [], []>} : vector<64x32xbf16>, vector<32x128xbf16>, vector<64x128xf32> -> vector<64x128xf32>
    %178 = arith.addf %174, %177 : vector<64x128xf32>
    %179 = vector.broadcast %119 : vector<64x1xf32> to vector<64x128xf32>
    %180 = arith.addf %178, %179 : vector<64x128xf32>
    %181 = arith.negf %180 : vector<64x128xf32>
    %182 = math.exp %181 : vector<64x128xf32>
    %cst_96 = arith.constant 1.000000e+00 : f32
    %183 = vector.broadcast %cst_96 : f32 to vector<64x128xf32>
    %184 = arith.addf %183, %182 : vector<64x128xf32>
    %185 = arith.divf %183, %184 : vector<64x128xf32>
    %186 = vector.extract_strided_slice %185 {offsets = [0, 0], sizes = [32, 128], strides = [1, 1]} : vector<64x128xf32> to vector<32x128xf32>
    %187 = vector.extract_strided_slice %185 {offsets = [32, 0], sizes = [32, 128], strides = [1, 1]} : vector<64x128xf32> to vector<32x128xf32>
    %188 = arith.mulf %186, %107 : vector<32x128xf32>
    %189 = arith.truncf %188 : vector<32x128xf32> to vector<32x128xbf16>
    %cst_97 = arith.constant dense<0.000000e+00> : vector<32x128xf32>
    %190 = tpu.matmul %189, %4, %cst_97 {dimension_numbers = #tpu.dot_dimension_numbers<[1], [0], [0], [1], [0, 0, 1, 1], [], []>} : vector<32x128xbf16>, vector<128x128xbf16>, vector<32x128xf32> -> vector<32x128xf32>
    %191 = arith.truncf %190 : vector<32x128xf32> to vector<32x128xbf16>
    %cst_98 = arith.constant dense<0.000000e+00> : vector<32x128xf32>
    %192 = tpu.matmul %191, %4, %cst_98 {dimension_numbers = #tpu.dot_dimension_numbers<[1], [0], [0], [1], [0, 0, 1, 1], [], []>} : vector<32x128xbf16>, vector<128x128xbf16>, vector<32x128xf32> -> vector<32x128xf32>
    %193 = arith.truncf %188 : vector<32x128xf32> to vector<32x128xbf16>
    %cst_99 = arith.constant dense<0.000000e+00> : vector<32x128xf32>
    %194 = tpu.matmul %193, %6, %cst_99 {dimension_numbers = #tpu.dot_dimension_numbers<[1], [0], [0], [1], [0, 0, 1, 1], [], []>} : vector<32x128xbf16>, vector<128x128xbf16>, vector<32x128xf32> -> vector<32x128xf32>
    %195 = arith.truncf %194 : vector<32x128xf32> to vector<32x128xbf16>
    %cst_100 = arith.constant dense<0.000000e+00> : vector<32x128xf32>
    %196 = tpu.matmul %195, %6, %cst_100 {dimension_numbers = #tpu.dot_dimension_numbers<[1], [0], [0], [1], [0, 0, 1, 1], [], []>} : vector<32x128xbf16>, vector<128x128xbf16>, vector<32x128xf32> -> vector<32x128xf32>
    %c0_101 = arith.constant 0 : index
    %c0_102 = arith.constant 0 : index
    %c0_103 = arith.constant 0 : index
    %197 = vector.load %arg18[%c0_101, %c0_102, %c0_103] : memref<1x32x170xbf16, #tpu.memory_space<vmem>>, vector<1x32x170xbf16>
    %198 = vector.shape_cast %197 : vector<1x32x170xbf16> to vector<32x170xbf16>
    %c0_104 = arith.constant 0 : index
    %c0_105 = arith.constant 0 : index
    %c0_106 = arith.constant 0 : index
    %199 = vector.load %arg19[%c0_104, %c0_105, %c0_106] : memref<1x32x1xf32, #tpu.memory_space<vmem>>, vector<1x32x1xf32>
    %200 = vector.shape_cast %199 : vector<1x32x1xf32> to vector<32x1xf32>
    %201 = vector.extract_strided_slice %198 {offsets = [0, 0], sizes = [32, 1], strides = [1, 1]} : vector<32x170xbf16> to vector<32x1xbf16>
    %202 = arith.truncf %90 : vector<1x128xf32> to vector<1x128xbf16>
    %cst_107 = arith.constant dense<0.000000e+00> : vector<32x128xf32>
    %203 = tpu.matmul %201, %202, %cst_107 {dimension_numbers = #tpu.dot_dimension_numbers<[1], [0], [0], [1], [0, 0, 1, 1], [], []>} : vector<32x1xbf16>, vector<1x128xbf16>, vector<32x128xf32> -> vector<32x128xf32>
    %204 = vector.extract_strided_slice %198 {offsets = [0, 1], sizes = [32, 1], strides = [1, 1]} : vector<32x170xbf16> to vector<32x1xbf16>
    %205 = arith.truncf %10 : vector<1x128xf32> to vector<1x128xbf16>
    %cst_108 = arith.constant dense<0.000000e+00> : vector<32x128xf32>
    %206 = tpu.matmul %204, %205, %cst_108 {dimension_numbers = #tpu.dot_dimension_numbers<[1], [0], [0], [1], [0, 0, 1, 1], [], []>} : vector<32x1xbf16>, vector<1x128xbf16>, vector<32x128xf32> -> vector<32x128xf32>
    %207 = arith.addf %203, %206 : vector<32x128xf32>
    %208 = vector.extract_strided_slice %198 {offsets = [0, 2], sizes = [32, 32], strides = [1, 1]} : vector<32x170xbf16> to vector<32x32xbf16>
    %209 = arith.truncf %188 : vector<32x128xf32> to vector<32x128xbf16>
    %cst_109 = arith.constant dense<0.000000e+00> : vector<32x128xf32>
    %210 = tpu.matmul %208, %209, %cst_109 {dimension_numbers = #tpu.dot_dimension_numbers<[1], [0], [0], [1], [0, 0, 1, 1], [], []>} : vector<32x32xbf16>, vector<32x128xbf16>, vector<32x128xf32> -> vector<32x128xf32>
    %211 = arith.addf %207, %210 : vector<32x128xf32>
    %212 = vector.extract_strided_slice %198 {offsets = [0, 34], sizes = [32, 1], strides = [1, 1]} : vector<32x170xbf16> to vector<32x1xbf16>
    %213 = arith.truncf %92 : vector<1x128xf32> to vector<1x128xbf16>
    %cst_110 = arith.constant dense<0.000000e+00> : vector<32x128xf32>
    %214 = tpu.matmul %212, %213, %cst_110 {dimension_numbers = #tpu.dot_dimension_numbers<[1], [0], [0], [1], [0, 0, 1, 1], [], []>} : vector<32x1xbf16>, vector<1x128xbf16>, vector<32x128xf32> -> vector<32x128xf32>
    %215 = arith.addf %211, %214 : vector<32x128xf32>
    %216 = vector.extract_strided_slice %198 {offsets = [0, 35], sizes = [32, 1], strides = [1, 1]} : vector<32x170xbf16> to vector<32x1xbf16>
    %217 = arith.truncf %100 : vector<1x128xf32> to vector<1x128xbf16>
    %cst_111 = arith.constant dense<0.000000e+00> : vector<32x128xf32>
    %218 = tpu.matmul %216, %217, %cst_111 {dimension_numbers = #tpu.dot_dimension_numbers<[1], [0], [0], [1], [0, 0, 1, 1], [], []>} : vector<32x1xbf16>, vector<1x128xbf16>, vector<32x128xf32> -> vector<32x128xf32>
    %219 = arith.addf %215, %218 : vector<32x128xf32>
    %220 = vector.extract_strided_slice %198 {offsets = [0, 36], sizes = [32, 32], strides = [1, 1]} : vector<32x170xbf16> to vector<32x32xbf16>
    %221 = arith.truncf %190 : vector<32x128xf32> to vector<32x128xbf16>
    %cst_112 = arith.constant dense<0.000000e+00> : vector<32x128xf32>
    %222 = tpu.matmul %220, %221, %cst_112 {dimension_numbers = #tpu.dot_dimension_numbers<[1], [0], [0], [1], [0, 0, 1, 1], [], []>} : vector<32x32xbf16>, vector<32x128xbf16>, vector<32x128xf32> -> vector<32x128xf32>
    %223 = arith.addf %219, %222 : vector<32x128xf32>
    %224 = vector.extract_strided_slice %198 {offsets = [0, 68], sizes = [32, 1], strides = [1, 1]} : vector<32x170xbf16> to vector<32x1xbf16>
    %225 = arith.truncf %94 : vector<1x128xf32> to vector<1x128xbf16>
    %cst_113 = arith.constant dense<0.000000e+00> : vector<32x128xf32>
    %226 = tpu.matmul %224, %225, %cst_113 {dimension_numbers = #tpu.dot_dimension_numbers<[1], [0], [0], [1], [0, 0, 1, 1], [], []>} : vector<32x1xbf16>, vector<1x128xbf16>, vector<32x128xf32> -> vector<32x128xf32>
    %227 = arith.addf %223, %226 : vector<32x128xf32>
    %228 = vector.extract_strided_slice %198 {offsets = [0, 69], sizes = [32, 1], strides = [1, 1]} : vector<32x170xbf16> to vector<32x1xbf16>
    %229 = arith.truncf %102 : vector<1x128xf32> to vector<1x128xbf16>
    %cst_114 = arith.constant dense<0.000000e+00> : vector<32x128xf32>
    %230 = tpu.matmul %228, %229, %cst_114 {dimension_numbers = #tpu.dot_dimension_numbers<[1], [0], [0], [1], [0, 0, 1, 1], [], []>} : vector<32x1xbf16>, vector<1x128xbf16>, vector<32x128xf32> -> vector<32x128xf32>
    %231 = arith.addf %227, %230 : vector<32x128xf32>
    %232 = vector.extract_strided_slice %198 {offsets = [0, 70], sizes = [32, 32], strides = [1, 1]} : vector<32x170xbf16> to vector<32x32xbf16>
    %233 = arith.truncf %192 : vector<32x128xf32> to vector<32x128xbf16>
    %cst_115 = arith.constant dense<0.000000e+00> : vector<32x128xf32>
    %234 = tpu.matmul %232, %233, %cst_115 {dimension_numbers = #tpu.dot_dimension_numbers<[1], [0], [0], [1], [0, 0, 1, 1], [], []>} : vector<32x32xbf16>, vector<32x128xbf16>, vector<32x128xf32> -> vector<32x128xf32>
    %235 = arith.addf %231, %234 : vector<32x128xf32>
    %236 = vector.extract_strided_slice %198 {offsets = [0, 102], sizes = [32, 1], strides = [1, 1]} : vector<32x170xbf16> to vector<32x1xbf16>
    %237 = arith.truncf %96 : vector<1x128xf32> to vector<1x128xbf16>
    %cst_116 = arith.constant dense<0.000000e+00> : vector<32x128xf32>
    %238 = tpu.matmul %236, %237, %cst_116 {dimension_numbers = #tpu.dot_dimension_numbers<[1], [0], [0], [1], [0, 0, 1, 1], [], []>} : vector<32x1xbf16>, vector<1x128xbf16>, vector<32x128xf32> -> vector<32x128xf32>
    %239 = arith.addf %235, %238 : vector<32x128xf32>
    %240 = vector.extract_strided_slice %198 {offsets = [0, 103], sizes = [32, 1], strides = [1, 1]} : vector<32x170xbf16> to vector<32x1xbf16>
    %241 = arith.truncf %104 : vector<1x128xf32> to vector<1x128xbf16>
    %cst_117 = arith.constant dense<0.000000e+00> : vector<32x128xf32>
    %242 = tpu.matmul %240, %241, %cst_117 {dimension_numbers = #tpu.dot_dimension_numbers<[1], [0], [0], [1], [0, 0, 1, 1], [], []>} : vector<32x1xbf16>, vector<1x128xbf16>, vector<32x128xf32> -> vector<32x128xf32>
    %243 = arith.addf %239, %242 : vector<32x128xf32>
    %244 = vector.extract_strided_slice %198 {offsets = [0, 104], sizes = [32, 32], strides = [1, 1]} : vector<32x170xbf16> to vector<32x32xbf16>
    %245 = arith.truncf %194 : vector<32x128xf32> to vector<32x128xbf16>
    %cst_118 = arith.constant dense<0.000000e+00> : vector<32x128xf32>
    %246 = tpu.matmul %244, %245, %cst_118 {dimension_numbers = #tpu.dot_dimension_numbers<[1], [0], [0], [1], [0, 0, 1, 1], [], []>} : vector<32x32xbf16>, vector<32x128xbf16>, vector<32x128xf32> -> vector<32x128xf32>
    %247 = arith.addf %243, %246 : vector<32x128xf32>
    %248 = vector.extract_strided_slice %198 {offsets = [0, 136], sizes = [32, 1], strides = [1, 1]} : vector<32x170xbf16> to vector<32x1xbf16>
    %249 = arith.truncf %98 : vector<1x128xf32> to vector<1x128xbf16>
    %cst_119 = arith.constant dense<0.000000e+00> : vector<32x128xf32>
    %250 = tpu.matmul %248, %249, %cst_119 {dimension_numbers = #tpu.dot_dimension_numbers<[1], [0], [0], [1], [0, 0, 1, 1], [], []>} : vector<32x1xbf16>, vector<1x128xbf16>, vector<32x128xf32> -> vector<32x128xf32>
    %251 = arith.addf %247, %250 : vector<32x128xf32>
    %252 = vector.extract_strided_slice %198 {offsets = [0, 137], sizes = [32, 1], strides = [1, 1]} : vector<32x170xbf16> to vector<32x1xbf16>
    %253 = arith.truncf %106 : vector<1x128xf32> to vector<1x128xbf16>
    %cst_120 = arith.constant dense<0.000000e+00> : vector<32x128xf32>
    %254 = tpu.matmul %252, %253, %cst_120 {dimension_numbers = #tpu.dot_dimension_numbers<[1], [0], [0], [1], [0, 0, 1, 1], [], []>} : vector<32x1xbf16>, vector<1x128xbf16>, vector<32x128xf32> -> vector<32x128xf32>
    %255 = arith.addf %251, %254 : vector<32x128xf32>
    %256 = vector.extract_strided_slice %198 {offsets = [0, 138], sizes = [32, 32], strides = [1, 1]} : vector<32x170xbf16> to vector<32x32xbf16>
    %257 = arith.truncf %196 : vector<32x128xf32> to vector<32x128xbf16>
    %cst_121 = arith.constant dense<0.000000e+00> : vector<32x128xf32>
    %258 = tpu.matmul %256, %257, %cst_121 {dimension_numbers = #tpu.dot_dimension_numbers<[1], [0], [0], [1], [0, 0, 1, 1], [], []>} : vector<32x32xbf16>, vector<32x128xbf16>, vector<32x128xf32> -> vector<32x128xf32>
    %259 = arith.addf %255, %258 : vector<32x128xf32>
    %260 = vector.broadcast %200 : vector<32x1xf32> to vector<32x128xf32>
    %261 = arith.addf %259, %260 : vector<32x128xf32>
    %262 = math.tanh %261 : vector<32x128xf32>
    %263 = arith.mulf %187, %107 : vector<32x128xf32>
    %cst_122 = arith.constant 1.000000e+00 : f32
    %264 = vector.broadcast %cst_122 : f32 to vector<32x128xf32>
    %265 = arith.subf %264, %187 : vector<32x128xf32>
    %266 = arith.mulf %265, %262 : vector<32x128xf32>
    %267 = arith.addf %263, %266 : vector<32x128xf32>
    %c0_123 = arith.constant 0 : index
    %c0_124 = arith.constant 0 : index
    %268 = vector.load %arg24[%c0_123, %c0_124] : memref<32x128xf32, #tpu.memory_space<vmem>>, vector<32x128xf32>
    tpu.vector_store %arg24[%c0_123, %c0_124], %267 {strides = array<i32>} : memref<32x128xf32, #tpu.memory_space<vmem>>, vector<32x128xf32>,
    %c0_125 = arith.constant 0 : index
    %c0_126 = arith.constant 0 : index
    %c0_127 = arith.constant 0 : index
    %c0_128 = arith.constant 0 : index
    %269 = vector.load %arg22[%c0_125, %c0_126, %c0_127, %c0_128] : memref<1x1x1x128xf32, #tpu.memory_space<vmem>>, vector<1x1x1x128xf32>
    %270 = vector.shape_cast %269 : vector<1x1x1x128xf32> to vector<1x128xf32>
    %271 = vector.shape_cast %21 : vector<1x128xf32> to vector<1x1x1x128xf32>
    tpu.vector_store %arg22[%c0_125, %c0_126, %c0_127, %c0_128], %271 {strides = array<i32>} : memref<1x1x1x128xf32, #tpu.memory_space<vmem>>, vector<1x1x1x128xf32>,
    %c0_129 = arith.constant 0 : index
    %c0_130 = arith.constant 0 : index
    %c0_131 = arith.constant 0 : index
    %c0_132 = arith.constant 0 : index
    %272 = vector.load %arg21[%c0_129, %c0_130, %c0_131, %c0_132] : memref<1x1x1x128xf32, #tpu.memory_space<vmem>>, vector<1x1x1x128xf32>
    %273 = vector.shape_cast %272 : vector<1x1x1x128xf32> to vector<1x128xf32>
    %274 = vector.shape_cast %89 : vector<1x128xf32> to vector<1x1x1x128xf32>
    tpu.vector_store %arg21[%c0_129, %c0_130, %c0_131, %c0_132], %274 {strides = array<i32>} : memref<1x1x1x128xf32, #tpu.memory_space<vmem>>, vector<1x1x1x128xf32>,
    %c0_133 = arith.constant 0 : index
    %c0_134 = arith.constant 0 : index
    %c0_135 = arith.constant 0 : index
    %c0_136 = arith.constant 0 : index
    %275 = vector.load %arg23[%c0_133, %c0_134, %c0_135, %c0_136] : memref<1x1x64x128xf32, #tpu.memory_space<vmem>>, vector<1x1x32x128xf32>
    %276 = vector.shape_cast %275 : vector<1x1x32x128xf32> to vector<32x128xf32>
    %277 = vector.shape_cast %76 : vector<32x128xf32> to vector<1x1x32x128xf32>
    tpu.vector_store %arg23[%c0_133, %c0_134, %c0_135, %c0_136], %277 {strides = array<i32>} : memref<1x1x64x128xf32, #tpu.memory_space<vmem>>, vector<1x1x32x128xf32>,
    %c0_137 = arith.constant 0 : index
    %c0_138 = arith.constant 0 : index
    %c32 = arith.constant 32 : index
    %c0_139 = arith.constant 0 : index
    %278 = vector.load %arg23[%c0_137, %c0_138, %c32, %c0_139] : memref<1x1x64x128xf32, #tpu.memory_space<vmem>>, vector<1x1x32x128xf32>
    %279 = vector.shape_cast %278 : vector<1x1x32x128xf32> to vector<32x128xf32>
    %280 = vector.shape_cast %13 : vector<32x128xf32> to vector<1x1x32x128xf32>
    tpu.vector_store %arg23[%c0_137, %c0_138, %c32, %c0_139], %280 {strides = array<i32>} : memref<1x1x64x128xf32, #tpu.memory_space<vmem>>, vector<1x1x32x128xf32>,
    return
  }
  func.func @transform_0(%arg0: i32, %arg1: i32) -> (i32, i32, i32, i32) {
    %c0_i32 = arith.constant 0 : i32
    %c0_i32_0 = arith.constant 0 : i32
    %c0_i32_1 = arith.constant 0 : i32
    return %arg0, %arg1, %c0_i32, %c0_i32_0 : i32, i32, i32, i32
  }
  func.func @transform_1(%arg0: i32, %arg1: i32) -> (i32, i32, i32, i32) {
    %c0_i32 = arith.constant 0 : i32
    %c0_i32_0 = arith.constant 0 : i32
    %c0_i32_1 = arith.constant 0 : i32
    return %arg0, %arg1, %c0_i32, %c0_i32_0 : i32, i32, i32, i32
  }
  func.func @transform_2(%arg0: i32, %arg1: i32) -> (i32, i32, i32) {
    %c0_i32 = arith.constant 0 : i32
    %c0_i32_0 = arith.constant 0 : i32
    %c0_i32_1 = arith.constant 0 : i32
    %c0_i32_2 = arith.constant 0 : i32
    return %c0_i32, %c0_i32_0, %c0_i32_1 : i32, i32, i32
  }
  func.func @transform_3(%arg0: i32, %arg1: i32) -> (i32, i32, i32) {
    %c0_i32 = arith.constant 0 : i32
    %c0_i32_0 = arith.constant 0 : i32
    %c0_i32_1 = arith.constant 0 : i32
    return %arg0, %c0_i32, %c0_i32_0 : i32, i32, i32
  }
  func.func @transform_4(%arg0: i32, %arg1: i32) -> (i32, i32, i32) {
    %c0_i32 = arith.constant 0 : i32
    %c0_i32_0 = arith.constant 0 : i32
    %c0_i32_1 = arith.constant 0 : i32
    return %arg0, %c0_i32, %c0_i32_0 : i32, i32, i32
  }
  func.func @transform_5(%arg0: i32, %arg1: i32) -> (i32, i32, i32) {
    %c0_i32 = arith.constant 0 : i32
    %c0_i32_0 = arith.constant 0 : i32
    %c0_i32_1 = arith.constant 0 : i32
    return %arg0, %c0_i32, %c0_i32_0 : i32, i32, i32
  }
  func.func @transform_6(%arg0: i32, %arg1: i32) -> (i32, i32, i32) {
    %c0_i32 = arith.constant 0 : i32
    %c0_i32_0 = arith.constant 0 : i32
    %c0_i32_1 = arith.constant 0 : i32
    return %arg0, %c0_i32, %c0_i32_0 : i32, i32, i32
  }
  func.func @transform_7(%arg0: i32, %arg1: i32) -> (i32, i32, i32) {
    %c0_i32 = arith.constant 0 : i32
    %c0_i32_0 = arith.constant 0 : i32
    %c0_i32_1 = arith.constant 0 : i32
    return %arg0, %c0_i32, %c0_i32_0 : i32, i32, i32
  }
  func.func @transform_8(%arg0: i32, %arg1: i32) -> (i32, i32, i32) {
    %c0_i32 = arith.constant 0 : i32
    %c0_i32_0 = arith.constant 0 : i32
    %c0_i32_1 = arith.constant 0 : i32
    return %arg0, %c0_i32, %c0_i32_0 : i32, i32, i32
  }
  func.func @transform_9(%arg0: i32, %arg1: i32) -> (i32, i32, i32) {
    %c0_i32 = arith.constant 0 : i32
    %c0_i32_0 = arith.constant 0 : i32
    %c0_i32_1 = arith.constant 0 : i32
    return %arg0, %c0_i32, %c0_i32_0 : i32, i32, i32
  }
  func.func @transform_10(%arg0: i32, %arg1: i32) -> (i32, i32, i32) {
    %c0_i32 = arith.constant 0 : i32
    %c0_i32_0 = arith.constant 0 : i32
    %c0_i32_1 = arith.constant 0 : i32
    return %arg0, %c0_i32, %c0_i32_0 : i32, i32, i32
  }
  func.func @transform_11(%arg0: i32, %arg1: i32) -> (i32, i32, i32) {
    %c0_i32 = arith.constant 0 : i32
    %c0_i32_0 = arith.constant 0 : i32
    %c0_i32_1 = arith.constant 0 : i32
    return %arg0, %c0_i32, %c0_i32_0 : i32, i32, i32
  }
  func.func @transform_12(%arg0: i32, %arg1: i32) -> (i32, i32, i32) {
    %c0_i32 = arith.constant 0 : i32
    %c0_i32_0 = arith.constant 0 : i32
    %c0_i32_1 = arith.constant 0 : i32
    return %arg0, %c0_i32, %c0_i32_0 : i32, i32, i32
  }
  func.func @transform_13(%arg0: i32, %arg1: i32) -> (i32, i32, i32) {
    %c0_i32 = arith.constant 0 : i32
    %c0_i32_0 = arith.constant 0 : i32
    %c0_i32_1 = arith.constant 0 : i32
    return %arg0, %c0_i32, %c0_i32_0 : i32, i32, i32
  }
  func.func @transform_14(%arg0: i32, %arg1: i32) -> (i32, i32, i32) {
    %c0_i32 = arith.constant 0 : i32
    %c0_i32_0 = arith.constant 0 : i32
    %c0_i32_1 = arith.constant 0 : i32
    return %arg0, %c0_i32, %c0_i32_0 : i32, i32, i32
  }
  func.func @transform_15(%arg0: i32, %arg1: i32) -> (i32, i32, i32) {
    %c0_i32 = arith.constant 0 : i32
    %c0_i32_0 = arith.constant 0 : i32
    %c0_i32_1 = arith.constant 0 : i32
    return %arg0, %c0_i32, %c0_i32_0 : i32, i32, i32
  }
  func.func @transform_16(%arg0: i32, %arg1: i32) -> (i32, i32, i32) {
    %c0_i32 = arith.constant 0 : i32
    %c0_i32_0 = arith.constant 0 : i32
    %c0_i32_1 = arith.constant 0 : i32
    return %arg0, %c0_i32, %c0_i32_0 : i32, i32, i32
  }
  func.func @transform_17(%arg0: i32, %arg1: i32) -> (i32, i32, i32) {
    %c0_i32 = arith.constant 0 : i32
    %c0_i32_0 = arith.constant 0 : i32
    %c0_i32_1 = arith.constant 0 : i32
    return %arg0, %c0_i32, %c0_i32_0 : i32, i32, i32
  }
  func.func @transform_18(%arg0: i32, %arg1: i32) -> (i32, i32, i32) {
    %c0_i32 = arith.constant 0 : i32
    %c0_i32_0 = arith.constant 0 : i32
    %c0_i32_1 = arith.constant 0 : i32
    return %arg0, %c0_i32, %c0_i32_0 : i32, i32, i32
  }
  func.func @transform_19(%arg0: i32, %arg1: i32) -> (i32, i32, i32, i32) {
    %c0_i32 = arith.constant 0 : i32
    %c0_i32_0 = arith.constant 0 : i32
    %c0_i32_1 = arith.constant 0 : i32
    return %arg0, %arg1, %c0_i32, %c0_i32_0 : i32, i32, i32, i32
  }
  func.func @transform_20(%arg0: i32, %arg1: i32) -> (i32, i32, i32, i32) {
    %c0_i32 = arith.constant 0 : i32
    %c0_i32_0 = arith.constant 0 : i32
    %c0_i32_1 = arith.constant 0 : i32
    return %arg0, %arg1, %c0_i32, %c0_i32_0 : i32, i32, i32, i32
  }
  func.func @transform_21(%arg0: i32, %arg1: i32) -> (i32, i32, i32, i32) {
    %c0_i32 = arith.constant 0 : i32
    %c0_i32_0 = arith.constant 0 : i32
    %c0_i32_1 = arith.constant 0 : i32
    return %arg0, %arg1, %c0_i32, %c0_i32_0 : i32, i32, i32, i32
  }
}

module attributes {stable_mosaic.version = 11 : i64} {
  func.func @kernel(%arg0: i32, %arg1: memref<64x128xf32, #tpu.memory_space<vmem>>, %arg2: memref<64x128xf32, #tpu.memory_space<vmem>>, %arg3: memref<1x128xf32, #tpu.memory_space<vmem>>, %arg4: memref<8x128xf32, #tpu.memory_space<vmem>>, %arg5: memref<32x137xbf16, #tpu.memory_space<vmem>>, %arg6: memref<32x1xf32, #tpu.memory_space<vmem>>, %arg7: memref<1x32xbf16, #tpu.memory_space<vmem>>, %arg8: memref<1x1xf32, #tpu.memory_space<vmem>>, %arg9: memref<1x128xf32, #tpu.memory_space<vmem>>) attributes {dimension_semantics = [#tpu.dimension_semantics<parallel>], iteration_bounds = array<i64: 2>, scalar_prefetch = 0 : i64, scratch_operands = 0 : i64, tpu.core_type = #tpu.core_type<tc>, window_params = [{transform_indices = @transform_0, window_bounds = array<i64: 64, 128>}, {transform_indices = @transform_1, window_bounds = array<i64: 64, 128>}, {transform_indices = @transform_2, window_bounds = array<i64: 1, 128>}, {transform_indices = @transform_3, window_bounds = array<i64: 8, 128>}, {pipeline_mode = #tpu.pipeline_mode<synchronous>, transform_indices = @transform_4, window_bounds = array<i64: 32, 137>}, {pipeline_mode = #tpu.pipeline_mode<synchronous>, transform_indices = @transform_5, window_bounds = array<i64: 32, 1>}, {pipeline_mode = #tpu.pipeline_mode<synchronous>, transform_indices = @transform_6, window_bounds = array<i64: 1, 32>}, {pipeline_mode = #tpu.pipeline_mode<synchronous>, transform_indices = @transform_7, window_bounds = array<i64: 1, 1>}, {transform_indices = @transform_8, window_bounds = array<i64: 1, 128>}]} {
    %c0 = arith.constant 0 : index
    %c0_0 = arith.constant 0 : index
    %0 = vector.load %arg5[%c0, %c0_0] : memref<32x137xbf16, #tpu.memory_space<vmem>>, vector<32x137xbf16>
    %1 = vector.extract_strided_slice %0 {offsets = [0, 0], sizes = [32, 64], strides = [1, 1]} : vector<32x137xbf16> to vector<32x64xbf16>
    %c0_1 = arith.constant 0 : index
    %c0_2 = arith.constant 0 : index
    %2 = vector.load %arg1[%c0_1, %c0_2] : memref<64x128xf32, #tpu.memory_space<vmem>>, vector<64x128xf32>
    %3 = arith.truncf %2 : vector<64x128xf32> to vector<64x128xbf16>
    %cst = arith.constant dense<0.000000e+00> : vector<32x128xf32>
    %4 = tpu.matmul %1, %3, %cst {dimension_numbers = #tpu.dot_dimension_numbers<[1], [0], [0], [1], [0, 0, 1, 1], [], []>} : vector<32x64xbf16>, vector<64x128xbf16>, vector<32x128xf32> -> vector<32x128xf32>
    %5 = vector.extract_strided_slice %0 {offsets = [0, 64], sizes = [32, 64], strides = [1, 1]} : vector<32x137xbf16> to vector<32x64xbf16>
    %c0_3 = arith.constant 0 : index
    %c0_4 = arith.constant 0 : index
    %6 = vector.load %arg2[%c0_3, %c0_4] : memref<64x128xf32, #tpu.memory_space<vmem>>, vector<64x128xf32>
    %7 = arith.truncf %6 : vector<64x128xf32> to vector<64x128xbf16>
    %cst_5 = arith.constant dense<0.000000e+00> : vector<32x128xf32>
    %8 = tpu.matmul %5, %7, %cst_5 {dimension_numbers = #tpu.dot_dimension_numbers<[1], [0], [0], [1], [0, 0, 1, 1], [], []>} : vector<32x64xbf16>, vector<64x128xbf16>, vector<32x128xf32> -> vector<32x128xf32>
    %9 = arith.addf %4, %8 : vector<32x128xf32>
    %10 = vector.extract_strided_slice %0 {offsets = [0, 128], sizes = [32, 1], strides = [1, 1]} : vector<32x137xbf16> to vector<32x1xbf16>
    %c0_6 = arith.constant 0 : index
    %c0_7 = arith.constant 0 : index
    %11 = vector.load %arg3[%c0_6, %c0_7] : memref<1x128xf32, #tpu.memory_space<vmem>>, vector<1x128xf32>
    %12 = arith.truncf %11 : vector<1x128xf32> to vector<1x128xbf16>
    %cst_8 = arith.constant dense<0.000000e+00> : vector<32x128xf32>
    %13 = tpu.matmul %10, %12, %cst_8 {dimension_numbers = #tpu.dot_dimension_numbers<[1], [0], [0], [1], [0, 0, 1, 1], [], []>} : vector<32x1xbf16>, vector<1x128xbf16>, vector<32x128xf32> -> vector<32x128xf32>
    %14 = arith.addf %9, %13 : vector<32x128xf32>
    %15 = vector.extract_strided_slice %0 {offsets = [0, 129], sizes = [32, 8], strides = [1, 1]} : vector<32x137xbf16> to vector<32x8xbf16>
    %c0_9 = arith.constant 0 : index
    %c0_10 = arith.constant 0 : index
    %16 = vector.load %arg4[%c0_9, %c0_10] : memref<8x128xf32, #tpu.memory_space<vmem>>, vector<8x128xf32>
    %17 = arith.truncf %16 : vector<8x128xf32> to vector<8x128xbf16>
    %cst_11 = arith.constant dense<0.000000e+00> : vector<32x128xf32>
    %18 = tpu.matmul %15, %17, %cst_11 {dimension_numbers = #tpu.dot_dimension_numbers<[1], [0], [0], [1], [0, 0, 1, 1], [], []>} : vector<32x8xbf16>, vector<8x128xbf16>, vector<32x128xf32> -> vector<32x128xf32>
    %19 = arith.addf %14, %18 : vector<32x128xf32>
    %c0_12 = arith.constant 0 : index
    %c0_13 = arith.constant 0 : index
    %20 = vector.load %arg6[%c0_12, %c0_13] : memref<32x1xf32, #tpu.memory_space<vmem>>, vector<32x1xf32>
    %21 = vector.broadcast %20 : vector<32x1xf32> to vector<32x128xf32>
    %22 = arith.addf %19, %21 : vector<32x128xf32>
    %cst_14 = arith.constant 0.000000e+00 : f32
    %23 = vector.broadcast %cst_14 : f32 to vector<32x128xf32>
    %24 = arith.maximumf %22, %23 : vector<32x128xf32>
    %c0_15 = arith.constant 0 : index
    %c0_16 = arith.constant 0 : index
    %25 = vector.load %arg7[%c0_15, %c0_16] : memref<1x32xbf16, #tpu.memory_space<vmem>>, vector<1x32xbf16>
    %26 = arith.truncf %24 : vector<32x128xf32> to vector<32x128xbf16>
    %cst_17 = arith.constant dense<0.000000e+00> : vector<1x128xf32>
    %27 = tpu.matmul %25, %26, %cst_17 {dimension_numbers = #tpu.dot_dimension_numbers<[1], [0], [0], [1], [0, 0, 1, 1], [], []>} : vector<1x32xbf16>, vector<32x128xbf16>, vector<1x128xf32> -> vector<1x128xf32>
    %c0_18 = arith.constant 0 : index
    %c0_19 = arith.constant 0 : index
    %28 = vector.load %arg8[%c0_18, %c0_19] : memref<1x1xf32, #tpu.memory_space<vmem>>, vector<1x1xf32>
    %29 = vector.broadcast %28 : vector<1x1xf32> to vector<1x128xf32>
    %30 = arith.addf %27, %29 : vector<1x128xf32>
    %c0_20 = arith.constant 0 : index
    %c0_21 = arith.constant 0 : index
    %31 = vector.load %arg9[%c0_20, %c0_21] : memref<1x128xf32, #tpu.memory_space<vmem>>, vector<1x128xf32>
    tpu.vector_store %arg9[%c0_20, %c0_21], %30 {strides = array<i32>} : memref<1x128xf32, #tpu.memory_space<vmem>>, vector<1x128xf32>,
    return
  }
  func.func @transform_0(%arg0: i32) -> (i32, i32) {
    %c0_i32 = arith.constant 0 : i32
    %c0_i32_0 = arith.constant 0 : i32
    return %c0_i32, %arg0 : i32, i32
  }
  func.func @transform_1(%arg0: i32) -> (i32, i32) {
    %c0_i32 = arith.constant 0 : i32
    %c0_i32_0 = arith.constant 0 : i32
    return %c0_i32, %arg0 : i32, i32
  }
  func.func @transform_2(%arg0: i32) -> (i32, i32) {
    %c0_i32 = arith.constant 0 : i32
    %c0_i32_0 = arith.constant 0 : i32
    return %c0_i32, %arg0 : i32, i32
  }
  func.func @transform_3(%arg0: i32) -> (i32, i32) {
    %c0_i32 = arith.constant 0 : i32
    %c0_i32_0 = arith.constant 0 : i32
    return %c0_i32, %arg0 : i32, i32
  }
  func.func @transform_4(%arg0: i32) -> (i32, i32) {
    %c0_i32 = arith.constant 0 : i32
    %c0_i32_0 = arith.constant 0 : i32
    %c0_i32_1 = arith.constant 0 : i32
    return %c0_i32, %c0_i32_0 : i32, i32
  }
  func.func @transform_5(%arg0: i32) -> (i32, i32) {
    %c0_i32 = arith.constant 0 : i32
    %c0_i32_0 = arith.constant 0 : i32
    %c0_i32_1 = arith.constant 0 : i32
    return %c0_i32, %c0_i32_0 : i32, i32
  }
  func.func @transform_6(%arg0: i32) -> (i32, i32) {
    %c0_i32 = arith.constant 0 : i32
    %c0_i32_0 = arith.constant 0 : i32
    %c0_i32_1 = arith.constant 0 : i32
    return %c0_i32, %c0_i32_0 : i32, i32
  }
  func.func @transform_7(%arg0: i32) -> (i32, i32) {
    %c0_i32 = arith.constant 0 : i32
    %c0_i32_0 = arith.constant 0 : i32
    %c0_i32_1 = arith.constant 0 : i32
    return %c0_i32, %c0_i32_0 : i32, i32
  }
  func.func @transform_8(%arg0: i32) -> (i32, i32) {
    %c0_i32 = arith.constant 0 : i32
    %c0_i32_0 = arith.constant 0 : i32
    return %c0_i32, %arg0 : i32, i32
  }
}

</mosaic_0001>

<bundles_post_ra>
// kernel: reverse
= control target key start
LH: loop header
LB: loop body
LE: loop exit
PB: predicated region body
PF: predicated region fallthrough
CT: control target
= control target key end

     0   :  { %s776_s0 = inlined_call_operand.vmem [shape: f32[8,64,32], index: 0, kind: input, shape index: {}]   ;;  %s777_s1 = inlined_call_operand.vmem [shape: f32[8,64,32], index: 1, kind: output, shape index: {}]  }
   0x1   :  { %v256_v0 = vld [vmem:[%s776_s0 + $0x1c0] sm:$0xff]  ;;  %v270_v8 = vld [vmem:[%s776_s0 + $0x1c8] sm:$0xff]  ;;  %v286_v16 = vld [vmem:[%s776_s0 + $0x1d0] sm:$0xff] }
   0x2   :  { %v257_v1 = vld [vmem:[%s776_s0 + $0x180] sm:$0xff]  ;;  %4 = vst [vmem:[%s777_s1] sm:$0xff] %v256_v0  ;;  %271 = vst [vmem:[%s777_s1 + $0x8] sm:$0xff] %v270_v8  ;;  %v272_v9 = vld [vmem:[%s776_s0 + $0x188] sm:$0xff] }
   0x3   :  { %v259_v2 = vld [vmem:[%s776_s0 + $0x140] sm:$0xff]  ;;  %258 = vst [vmem:[%s777_s1 + $0x40] sm:$0xff] %v257_v1  ;;  %v274_v10 = vld [vmem:[%s776_s0 + $0x148] sm:$0xff]  ;;  %273 = vst [vmem:[%s777_s1 + $0x48] sm:$0xff] %v272_v9 }
   0x4   :  { %260 = vst [vmem:[%s777_s1 + $0x80] sm:$0xff] %v259_v2  ;;  %v261_v3 = vld [vmem:[%s776_s0 + $0x100] sm:$0xff]  ;;  %v276_v11 = vld [vmem:[%s776_s0 + $0x108] sm:$0xff]  ;;  %275 = vst [vmem:[%s777_s1 + $0x88] sm:$0xff] %v274_v10 }
   0x5   :  { %v263_v4 = vld [vmem:[%s776_s0 + $0xc0] sm:$0xff]  ;;  %262 = vst [vmem:[%s777_s1 + $0xc0] sm:$0xff] %v261_v3  ;;  %277 = vst [vmem:[%s777_s1 + $0xc8] sm:$0xff] %v276_v11  ;;  %v278_v12 = vld [vmem:[%s776_s0 + $0xc8] sm:$0xff] }
   0x6   :  { %v265_v5 = vld [vmem:[%s776_s0 + $0x80] sm:$0xff]  ;;  %264 = vst [vmem:[%s777_s1 + $0x100] sm:$0xff] %v263_v4  ;;  %v280_v13 = vld [vmem:[%s776_s0 + $0x88] sm:$0xff]  ;;  %279 = vst [vmem:[%s777_s1 + $0x108] sm:$0xff] %v278_v12 }
   0x7   :  { %266 = vst [vmem:[%s777_s1 + $0x140] sm:$0xff] %v265_v5  ;;  %v267_v6 = vld [vmem:[%s776_s0 + $0x40] sm:$0xff]  ;;  %v282_v14 = vld [vmem:[%s776_s0 + $0x48] sm:$0xff]  ;;  %281 = vst [vmem:[%s777_s1 + $0x148] sm:$0xff] %v280_v13 }
   0x8   :  { %v29_v7 = vld [vmem:[%s776_s0] sm:$0xff]  ;;  %268 = vst [vmem:[%s777_s1 + $0x180] sm:$0xff] %v267_v6  ;;  %283 = vst [vmem:[%s777_s1 + $0x188] sm:$0xff] %v282_v14  ;;  %v284_v15 = vld [vmem:[%s776_s0 + $0x8] sm:$0xff] }
   0x9   :  { %269 = vst [vmem:[%s777_s1 + $0x1c0] sm:$0xff] %v29_v7  ;;  %v288_v17 = vld [vmem:[%s776_s0 + $0x190] sm:$0xff]  ;;  %285 = vst [vmem:[%s777_s1 + $0x1c8] sm:$0xff] %v284_v15  ;;  %v302_v24 = vld [vmem:[%s776_s0 + $0x1d8] sm:$0xff] }
   0xa   :  { %287 = vst [vmem:[%s777_s1 + $0x10] sm:$0xff] %v286_v16  ;;  %289 = vst [vmem:[%s777_s1 + $0x50] sm:$0xff] %v288_v17  ;;  %v290_v18 = vld [vmem:[%s776_s0 + $0x150] sm:$0xff]  ;;  %v304_v25 = vld [vmem:[%s776_s0 + $0x198] sm:$0xff] }
   0xb   :  { %v292_v19 = vld [vmem:[%s776_s0 + $0x110] sm:$0xff]  ;;  %291 = vst [vmem:[%s777_s1 + $0x90] sm:$0xff] %v290_v18  ;;  %v306_v26 = vld [vmem:[%s776_s0 + $0x158] sm:$0xff]  ;;  %303 = vst [vmem:[%s777_s1 + $0x18] sm:$0xff] %v302_v24 }
   0xc   :  { %v294_v20 = vld [vmem:[%s776_s0 + $0xd0] sm:$0xff]  ;;  %293 = vst [vmem:[%s777_s1 + $0xd0] sm:$0xff] %v292_v19  ;;  %305 = vst [vmem:[%s777_s1 + $0x58] sm:$0xff] %v304_v25  ;;  %v308_v27 = vld [vmem:[%s776_s0 + $0x118] sm:$0xff] }
   0xd   :  { %295 = vst [vmem:[%s777_s1 + $0x110] sm:$0xff] %v294_v20  ;;  %v296_v21 = vld [vmem:[%s776_s0 + $0x90] sm:$0xff]  ;;  %307 = vst [vmem:[%s777_s1 + $0x98] sm:$0xff] %v306_v26  ;;  %v310_v28 = vld [vmem:[%s776_s0 + $0xd8] sm:$0xff] }
   0xe   :  { %v298_v22 = vld [vmem:[%s776_s0 + $0x50] sm:$0xff]  ;;  %297 = vst [vmem:[%s777_s1 + $0x150] sm:$0xff] %v296_v21  ;;  %v312_v29 = vld [vmem:[%s776_s0 + $0x98] sm:$0xff]  ;;  %309 = vst [vmem:[%s777_s1 + $0xd8] sm:$0xff] %v308_v27 }
   0xf   :  { %v300_v23 = vld [vmem:[%s776_s0 + $0x10] sm:$0xff]  ;;  %299 = vst [vmem:[%s777_s1 + $0x190] sm:$0xff] %v298_v22  ;;  %311 = vst [vmem:[%s777_s1 + $0x118] sm:$0xff] %v310_v28  ;;  %v314_v30 = vld [vmem:[%s776_s0 + $0x58] sm:$0xff] }
  0x10   :  { %301 = vst [vmem:[%s777_s1 + $0x1d0] sm:$0xff] %v300_v23  ;;  %313 = vst [vmem:[%s777_s1 + $0x158] sm:$0xff] %v312_v29  ;;  %v316_v31 = vld [vmem:[%s776_s0 + $0x18] sm:$0xff]  ;;  %v318_v32 = vld [vmem:[%s776_s0 + $0x1e0] sm:$0xff] }
  0x11   :  { %315 = vst [vmem:[%s777_s1 + $0x198] sm:$0xff] %v314_v30  ;;  %317 = vst [vmem:[%s777_s1 + $0x1d8] sm:$0xff] %v316_v31  ;;  %v320_v33 = vld [vmem:[%s776_s0 + $0x1a0] sm:$0xff]  ;;  %v334_v40 = vld [vmem:[%s776_s0 + $0x1e8] sm:$0xff] }
  0x12   :  { %319 = vst [vmem:[%s777_s1 + $0x20] sm:$0xff] %v318_v32  ;;  %v322_v34 = vld [vmem:[%s776_s0 + $0x160] sm:$0xff]  ;;  %321 = vst [vmem:[%s777_s1 + $0x60] sm:$0xff] %v320_v33  ;;  %v336_v41 = vld [vmem:[%s776_s0 + $0x1a8] sm:$0xff] }
  0x13   :  { %v324_v35 = vld [vmem:[%s776_s0 + $0x120] sm:$0xff]  ;;  %323 = vst [vmem:[%s777_s1 + $0xa0] sm:$0xff] %v322_v34  ;;  %335 = vst [vmem:[%s777_s1 + $0x28] sm:$0xff] %v334_v40  ;;  %v338_v42 = vld [vmem:[%s776_s0 + $0x168] sm:$0xff] }
  0x14   :  { %325 = vst [vmem:[%s777_s1 + $0xe0] sm:$0xff] %v324_v35  ;;  %v326_v36 = vld [vmem:[%s776_s0 + $0xe0] sm:$0xff]  ;;  %337 = vst [vmem:[%s777_s1 + $0x68] sm:$0xff] %v336_v41  ;;  %v340_v43 = vld [vmem:[%s776_s0 + $0x128] sm:$0xff] }
  0x15   :  { %v328_v37 = vld [vmem:[%s776_s0 + $0xa0] sm:$0xff]  ;;  %327 = vst [vmem:[%s777_s1 + $0x120] sm:$0xff] %v326_v36  ;;  %v342_v44 = vld [vmem:[%s776_s0 + $0xe8] sm:$0xff]  ;;  %339 = vst [vmem:[%s777_s1 + $0xa8] sm:$0xff] %v338_v42 }
  0x16   :  { %v330_v38 = vld [vmem:[%s776_s0 + $0x60] sm:$0xff]  ;;  %329 = vst [vmem:[%s777_s1 + $0x160] sm:$0xff] %v328_v37  ;;  %341 = vst [vmem:[%s777_s1 + $0xe8] sm:$0xff] %v340_v43  ;;  %v344_v45 = vld [vmem:[%s776_s0 + $0xa8] sm:$0xff] }
  0x17   :  { %331 = vst [vmem:[%s777_s1 + $0x1a0] sm:$0xff] %v330_v38  ;;  %v332_v39 = vld [vmem:[%s776_s0 + $0x20] sm:$0xff]  ;;  %343 = vst [vmem:[%s777_s1 + $0x128] sm:$0xff] %v342_v44  ;;  %v346_v46 = vld [vmem:[%s776_s0 + $0x68] sm:$0xff] }
  0x18   :  { %333 = vst [vmem:[%s777_s1 + $0x1e0] sm:$0xff] %v332_v39  ;;  %v348_v47 = vld [vmem:[%s776_s0 + $0x28] sm:$0xff]  ;;  %345 = vst [vmem:[%s777_s1 + $0x168] sm:$0xff] %v344_v45  ;;  %v350_v48 = vld [vmem:[%s776_s0 + $0x1f0] sm:$0xff] }
  0x19   :  { %347 = vst [vmem:[%s777_s1 + $0x1a8] sm:$0xff] %v346_v46  ;;  %349 = vst [vmem:[%s777_s1 + $0x1e8] sm:$0xff] %v348_v47  ;;  %v352_v49 = vld [vmem:[%s776_s0 + $0x1b0] sm:$0xff]  ;;  %v366_v56 = vld [vmem:[%s776_s0 + $0x1f8] sm:$0xff] }
  0x1a   :  { %v354_v50 = vld [vmem:[%s776_s0 + $0x170] sm:$0xff]  ;;  %351 = vst [vmem:[%s777_s1 + $0x30] sm:$0xff] %v350_v48  ;;  %353 = vst [vmem:[%s777_s1 + $0x70] sm:$0xff] %v352_v49  ;;  %v368_v57 = vld [vmem:[%s776_s0 + $0x1b8] sm:$0xff] }
  0x1b   :  { %355 = vst [vmem:[%s777_s1 + $0xb0] sm:$0xff] %v354_v50  ;;  %v356_v51 = vld [vmem:[%s776_s0 + $0x130] sm:$0xff]  ;;  %367 = vst [vmem:[%s777_s1 + $0x38] sm:$0xff] %v366_v56  ;;  %v370_v58 = vld [vmem:[%s776_s0 + $0x178] sm:$0xff] }
  0x1c   :  { %v358_v52 = vld [vmem:[%s776_s0 + $0xf0] sm:$0xff]  ;;  %357 = vst [vmem:[%s777_s1 + $0xf0] sm:$0xff] %v356_v51  ;;  %v372_v59 = vld [vmem:[%s776_s0 + $0x138] sm:$0xff]  ;;  %369 = vst [vmem:[%s777_s1 + $0x78] sm:$0xff] %v368_v57 }
  0x1d   :  { %v360_v53 = vld [vmem:[%s776_s0 + $0xb0] sm:$0xff]  ;;  %359 = vst [vmem:[%s777_s1 + $0x130] sm:$0xff] %v358_v52  ;;  %371 = vst [vmem:[%s777_s1 + $0xb8] sm:$0xff] %v370_v58  ;;  %v374_v60 = vld [vmem:[%s776_s0 + $0xf8] sm:$0xff] }
  0x1e   :  { %361 = vst [vmem:[%s777_s1 + $0x170] sm:$0xff] %v360_v53  ;;  %v362_v54 = vld [vmem:[%s776_s0 + $0x70] sm:$0xff]  ;;  %373 = vst [vmem:[%s777_s1 + $0xf8] sm:$0xff] %v372_v59  ;;  %v376_v61 = vld [vmem:[%s776_s0 + $0xb8] sm:$0xff] }
  0x1f   :  { %v364_v55 = vld [vmem:[%s776_s0 + $0x30] sm:$0xff]  ;;  %363 = vst [vmem:[%s777_s1 + $0x1b0] sm:$0xff] %v362_v54  ;;  %v378_v62 = vld [vmem:[%s776_s0 + $0x78] sm:$0xff]  ;;  %375 = vst [vmem:[%s777_s1 + $0x138] sm:$0xff] %v374_v60 }
  0x20   :  { %365 = vst [vmem:[%s777_s1 + $0x1f0] sm:$0xff] %v364_v55  ;;  %377 = vst [vmem:[%s777_s1 + $0x178] sm:$0xff] %v376_v61  ;;  %v380_v63 = vld [vmem:[%s776_s0 + $0x38] sm:$0xff] }
  0x21   :  { %379 = vst [vmem:[%s777_s1 + $0x1b8] sm:$0xff] %v378_v62  ;;  %381 = vst [vmem:[%s777_s1 + $0x1f8] sm:$0xff] %v380_v63 }

// kernel: bigril_forward.3
= control target key start
LH: loop header
LB: loop body
LE: loop exit
PB: predicated region body
PF: predicated region fallthrough
CT: control target
= control target key end

     0   :  { %s1309_s0 = inlined_call_operand.vmem [shape: f32[64,256], index: 0, kind: input, shape index: {}]   ;;  %s1310_s1 = inlined_call_operand.vmem [shape: f32[64,256], index: 1, kind: input, shape index: {}]   ;;  %s1311_s2 = inlined_call_operand.vmem [shape: f32[1,256], index: 2, kind: input, shape index: {}]   ;;  %s1312_s3 = inlined_call_operand.vmem [shape: f32[8,256], index: 3, kind: input, shape index: {}]   ;;  %s1313_s4 = inlined_call_operand.vmem [shape: bf16[32,137], index: 4, kind: input, shape index: {}]   ;;  %s1314_s5 = inlined_call_operand.vmem [shape: f32[32,1], index: 5, kind: input, shape index: {}]   ;;  %s1315_s6 = inlined_call_operand.vmem [shape: bf16[1,32], index: 6, kind: input, shape index: {}]   ;;  %s1316_s7 = inlined_call_operand.<no memory space> [shape: f32[1,1], index: 7, kind: input, shape index: {}]   ;;  %s1317_s8 = inlined_call_operand.vmem [shape: f32[1,256], index: 8, kind: output, shape index: {}]  }
   0x1   :  { %v13_v0 = vstv %s1316_s7 }
   0x2   :  { %14 = vst [vmem:[#allocation2] sm:$0x1] %v13_v0 }
   0x3   :  { %s1178_s29 = smov 0   ;;  %s1180_s30 = smov 0  }
   0x4   :  { %s1182_s9 = smov 0  }
   0x5 LB: > { %s959_s7 = sadd.s32 4294967295, %s1123_s9   ;;  %s1195_s10 = sadd.s32 1, %s1123_s9   ;;  %s1123_s9 = sphi %s1182_s9, %s1321_s9   ;;  %s1119_s30 = sphi %s1180_s30, %s1320_s30   ;;  %s1115_s29 = sphi %s1178_s29, %s1319_s29  }
   0x6   : > { %s24_s11 = ssub.s32 %s1123_s9, %s1195_s10  ;;  %s27_s12 = sadd.s32 1, %s1119_s30 }
   0x7   : > { %p25_p0 = scmp.eq.s32.totalorder %s24_s11, 0  ;;  %p34_p1 = scmp.ne.s32.totalorder %s1119_s30, %s1115_s29 }
   0x8   : > { %p35_p2 = scmp.eq.s32.totalorder %s1123_s9, 0  ;;  %p962_p4 = scmp.ge.s32.totalorder %s1123_s9, 2 }
   0x9   : > { %s1204_s13 = scalar_select %p25_p0, %s1119_s30, %s27_s12  }
   0xa   : > { %p1206_p3 = por %p35_p2, %p34_p1  ;;  %260 = sbr.rel (%p962_p4) target bundleno = 33 (0x21), region = 32 }
  0x11   : > { %263 = sbr.rel (!%p1206_p3) target bundleno = 25 (0x19), region = 36  ;;  %s265_s15 = sand.u32 (%p1206_p3), 1, %s1119_s30  }
  0x12   : > { %s964_s16 = sshll.u32 (%p1206_p3), %s1123_s9, 3  ;;  %s963_s17 = sshll.u32 (%p1206_p3), %s265_s15, 6 }
  0x13   : > { %s269_s20 = scalar_lea.vmem (%p1206_p3), %s1309_s0, %s964_s16  ;;  %s267_s21 = scalar_lea.vmem (%p1206_p3), [#allocation3], %s963_s17 }
  0x14   : > { %v311_v1 = vld [vmem:[%s269_s20] sm:$0xff] (%p1206_p3)  ;;  %v313_v2 = vld [vmem:[%s269_s20 + $0x10] sm:$0xff] (%p1206_p3) }
  0x15   : > { %v315_v3 = vld [vmem:[%s269_s20 + $0x20] sm:$0xff] (%p1206_p3)  ;;  %312 = vst [vmem:[%s267_s21] sm:$0xff] (%p1206_p3), %v311_v1  ;;  %314 = vst [vmem:[%s267_s21 + $0x8] sm:$0xff] (%p1206_p3), %v313_v2  ;;  %v317_v4 = vld [vmem:[%s269_s20 + $0x30] sm:$0xff] (%p1206_p3) }
  0x16   : > { %316 = vst [vmem:[%s267_s21 + $0x10] sm:$0xff] (%p1206_p3), %v315_v3  ;;  %v319_v5 = vld [vmem:[%s269_s20 + $0x40] sm:$0xff] (%p1206_p3)  ;;  %v321_v6 = vld [vmem:[%s269_s20 + $0x50] sm:$0xff] (%p1206_p3)  ;;  %318 = vst [vmem:[%s267_s21 + $0x18] sm:$0xff] (%p1206_p3), %v317_v4 }
  0x17   : > { %320 = vst [vmem:[%s267_s21 + $0x20] sm:$0xff] (%p1206_p3), %v319_v5  ;;  %322 = vst [vmem:[%s267_s21 + $0x28] sm:$0xff] (%p1206_p3), %v321_v6  ;;  %v323_v7 = vld [vmem:[%s269_s20 + $0x60] sm:$0xff] (%p1206_p3)  ;;  %v325_v8 = vld [vmem:[%s269_s20 + $0x70] sm:$0xff] (%p1206_p3) }
  0x18   : > { %324 = vst [vmem:[%s267_s21 + $0x30] sm:$0xff] %v323_v7  ;;  %326 = vst [vmem:[%s267_s21 + $0x38] sm:$0xff] %v325_v8 }
  0x19 PF: > { %332 = sbr.rel (!%p1206_p3) target bundleno = 33 (0x21), region = 74  ;;  %s334_s22 = sand.u32 (%p1206_p3), 1, %s1119_s30  }
  0x1a   : > { %s966_s23 = sshll.u32 (%p1206_p3), %s1123_s9, 3  ;;  %s965_s24 = sshll.u32 (%p1206_p3), %s334_s22, 6 }
  0x1b   : > { %s338_s27 = scalar_lea.vmem (%p1206_p3), %s1310_s1, %s966_s23  ;;  %s336_s28 = scalar_lea.vmem (%p1206_p3), [#allocation4], %s965_s24 }
  0x1c   : > { %v380_v9 = vld [vmem:[%s338_s27] sm:$0xff] (%p1206_p3)  ;;  %v382_v10 = vld [vmem:[%s338_s27 + $0x10] sm:$0xff] (%p1206_p3) }
  0x1d   : > { %v384_v11 = vld [vmem:[%s338_s27 + $0x20] sm:$0xff] (%p1206_p3)  ;;  %381 = vst [vmem:[%s336_s28] sm:$0xff] (%p1206_p3), %v380_v9  ;;  %383 = vst [vmem:[%s336_s28 + $0x8] sm:$0xff] (%p1206_p3), %v382_v10  ;;  %v386_v12 = vld [vmem:[%s338_s27 + $0x30] sm:$0xff] (%p1206_p3) }
  0x1e   : > { %385 = vst [vmem:[%s336_s28 + $0x10] sm:$0xff] (%p1206_p3), %v384_v11  ;;  %v388_v13 = vld [vmem:[%s338_s27 + $0x40] sm:$0xff] (%p1206_p3)  ;;  %v390_v14 = vld [vmem:[%s338_s27 + $0x50] sm:$0xff] (%p1206_p3)  ;;  %387 = vst [vmem:[%s336_s28 + $0x18] sm:$0xff] (%p1206_p3), %v386_v12 }
  0x1f   : > { %389 = vst [vmem:[%s336_s28 + $0x20] sm:$0xff] (%p1206_p3), %v388_v13  ;;  %391 = vst [vmem:[%s336_s28 + $0x28] sm:$0xff] (%p1206_p3), %v390_v14  ;;  %v392_v15 = vld [vmem:[%s338_s27 + $0x60] sm:$0xff] (%p1206_p3)  ;;  %v394_v16 = vld [vmem:[%s338_s27 + $0x70] sm:$0xff] (%p1206_p3) }
  0x20   : > { %393 = vst [vmem:[%s336_s28 + $0x30] sm:$0xff] %v392_v15  ;;  %395 = vst [vmem:[%s336_s28 + $0x38] sm:$0xff] %v394_v16 }
  0x21 PF: > { %p967_p5 = scmp.ge.s32.totalorder %s1123_s9, 1  ;;  %p413_p6 = scmp.lt.s32.totalorder %s1123_s9, 3 }
  0x23   : > { %p414_p7 = pnand %p967_p5, %p413_p6 }
  0x24   : > { %v1095_v17 = vld [vmem:[%s1313_s4] ss:$8 sps:$4 sm:$0xff] (!%p414_p7)   ;;  %s420_s14 = sand.u32 (!%p414_p7), 1, %s1115_s29   ;;  %vm522_vm0 = vcmask (!%p414_p7), 523264   ;;  %v1234_v18 = vld [vmem:[%s1313_s4 + $0x4] ss:$8 sps:$4 sm:$0xff] (!%p414_p7)  }
  0x25   : > { %417 = sbr.rel (%p414_p7) target bundleno = 603 (0x25b), region = 120  ;;  %s1125_s17 = smov (!%p414_p7), 64   ;;  %v1239_v19 = vld [vmem:[%s1313_s4 + $0x10] ss:$8 sps:$4 sm:$0xff] (!%p414_p7)   ;;  %1027 = vmatprep.mubr.msk.bf16.mxu0 (!%p414_p7), %vm522_vm0, %v1095_v17  ;;  %v1247_v20 = vld [vmem:[%s1313_s4 + $0x14] ss:$8 sps:$4 sm:$0xff] (!%p414_p7)  }
  0x26   : > { %518 = vrot.lane.b32.xlu0 (!%p414_p7), %v1095_v17, %s1125_s17  ;;  %s968_s20 = sshll.u32 (!%p414_p7), %s420_s14, 6  ;;  %p469_p8 = scmp.lt.s32.totalorder (!%p414_p7), %s959_s7, 1  ;;  %520 = vrot.lane.b32.xlu1 (!%p414_p7), %v1239_v19, %s1125_s17  ;;  %v1126_v24 = vmov (!%p414_p7), 0   ;;  %v778_v42 = vld [vmem:[%s1314_s5 + $0x8] sm:$0xff] (!%p414_p7)  ;;  %v777_v43 = vld [vmem:[%s1314_s5] sm:$0xff] (!%p414_p7)  ;;  %vm648_vm1 = vcmask (!%p414_p7), 1040384  }
  0x27   : > { %s422_s22 = scalar_lea.vmem (!%p414_p7), [#allocation3], %s968_s20  ;;  %1093 = vset.pattern.permute.xlu0 (!%p414_p7), %v1126_v24  ;;  %1094 = vset.pattern.permute.xlu1 (!%p414_p7), %v1126_v24  ;;  %s1127_s23 = smov (!%p414_p7), 127   ;;  %v780_v45 = vld [vmem:[%s1314_s5 + $0x18] sm:$0xff] (!%p414_p7)  ;;  %v650_v50 = vsel (!%p414_p7), %vm648_vm1, 65535, %v1126_v24  ;;  %v779_v51 = vld [vmem:[%s1314_s5 + $0x10] sm:$0xff] (!%p414_p7)  ;;  %vm641_vm2 = vcmask (!%p414_p7), 7168  }
  0x28   : > { %v484_v21 = vld [vmem:[%s422_s22] sm:$0xff] (!%p414_p7)  ;;  %v485_v22 = vld [vmem:[%s422_s22 + $0x8] sm:$0xff] (!%p414_p7)  ;;  %v486_v23 = vld [vmem:[%s422_s22 + $0x10] sm:$0xff] (!%p414_p7)  ;;  %s1255_s24 = scalar_lea.vmem (!%p414_p7), [#allocation4], %s968_s20  ;;  %vm720_vm3 = vcmask (!%p414_p7), 1043456   ;;  %vm713_vm4 = vcmask (!%p414_p7), 64512  }
  0x29   : > { %v492_v25 = vpack.c.bf16 (!%p414_p7), %v485_v22, %v484_v21  ;;  %v487_v26 = vld [vmem:[%s422_s22 + $0x18] sm:$0xff] (!%p414_p7)  ;;  %v488_v28 = vld [vmem:[%s422_s22 + $0x20] sm:$0xff] (!%p414_p7)  ;;  %v489_v29 = vld [vmem:[%s422_s22 + $0x28] sm:$0xff] (!%p414_p7)  ;;  %v1128_v62 = vmov (!%p414_p7), 0.0   ;;  %vm1129_vm5 = vmmov (!%p414_p7), 0   ;;  %vm822_vm6 = vcmask (!%p414_p7), 261120  }
  0x2a   : > { %709 = vrot.lane.b32.xlu0 (!%p414_p7), %v1234_v18, %s1127_s23  ;;  %v493_v27 = vpack.c.bf16 (!%p414_p7), %v487_v26, %v486_v23  ;;  %v496_v30 = vld [vmem:[%s1255_s24] sm:$0xff] (!%p414_p7)  ;;  %v497_v31 = vld [vmem:[%s1255_s24 + $0x8] sm:$0xff] (!%p414_p7)  ;;  %v498_v32 = vld [vmem:[%s1255_s24 + $0x10] sm:$0xff] (!%p414_p7)  ;;  %v494_v36 = vpack.c.bf16 (!%p414_p7), %v489_v29, %v488_v28  ;;  %v818_v26 = vlaneseq (!%p414_p7) }
  0x2b   : > { %1019 = vmatprep.subr.bf16.mxu0 (!%p414_p7), %v492_v25  ;;  %711 = vrot.lane.b32.xlu1 (!%p414_p7), %v1247_v20, %s1127_s23  ;;  %v490_v33 = vld [vmem:[%s422_s22 + $0x30] sm:$0xff] (!%p414_p7)  ;;  %v504_v34 = vpack.c.bf16 (!%p414_p7), %v497_v31, %v496_v30  ;;  %v499_v35 = vld [vmem:[%s1255_s24 + $0x18] sm:$0xff] (!%p414_p7)  ;;  %v500_v39 = vld [vmem:[%s1255_s24 + $0x20] sm:$0xff] (!%p414_p7) }
  0x2c   : > { %s1323_s7 = smov (!%p469_p8, %s959_s7), 1  ;;  %1020 = vmatpush3.bf16.msra.mxu0 %v492_v25  ;;  %v491_v37 = vld [vmem:[%s422_s22 + $0x38] sm:$0xff]  ;;  %v505_v38 = vpack.c.bf16 %v499_v35, %v498_v32  ;;  %v501_v40 = vld [vmem:[%s1255_s24 + $0x28] sm:$0xff]  ;;  %v502_v48 = vld [vmem:[%s1255_s24 + $0x30] sm:$0xff] }
  0x2d   : > { %s471_s26 = scalar_lea.vmem %s1311_s2, %s1323_s7  ;;  %1021 = vmatprep.subr.bf16.mxu0 %v493_v27  ;;  %1007 = vmatprep.subr.bf16.mxu1 %v504_v34  ;;  %v506_v44 = vpack.c.bf16 %v501_v40, %v500_v39  ;;  %s970_s14 = sshll.u32 %s1323_s7, 3  ;;  %v495_v46 = vpack.c.bf16 %v491_v37, %v490_v33  ;;  %v503_v49 = vld [vmem:[%s1255_s24 + $0x38] sm:$0xff] }
  0x2e   : > { %v633_v41 = vld [vmem:[%s471_s26] sm:$0x1]  ;;  %1008 = vmatpush3.bf16.msra.mxu1 %v504_v34  ;;  %783 = vperm.xlu0 %1093, %v777_v43   ;;  %s475_s21 = scalar_lea.vmem %s1312_s3, %s970_s14  ;;  %v507_v52 = vpack.c.bf16 %v503_v49, %v502_v48  ;;  %s478_s9 = scalar_lea.vmem %s1317_s8, %s1323_s7 }
  0x2f   : > { %1009 = vmatprep.subr.bf16.mxu1 %v505_v38  ;;  %v634_v47 = vpack.c.bf16 %v633_v41, %v633_v41  ;;  %788 = vperm.xlu1 %1094, %v778_v42   ;;  %v707_v54 = vld [vmem:[%s475_s21] sm:$0xff] }
  0x30   : > { %1022 = vmatpush3.bf16.msra.mxu0 %v493_v27  ;;  %v812_v55 = vld [vmem:[#allocation2] sm:$0x1]  ;;  %v708_v56 = vpack.c.bf16 %v707_v54, %v707_v54  ;;  %v819_v27 = vshrl.u32 %v818_v26, 7 }
  0x31   : > { %1023 = vmatprep.subr.bf16.mxu0 %v494_v36  ;;  %v652_v53 = vand.u32 %v650_v50, %v634_v47  ;;  %v809_v25 = vld [vmem:[%s1315_s6] sm:$0x1] }
  0x32   : > { %1010 = vmatpush3.bf16.msra.mxu1 %v505_v38  ;;  %798 = vperm.xlu0 %1093, %v780_v45   ;;  %v722_v57 = vsel %vm720_vm3, %v708_v56, 0  ;;  %v820_v28 = vsub.s32 0, %v819_v27 }
  0x33   : > { %1011 = vmatprep.subr.bf16.mxu1 %v506_v44  ;;  %793 = vperm.xlu1 %1094, %v779_v51  }
  0x34   : > { %1024 = vmatpush3.bf16.msra.mxu0 %v494_v36 }
  0x35   : > { %1025 = vmatprep.subr.bf16.mxu0 %v495_v46 }
  0x36   : > { %1012 = vmatpush3.bf16.msra.mxu1 %v506_v44 }
  0x37   : > { %1013 = vmatprep.subr.bf16.mxu1 %v507_v52  ;;  %815 = vperm.xlu1 %1094, %v812_v55  }
  0x38   : > { %1026 = vmatpush3.bf16.msra.mxu0 %v495_v46 }
  0x39   : > { %1031 = vmatprep.subr.bf16.mxu0 %v652_v53 }
  0x3a   : > { %1014 = vmatpush3.bf16.msra.mxu1 %v507_v52 }
  0x3b   : > { %1028 = vmatmul.mubr.msk.bf16.vlgmr.msra.gmra.mrb[0].mxu0 %vm522_vm0, %v1239_v19  ;;  %1043 = vmatprep.subr.bf16.mxu1 %v1128_v62 }
  0x3c   : > { %1032 = vmatpush3.bf16.msra.mxu0 %v652_v53  ;;  %1033 = vmatprep.mubr.msk.bf16.mxu0 %vm641_vm2, %v1234_v18 }
  0x3d   : > { %1063 = vmatprep.subr.msk.bf16.mxu0 %vm720_vm3, %v708_v56 }
  0x47   : > { %1034 = vmatmul.mubr.msk.bf16.vlgmr.msra.gmra.mrb[0].mxu0 %vm641_vm2, %v1247_v20 }
  0x48   : > { %1038 = vmatpush3.bf16.msra.mxu0 %v722_v57 }
  0x98   : > { %v519_v58 = vpop.permute.xlu0 %518  ;;  %v521_v59 = vpop.permute.xlu1 %520 }
  0x99   : > { %1015 = vmatprep.mubr.msk.bf16.mxu1 %vm522_vm0, %v519_v58 }
  0x9a   : > { %1016 = vmatmul.mubr.msk.bf16.vlgmr.msra.gmra.mrb[0].mxu1 %vm522_vm0, %v521_v59 }
  0x9b   : > { %1047 = vmatprep.mubr.msk.bf16.mxu1 %vm1129_vm5, %v1128_v62 }
  0x9c   : > { %v710_v60 = vpop.permute.xlu0 %709 }
  0x9d   : > { %1039 = vmatprep.mubr.msk.bf16.mxu0 %vm713_vm4, %v710_v60  ;;  %v712_v61 = vpop.permute.xlu1 %711 }
  0x9e   : > { %1040 = vmatmul.mubr.msk.bf16.vlgmr.msra.gmra.mrb[0].mxu0 %vm713_vm4, %v712_v61 }
  0xad   : > { %v784_v1 = vpop.permute.xlu0 %783 }
  0xae   : > { %v789_v63 = vpop.permute.xlu1 %788 }
  0xb1   : > { %v799_v11 = vpop.permute.xlu0 %798 }
  0xb2   : > { %v794_v6 = vpop.permute.xlu1 %793 }
  0xb6   : > { %v816_v29 = vpop.permute.xlu1 %815 }
  0xb7   : > { %v821_v30 = vrot.slane %v816_v29, %v820_v28 }
 0x16d   : > { %v1017_v0 = vpop.f32.mrb[0].mxu1 }
 0x16e   : > { %v563_v2 = vpop.f32.mrb[1].mxu1 }
 0x16f   : > { %v1018_v3 = vpop.f32.mrb[2].mxu1 }
 0x170   : > { %v566_v4 = vpop.f32.mrb[3].mxu1 }
 0x171   : > { %v1041_v5 = vpop.f32.mrb[0].mxu0 }
 0x172   : > { %v1051_v7 = vadd.f32 %v1041_v5, %v1017_v0  ;;  %v758_v8 = vpop.f32.mrb[1].mxu0 }
 0x173   : > { %v1052_v9 = vadd.f32 %v758_v8, %v563_v2  ;;  %v1042_v10 = vpop.f32.mrb[2].mxu0 }
 0x174   : > { %v803_v12 = vadd.f32 %v1051_v7, %v794_v6  ;;  %v1053_v13 = vadd.f32 %v1042_v10, %v1018_v3  ;;  %v761_v14 = vpop.f32.mrb[3].mxu0 }
 0x175   : > { %v801_v15 = vadd.f32 %v1052_v9, %v784_v1  ;;  %v1054_v16 = vadd.f32 %v761_v14, %v566_v4 }
 0x176   : > { %v804_v17 = vadd.f32 %v1053_v13, %v799_v11  ;;  %v807_v19 = vmax.f32 %v803_v12, 0.0 }
 0x177   : > { %v802_v18 = vadd.f32 %v1054_v16, %v789_v63  ;;  %v805_v21 = vmax.f32 %v801_v15, 0.0 }
 0x178   : > { %v808_v20 = vmax.f32 %v804_v17, 0.0 }
 0x179   : > { %v806_v22 = vmax.f32 %v802_v18, 0.0 }
 0x17a   : > { %v811_v23 = vpack.c.bf16 %v808_v20, %v807_v19 }
 0x17b   : > { %v810_v24 = vpack.c.bf16 %v806_v22, %v805_v21 }
 0x17d   : > { %1044 = vmatpush3.bf16.msra.mxu1 %v810_v24 }
 0x17e   : > { %1045 = vmatprep.subr.bf16.mxu1 %v1128_v62 }
 0x181   : > { %1046 = vmatpush3.bf16.msra.mxu1 %v811_v23 }
 0x184   : > { %1048 = vmatmul.mubr.msk.bf16.vlgmr.msra.gmra.mrb[4].mxu1 %vm822_vm6, %v809_v25 }
 0x257   : > { %v860_v31 = vpop.f32.mrb[4].mxu1 }
 0x258   : > { %v861_v32 = vadd.f32 %v860_v31, %v821_v30  ;;  %v1049_v33 = vpop.f32.mrb[5].mxu1 }
 0x259   : > { %v863_v34 = vpop.f32.mrb[6].mxu1 }
 0x25a   : > { %866 = vst [vmem:[%s478_s9] sm:$0x1] %v861_v32  ;;  %v1050_v35 = vpop.f32.mrb[7].mxu1 }
 0x25b PF: > { %p17_p9 = scmp.ge.s32.totalorder %s1195_s10, 4   ;;  %s1319_s29 = smov %s1119_s30 }
 0x25c   : > { %s1320_s30 = smov %s1204_s13  ;;  %s1321_s9 = smov %s1195_s10 }
 0x25d   :  { %19 = sbr.rel (!%p17_p9) target bundleno = 5 (0x5), region = 177 }

// kernel: bigril_forward.2
= control target key start
LH: loop header
LB: loop body
LE: loop exit
PB: predicated region body
PF: predicated region fallthrough
CT: control target
= control target key end

     0   :  { %s7489_s25 = smov 0   ;;  %s7491_s26 = smov 0   ;;  %s8982_s0 = inlined_call_operand.vmem [shape: f32[2,8,1,128], index: 0, kind: input, shape index: {}]   ;;  %s8983_s1 = inlined_call_operand.vmem [shape: f32[2,8,1,128], index: 1, kind: input, shape index: {}]   ;;  %s8984_s2 = inlined_call_operand.vmem [shape: bf16[2,128,128], index: 2, kind: input, shape index: {}]   ;;  %s8985_s3 = inlined_call_operand.vmem [shape: bf16[2,1,32], index: 3, kind: input, shape index: {}]   ;;  %s8986_s4 = inlined_call_operand.vmem [shape: f32[2,1,1], index: 4, kind: input, shape index: {}]   ;;  %s8987_s5 = inlined_call_operand.vmem [shape: bf16[2,32,34], index: 5, kind: input, shape index: {}]   ;;  %s8988_s6 = inlined_call_operand.vmem [shape: f32[2,32,1], index: 6, kind: input, shape index: {}]   ;;  %s8989_s7 = inlined_call_operand.vmem [shape: bf16[2,32,64], index: 7, kind: input, shape index: {}]   ;;  %s8990_s8 = inlined_call_operand.vmem [shape: f32[2,32,1], index: 8, kind: input, shape index: {}]   ;;  %s8991_s9 = inlined_call_operand.vmem [shape: bf16[2,32,64], index: 9, kind: input, shape index: {}]   ;;  %s8992_s10 = inlined_call_operand.vmem [shape: f32[2,32,1], index: 10, kind: input, shape index: {}]   ;;  %s8993_s11 = inlined_call_operand.vmem [shape: bf16[2,1,64], index: 11, kind: input, shape index: {}]   ;;  %s8994_s12 = inlined_call_operand.vmem [shape: f32[2,1,1], index: 12, kind: input, shape index: {}]   ;;  %s8995_s13 = inlined_call_operand.vmem [shape: f32[2,1,1], index: 13, kind: input, shape index: {}]   ;;  %s8996_s14 = inlined_call_operand.vmem [shape: bf16[2,64,170], index: 14, kind: input, shape index: {}]   ;;  %s8997_s15 = inlined_call_operand.vmem [shape: f32[2,64,1], index: 15, kind: input, shape index: {}]   ;;  %s8998_s16 = inlined_call_operand.vmem [shape: bf16[2,32,170], index: 16, kind: input, shape index: {}]   ;;  %s8999_s17 = inlined_call_operand.vmem [shape: f32[2,32,1], index: 17, kind: input, shape index: {}]   ;;  %s9000_s18 = inlined_call_operand.vmem [shape: f32[2,32,128], index: 18, kind: input, shape index: {}]   ;;  %s9001_s19 = inlined_call_operand.vmem [shape: f32[2,8,1,128], index: 19, kind: output, shape index: {0}]   ;;  %s9002_s20 = inlined_call_operand.vmem [shape: f32[2,8,1,128], index: 20, kind: output, shape index: {1}]   ;;  %s9003_s21 = inlined_call_operand.vmem [shape: f32[2,8,64,128], index: 21, kind: output, shape index: {2}]  }
   0x1   :  { %9016 = sst [smem:[#allocation94_spill]] %s8982_s0  ;;  %s7493_s27 = smov 0  }
   0x2   :  { %9017 = sst [smem:[#allocation95_spill]] %s8983_s1 }
   0x3   :  { %9018 = sst [smem:[#allocation96_spill]] %s8984_s2  ;;  %s7487_s2 = smov 0  }
   0x4   :  { %9019 = sst [smem:[#allocation97_spill]] %s8985_s3  ;;  %s7495_s3 = smov 0  }
   0x5   :  { %9020 = sst [smem:[#allocation98_spill]] %s8986_s4 }
   0x6   :  { %9021 = sst [smem:[#allocation99_spill]] %s8987_s5 }
   0x7   :  { %9022 = sst [smem:[#allocation100_spill]] %s8988_s6 }
   0x8   :  { %9023 = sst [smem:[#allocation101_spill]] %s8989_s7 }
   0x9   :  { %9024 = sst [smem:[#allocation102_spill]] %s8990_s8 }
   0xa   :  { %9025 = sst [smem:[#allocation103_spill]] %s8991_s9 }
   0xb   :  { %9026 = sst [smem:[#allocation104_spill]] %s8992_s10 }
   0xc   :  { %9027 = sst [smem:[#allocation105_spill]] %s8993_s11 }
   0xd   :  { %9028 = sst [smem:[#allocation106_spill]] %s8994_s12 }
   0xe   :  { %9029 = sst [smem:[#allocation107_spill]] %s8995_s13 }
   0xf   :  { %9030 = sst [smem:[#allocation108_spill]] %s8996_s14 }
  0x10   :  { %9031 = sst [smem:[#allocation109_spill]] %s8997_s15 }
  0x11   :  { %9032 = sst [smem:[#allocation110_spill]] %s8998_s16 }
  0x12   :  { %9033 = sst [smem:[#allocation111_spill]] %s8999_s17 }
  0x13   :  { %9034 = sst [smem:[#allocation112_spill]] %s9000_s18 }
  0x14   :  { %9035 = sst [smem:[#allocation113_spill]] %s9001_s19 }
  0x15   :  { %9036 = sst [smem:[#allocation114_spill]] %s9002_s20 }
  0x16   :  { %9037 = sst [smem:[#allocation115_spill]] %s9003_s21 }
  0x17 LB: > { %9038 = sst [smem:[#allocation3_spill]] %s7340_s2  ;;  %s41_s28 = sadd.s32 1, %s7348_s26  ;;  %s7356_s3 = sphi %s7495_s3, %s32_s3   ;;  %s7352_s27 = sphi %s7493_s27, %s9259_s27   ;;  %s7348_s26 = sphi %s7491_s26, %s9258_s26   ;;  %s7344_s25 = sphi %s7489_s25, %s9257_s25   ;;  %s7340_s2 = sphi %s7487_s2, %s9256_s2  }
  0x18   : > { %9039 = sst [smem:[#allocation4_spill]] %s7348_s26  ;;  %s44_s29 = sadd.s32 1, %s7352_s27 }
  0x19   : > { %9040 = sst [smem:[#allocation5_spill]] %s7352_s27  ;;  %p42_p0 = scmp.ge.s32.totalorder %s41_s28, 8 }
  0x1a   : > { %9041 = sst [smem:[#allocation6_spill]] %s7356_s3  ;;  %p5724_p1 = scmp.ge.s32.totalorder %s7356_s3, 1 }
  0x1b   : > { %p778_p2 = scmp.lt.s32.totalorder %s7356_s3, 17  ;;  %s9261_s28 = smov (%p42_p0, %s41_s28), 0 }
  0x1c   : > { %9042 = sst [smem:[#allocation7_spill]] %s9261_s28  ;;  %s9263_s29 = smov (!%p42_p0, %s44_s29), %s7352_s27 }
  0x1d   : > { %p779_p3 = pnand %p5724_p1, %p778_p2  ;;  %p46_p4 = scmp.ge.s32.totalorder %s9263_s29, 2 }
  0x1f   : > { %s9265_s29 = smov (%p46_p4, %s9263_s29), 0  ;;  %782 = sbr.rel (%p779_p3) target bundleno = 3284 (0xcd4), region = 96 }
  0x20   : > { %9043 = sst [smem:[#allocation8_spill]] %s9265_s29 }
  0x26   : > { %p935_p5 = scmp.lt.s32.totalorder %s7344_s25, 1  ;;  %p937_p6 = scmp.lt.s32.totalorder %s7340_s2, 7 }
  0x27   : > { %s9049_s6 = sld [smem:[#allocation100_spill]]  ;;  %s9050_s7 = sld [smem:[#allocation101_spill]] }
  0x28   : > { %s9267_s25 = smov (!%p935_p5, %s7344_s25), 1  ;;  %s9051_s8 = sld [smem:[#allocation102_spill]] }
  0x29   : > { %s938_s0 = scalar_select %p937_p6, %s7340_s2, 7 }
  0x2a   : > { %s5725_s4 = sshll.u32 %s9267_s25, 3  ;;  %s5923_s30 = sshll.u32 %s9267_s25, 4 }
  0x2b   : > { %s7528_s1 = sadd.s32 %s5725_s4, %s938_s0  ;;  %s5924_s5 = sshll.u32 %s9267_s25, 5 }
  0x2c   : > { %s9048_s4 = sld [smem:[#allocation99_spill]]  ;;  %s9052_s9 = sld [smem:[#allocation103_spill]] }
  0x2d   : > { %s7552_s28 = scalar_lea.vmem %s9049_s6, %s5924_s5  ;;  %s7557_s3 = scalar_lea.vmem %s9050_s7, %s5923_s30 }
  0x2e   : > { %s7562_s20 = scalar_lea.vmem %s9051_s8, %s5924_s5  ;;  %s9053_s10 = sld [smem:[#allocation104_spill]] }
  0x2f   : > { %s5929_s23 = sshll.u32 %s9267_s25, 6  ;;  %s9058_s14 = sld [smem:[#allocation108_spill]] }
  0x30   : > { %s9060_s15 = sld [smem:[#allocation109_spill]]  ;;  %s9062_s26 = sld [smem:[#allocation110_spill]] }
  0x31   : > { %s9064_s7 = sld [smem:[#allocation111_spill]]  ;;  %s9066_s11 = sld [smem:[#allocation113_spill]] }
  0x32   : > { %s7547_s16 = scalar_lea.vmem %s9048_s4, %s5923_s30  ;;  %s7567_s4 = scalar_lea.vmem %s9052_s9, %s5923_s30 }
  0x33   : > { %s9065_s30 = sld [smem:[#allocation112_spill]]  ;;  %s5751_s17 = sshll.u32 %s938_s0, 3 }
  0x34   : > { %s7572_s24 = scalar_lea.vmem %s9053_s10, %s5924_s5  ;;  %s9068_s18 = sld [smem:[#allocation115_spill]] }
  0x35   : > { %9054 = sst [smem:[#allocation9_spill]] %s7572_s24  ;;  %s7590_s9 = scalar_lea.vmem %s9058_s14, %s5929_s23 }
  0x36   : > { %9059 = sst [smem:[#allocation10_spill]] %s7590_s9  ;;  %s7595_s10 = scalar_lea.vmem %s9060_s15, %s5929_s23 }
  0x37   : > { %9061 = sst [smem:[#allocation11_spill]] %s7595_s10  ;;  %s7600_s6 = scalar_lea.vmem %s9062_s26, %s5924_s5 }
  0x38   : > { %9063 = sst [smem:[#allocation12_spill]] %s7600_s6  ;;  %s7605_s19 = scalar_lea.vmem %s9064_s7, %s5924_s5 }
  0x39   : > { %s1018_s22 = scalar_lea.vmem %s9065_s30, %s5924_s5  ;;  %s1025_s2 = scalar_lea.vmem %s9066_s11, %s7528_s1 }
  0x3a   : > { %s9067_s10 = sld [smem:[#allocation114_spill]]  ;;  %s1039_s26 = sadd.s32 %s5929_s23, %s5751_s17 }
  0x3b   : > { %s5753_s27 = sshll.u32 %s1039_s26, 3  ;;  %s9069_s7 = sld [smem:[#allocation3_spill]] }
  0x3c   : > { %s7621_s21 = scalar_lea.vmem %s9068_s18, %s5753_s27 }
  0x40   : > { %s1032_s9 = scalar_lea.vmem %s9067_s10, %s7528_s1 }
  0x41   : > { %p5754_p7 = scmp.ne.s32.totalorder %s9069_s7, 0 }
  0x42   : > { %v1047_v0 = vld [vmem:[%s1018_s22] sm:$0xff] (!%p5754_p7)  ;;  %v1048_v1 = vld [vmem:[%s1018_s22 + $0x8] sm:$0xff] (!%p5754_p7)  ;;  %v1049_v2 = vld [vmem:[%s1018_s22 + $0x10] sm:$0xff] (!%p5754_p7) }
  0x43   : > { %1046 = sbr.rel (%p5754_p7) target bundleno = 74 (0x4a), region = 100  ;;  %1051 = vst [vmem:[#allocation2] sm:$0xff] (!%p5754_p7), %v1047_v0  ;;  %1052 = vst [vmem:[#allocation2 + $0x8] sm:$0xff] (!%p5754_p7), %v1048_v1  ;;  %v1050_v3 = vld [vmem:[%s1018_s22 + $0x18] sm:$0xff] (!%p5754_p7) }
  0x44   : > { %1053 = vst [vmem:[#allocation2 + $0x10] sm:$0xff] (!%p5754_p7), %v1049_v2  ;;  %1054 = vst [vmem:[#allocation2 + $0x18] sm:$0xff] (!%p5754_p7), %v1050_v3 }
  0x4a PF: > { %s9070_s11 = sld [smem:[#allocation98_spill]]  ;;  %v1091_v5 = vld [vmem:[#allocation2] sm:$0xff]  ;;  %v7358_v6 = vmov 0   ;;  %v9013_v7 = vmov 0.0   ;;  %v1092_v8 = vld [vmem:[#allocation2 + $0x8] sm:$0xff]  ;;  %vm7360_vm0 = vmmov 0   ;;  %v1104_v26 = vlaneseq }
  0x4b   : > { %7210 = vset.pattern.permute.xlu0 %v7358_v6  ;;  %6271 = vmatprep.subr.bf16.mxu0 %v9013_v7  ;;  %5353 = vst [vmem:[%s7621_s21 + $0x20] sm:$0xff] %v1091_v5  ;;  %v7632_v9 = vpack.c.bf16 %v1092_v8, %v1091_v5  ;;  %5354 = vst [vmem:[%s7621_s21 + $0x28] sm:$0xff] %v1092_v8  ;;  %v7636_v10 = vld [vmem:[%s7547_s16] sm:$0xff]   ;;  %v1093_v11 = vld [vmem:[#allocation2 + $0x10] sm:$0xff]  ;;  %s7361_s13 = smov 127   ;;  %vm1108_vm1 = vcmask 261120  }
  0x4c   : > { %v1094_v12 = vld [vmem:[#allocation2 + $0x18] sm:$0xff]  ;;  %7211 = vset.pattern.permute.xlu1 %v7358_v6  ;;  %5355 = vst [vmem:[%s7621_s21 + $0x30] sm:$0xff] %v1093_v11  ;;  %6275 = vmatprep.mubr.msk.bf16.mxu0 %vm7360_vm0, %v9013_v7  ;;  %v7644_v13 = vld [vmem:[%s7547_s16 + $0x8] sm:$0xff]   ;;  %s9072_s16 = sld [smem:[#allocation97_spill]]  ;;  %s7362_s5 = smov 126   ;;  %v1356_v16 = vld [vmem:[%s7552_s28] sm:$0xff] }
  0x4d   : > { %5356 = vst [vmem:[%s7621_s21 + $0x38] sm:$0xff] %v1094_v12  ;;  %6272 = vmatpush3.bf16.msra.mxu0 %v7632_v9  ;;  %v7647_v14 = vpack.c.bf16 %v1094_v12, %v1093_v11  ;;  %1171 = vrot.lane.b32.xlu1 %v7644_v13, %s7361_s13  ;;  %v1357_v17 = vld [vmem:[%s7552_s28 + $0x8] sm:$0xff]  ;;  %v1358_v18 = vld [vmem:[%s7552_s28 + $0x10] sm:$0xff]  ;;  %s7363_s24 = smov 96   ;;  %s9074_s23 = sld [smem:[#allocation9_spill]]  ;;  %v7689_v31 = vshrl.u32 %v1104_v26, 7 }
  0x4e   : > { %6273 = vmatprep.subr.bf16.mxu0 %v9013_v7  ;;  %v1359_v19 = vld [vmem:[%s7552_s28 + $0x18] sm:$0xff]  ;;  %v7670_v20 = vld [vmem:[%s7557_s3 + $0x8] sm:$0xff]   ;;  %v7673_v21 = vld [vmem:[%s7557_s3] sm:$0xff]   ;;  %v7364_v27 = vmov 1966171168   ;;  %s9075_s28 = sld [smem:[#allocation10_spill]] }
  0x4f   : > { %v1713_v22 = vld [vmem:[%s7562_s20 + $0x8] sm:$0xff]  ;;  %v1712_v23 = vld [vmem:[%s7562_s20] sm:$0xff]  ;;  %v1715_v24 = vld [vmem:[%s7562_s20 + $0x18] sm:$0xff]  ;;  %v1925_v28 = vunpack.c.l.s4 %v7364_v27  ;;  %s9078_s29 = sld [smem:[#allocation107_spill]]  ;;  %s9080_s18 = sld [smem:[#allocation106_spill]]  ;;  %vm1180_vm2 = vcmask 1040384  }
  0x50   : > { %s9071_s12 = scalar_lea.vmem %s9070_s11, %s9267_s25  ;;  %v1714_v25 = vld [vmem:[%s7562_s20 + $0x10] sm:$0xff]  ;;  %v7684_v29 = vld [vmem:[%s7567_s4] sm:$0xff]   ;;  %v7687_v30 = vld [vmem:[%s7567_s4 + $0x8] sm:$0xff]   ;;  %s9076_s4 = sld [smem:[#allocation105_spill]]  ;;  %v7766_v47 = vsel %vm1180_vm2, 65535, %v7358_v6  ;;  %vm1173_vm3 = vcmask 7168  }
  0x51   : > { %v1098_v4 = vld [vmem:[%s9071_s12] sm:$0x1]  ;;  %6274 = vmatpush3.bf16.msra.mxu0 %v7647_v14  ;;  %1293 = vrot.lane.b32.xlu1 %v7636_v10, %s7362_s5  ;;  %v1926_v32 = vunpack.c.0.s8 %v1925_v28  ;;  %s7366_s8 = smov 93   ;;  %s7367_s10 = smov 92   ;;  %vm3651_vm5 = vcmask 195584  }
  0x52   : > { %1101 = vperm.xlu0 %7210, %v1098_v4   ;;  %s9073_s0 = scalar_lea.vmem %s9072_s16, %s9267_s25  ;;  %s9082_s14 = sld [smem:[#allocation95_spill]] }
  0x53   : > { %v1095_v15 = vld [vmem:[%s9073_s0] sm:$0x1]  ;;  %v1929_v33 = vsub.s32 %v1926_v32, %v7689_v31  ;;  %v1871_v35 = vld [vmem:[%s9074_s23 + $0x8] sm:$0xff]  ;;  %v1872_v39 = vld [vmem:[%s9074_s23 + $0x10] sm:$0xff]  ;;  %s7368_s16 = smov 60   ;;  %s7369_s0 = smov 59  }
  0x54   : > { %6276 = vmatmul.mubr.msk.bf16.vlgmr.msra.gmra.mrb[0].mxu0 %vm1108_vm1, %v1095_v15  ;;  %v1870_v34 = vld [vmem:[%s9074_s23] sm:$0xff]  ;;  %v1873_v41 = vld [vmem:[%s9074_s23 + $0x18] sm:$0xff]  ;;  %s7371_s23 = smov 26   ;;  %s7372_s3 = smov 25  }
  0x55   : > { %1362 = vperm.xlu1 %7211, %v1356_v16   ;;  %s9079_s17 = scalar_lea.vmem %s9078_s29, %s9267_s25  ;;  %v7715_v42 = vld [vmem:[%s9075_s28] ss:$8 sps:$4 sm:$0xff]   ;;  %s9081_s7 = scalar_lea.vmem %s9080_s18, %s9267_s25  ;;  %v7723_v44 = vld [vmem:[%s9075_s28 + $0x10] ss:$8 sps:$4 sm:$0xff]   ;;  %v7226_v53 = vld [vmem:[%s9075_s28 + $0x4] ss:$8 sps:$4 sm:$0xff]  }
  0x56   : > { %1169 = vrot.lane.b32.xlu0 %v7636_v10, %s7361_s13  ;;  %s9077_s6 = scalar_lea.vmem %s9076_s4, %s9267_s25  ;;  %v5808_v38 = vld [vmem:[%s9079_s17] ss:$0 sm:$0xff]  ;;  %v7733_v46 = vld [vmem:[%s9075_s28 + $0x30] ss:$8 sps:$4 sm:$0xff]   ;;  %s7365_s25 = smov 94  }
  0x57   : > { %v7703_v36 = vld [vmem:[%s9077_s6] sm:$0x1]  ;;  %s7373_s20 = smov 24   ;;  %v7230_v55 = vld [vmem:[%s9075_s28 + $0x14] ss:$8 sps:$4 sm:$0xff]   ;;  %s7374_s4 = smov 120  }
  0x58   : > { %v1930_v37 = vrot.slane %v7703_v36, %v1929_v33  ;;  %v2026_v43 = vld [vmem:[%s9081_s7] sm:$0x1]  ;;  %s9083_s15 = scalar_lea.vmem %s9082_s14, %s7528_s1  ;;  %v7852_v58 = vld [vmem:[%s9075_s28 + $0x24] ss:$8 sps:$4 sm:$0xff]   ;;  %v7861_v61 = vld [vmem:[%s9075_s28 + $0x34] ss:$8 sps:$4 sm:$0xff]  }
  0x59   : > { %1372 = vperm.xlu1 %7211, %v1358_v18   ;;  %v7728_v45 = vld [vmem:[%s9075_s28 + $0x20] ss:$8 sps:$4 sm:$0xff]   ;;  %s9084_s6 = sld [smem:[#allocation11_spill]]  ;;  %s7375_s30 = smov 119  }
  0x5a   : > { %1295 = vrot.lane.b32.xlu0 %v7644_v13, %s7362_s5  ;;  %v1937_v40 = vrot.slane %v1930_v37, %v1929_v33  ;;  %v7775_v48 = vld [vmem:[%s9083_s15] sm:$0x1]  ;;  %s9085_s22 = sld [smem:[#allocation12_spill]]  ;;  %s7376_s29 = smov 118  }
  0x5b   : > { %v7781_v49 = vpack.c.bf16 %v7775_v48, %v7775_v48  ;;  %s9108_s17 = sld [smem:[#allocation94_spill]]  ;;  %vm1090_vm4 = vcmp.gt.f32.partialorder %v7775_v48, 0.5 }
  0x5d   : > { %1598 = vrot.lane.b32.xlu1 %v7673_v21, %s7363_s24  ;;  %v7785_v50 = vand.u32 %v7766_v47, %v7781_v49 }
  0x5e   : > { %1367 = vperm.xlu0 %7210, %v1357_v17  }
  0x5f   : > { %6279 = vmatprep.subr.bf16.mxu1 %v7785_v50  ;;  %v2572_v15 = vld [vmem:[%s9084_s6 + $0x8] sm:$0xff]  ;;  %v2573_v16 = vld [vmem:[%s9084_s6 + $0x10] sm:$0xff] }
  0x60   : > { %6280 = vmatpush3.bf16.msra.mxu1 %v7785_v50 }
  0x61   : > { %1718 = vperm.xlu1 %7211, %v1712_v23   ;;  %s9109_s26 = scalar_lea.vmem %s9108_s17, %s7528_s1 }
  0x62   : > { %1377 = vperm.xlu0 %7210, %v1359_v19   ;;  %v7228_v19 = vld [vmem:[%s9085_s22] ss:$8 sps:$4 sm:$0xff]  }
  0x65   : > { %1728 = vperm.xlu1 %7211, %v1714_v25   ;;  %v7231_v25 = vld [vmem:[%s9085_s22 + $0x10] ss:$8 sps:$4 sm:$0xff]  }
  0x66   : > { %1600 = vrot.lane.b32.xlu0 %v7670_v20, %s7363_s24 }
  0x69   : > { %1756 = vrot.lane.b32.xlu1 %v7684_v29, %s7363_s24 }
  0x6a   : > { %1723 = vperm.xlu0 %7210, %v1713_v22   ;;  %v2574_v22 = vld [vmem:[%s9084_s6 + $0x18] sm:$0xff] }
  0x6d   : > { %1876 = vperm.xlu1 %7211, %v1870_v34  }
  0x6e   : > { %1733 = vperm.xlu0 %7210, %v1715_v24  }
  0x71   : > { %1909 = vperm.xlu1 %7211, %v5808_v38  }
  0x72   : > { %1758 = vrot.lane.b32.xlu0 %v7687_v30, %s7363_s24 }
  0x75   : > { %1891 = vperm.xlu1 %7211, %v1873_v41  }
  0x76   : > { %1881 = vperm.xlu0 %7210, %v1871_v35  }
  0x79   : > { %2029 = vperm.xlu1 %7211, %v2026_v43  }
  0x7a   : > { %1886 = vperm.xlu0 %7210, %v1872_v39  }
  0x7d   : > { %2601 = vrot.lane.b32.xlu1 %v7723_v44, %s7361_s13 }
  0x7e   : > { %1938 = vrot.lane.b32.xlu0 %v1937_v40, %s7363_s24  ;;  %s7370_s24 = smov 58  }
  0x81   : > { %2605 = vrot.lane.b32.xlu1 %v7733_v46, %s7361_s13 }
  0x82   : > { %2599 = vrot.lane.b32.xlu0 %v7715_v42, %s7361_s13 }
  0x85   : > { %2766 = vrot.lane.b32.xlu1 %v7723_v44, %s7362_s5 }
  0x86   : > { %2603 = vrot.lane.b32.xlu0 %v7728_v45, %s7361_s13 }
  0x89   : > { %2770 = vrot.lane.b32.xlu1 %v7733_v46, %s7362_s5 }
  0x8a   : > { %2764 = vrot.lane.b32.xlu0 %v7715_v42, %s7362_s5 }
  0x8d   : > { %2859 = vrot.lane.b32.xlu1 %v7723_v44, %s7365_s25 }
  0x8e   : > { %2768 = vrot.lane.b32.xlu0 %v7728_v45, %s7362_s5 }
  0x91   : > { %2863 = vrot.lane.b32.xlu1 %v7733_v46, %s7365_s25 }
  0x92   : > { %2857 = vrot.lane.b32.xlu0 %v7715_v42, %s7365_s25 }
  0x95   : > { %2955 = vrot.lane.b32.xlu1 %v7723_v44, %s7366_s8 }
  0x96   : > { %2861 = vrot.lane.b32.xlu0 %v7728_v45, %s7365_s25 }
  0x99   : > { %2959 = vrot.lane.b32.xlu1 %v7733_v46, %s7366_s8 }
  0x9a   : > { %2953 = vrot.lane.b32.xlu0 %v7715_v42, %s7366_s8 }
  0x9d   : > { %3051 = vrot.lane.b32.xlu1 %v7723_v44, %s7367_s10 }
  0x9e   : > { %2957 = vrot.lane.b32.xlu0 %v7728_v45, %s7366_s8 }
  0xa1   : > { %3055 = vrot.lane.b32.xlu1 %v7733_v46, %s7367_s10 }
  0xa2   : > { %3049 = vrot.lane.b32.xlu0 %v7715_v42, %s7367_s10 }
  0xa5   : > { %3145 = vrot.lane.b32.xlu1 %v7723_v44, %s7368_s16 }
  0xa6   : > { %3053 = vrot.lane.b32.xlu0 %v7728_v45, %s7367_s10 }
  0xa9   : > { %3149 = vrot.lane.b32.xlu1 %v7733_v46, %s7368_s16 }
  0xaa   : > { %3143 = vrot.lane.b32.xlu0 %v7715_v42, %s7368_s16 }
  0xad   : > { %3242 = vrot.lane.b32.xlu1 %v7723_v44, %s7369_s0 }
  0xae   : > { %3147 = vrot.lane.b32.xlu0 %v7728_v45, %s7368_s16 }
  0xb1   : > { %3246 = vrot.lane.b32.xlu1 %v7733_v46, %s7369_s0 }
  0xb2   : > { %3240 = vrot.lane.b32.xlu0 %v7715_v42, %s7369_s0 }
  0xb5   : > { %3340 = vrot.lane.b32.xlu1 %v7723_v44, %s7370_s24 }
  0xb6   : > { %3244 = vrot.lane.b32.xlu0 %v7728_v45, %s7369_s0 }
  0xb9   : > { %3344 = vrot.lane.b32.xlu1 %v7733_v46, %s7370_s24 }
  0xba   : > { %3338 = vrot.lane.b32.xlu0 %v7715_v42, %s7370_s24 }
  0xbd   : > { %3433 = vrot.lane.b32.xlu1 %v7723_v44, %s7371_s23 }
  0xbe   : > { %3342 = vrot.lane.b32.xlu0 %v7728_v45, %s7370_s24 }
  0xbf   : > { %v1172_v51 = vpop.permute.xlu1 %1171 }
  0xc1   : > { %3437 = vrot.lane.b32.xlu1 %v7733_v46, %s7371_s23 }
  0xc2   : > { %3431 = vrot.lane.b32.xlu0 %v7715_v42, %s7371_s23 }
  0xc3   : > { %v7840_v56 = vpop.permute.xlu1 %1293 }
  0xc5   : > { %3529 = vrot.lane.b32.xlu1 %v7723_v44, %s7372_s3 }
  0xc6   : > { %3435 = vrot.lane.b32.xlu0 %v7728_v45, %s7371_s23 }
  0xc9   : > { %3533 = vrot.lane.b32.xlu1 %v7733_v46, %s7372_s3 }
  0xca   : > { %3527 = vrot.lane.b32.xlu0 %v7715_v42, %s7372_s3 }
  0xcd   : > { %3637 = vrot.lane.b32.xlu1 %v7226_v53, %s7373_s20 }
  0xce   : > { %3531 = vrot.lane.b32.xlu0 %v7728_v45, %s7372_s3 }
  0xd1   : > { %v7829_v52 = vpop.permute.xlu0 %1101  ;;  %3641 = vrot.lane.b32.xlu1 %v7230_v55, %s7373_s20 }
  0xd2   : > { %3635 = vrot.lane.b32.xlu0 %v7715_v42, %s7373_s20 }
  0xd4   : > { %v7854_v59 = vpop.permute.xlu1 %1362 }
  0xd5   : > { %v1170_v54 = vpop.permute.xlu0 %1169  ;;  %3645 = vrot.lane.b32.xlu1 %v7852_v58, %s7373_s20 }
  0xd6   : > { %3639 = vrot.lane.b32.xlu0 %v7723_v44, %s7373_s20  ;;  %6281 = vmatprep.mubr.msk.bf16.mxu1 %vm1173_vm3, %v1170_v54 }
  0xd7   : > { %6282 = vmatmul.mubr.msk.bf16.vlgmr.msra.gmra.mrb[0].mxu1 %vm1173_vm3, %v1172_v51 }
  0xd8   : > { %6287 = vmatprep.mubr.msk.bf16.mxu1 %vm1173_vm3, %v7636_v10  ;;  %v7865_v62 = vpop.permute.xlu1 %1372  ;;  %v2571_v10 = vld [vmem:[%s9084_s6] sm:$0xff] }
  0xd9   : > { %v7846_v57 = vpop.permute.xlu0 %1295  ;;  %3649 = vrot.lane.b32.xlu1 %v7861_v61, %s7373_s20 }
  0xda   : > { %3643 = vrot.lane.b32.xlu0 %v7728_v45, %s7373_s20 }
  0xdc   : > { %v7872_v0 = vpop.permute.xlu1 %1598 }
  0xdd   : > { %v7856_v60 = vpop.permute.xlu0 %1367  ;;  %3744 = vrot.lane.b32.xlu1 %v7230_v55, %s7374_s4 }
  0xde   : > { %3647 = vrot.lane.b32.xlu0 %v7733_v46, %s7373_s20 }
  0xe0   : > { %v7879_v2 = vpop.permute.xlu1 %1718 }
  0xe1   : > { %v7867_v63 = vpop.permute.xlu0 %1377  ;;  %3748 = vrot.lane.b32.xlu1 %v7861_v61, %s7374_s4 }
  0xe2   : > { %3742 = vrot.lane.b32.xlu0 %v7226_v53, %s7374_s4 }
  0xe4   : > { %v7886_v4 = vpop.permute.xlu1 %1728 }
  0xe5   : > { %v7874_v1 = vpop.permute.xlu0 %1600  ;;  %3841 = vrot.lane.b32.xlu1 %v7230_v55, %s7375_s30 }
  0xe6   : > { %3746 = vrot.lane.b32.xlu0 %v7852_v58, %s7374_s4 }
  0xe8   : > { %v7893_v6 = vpop.permute.xlu1 %1756 }
  0xe9   : > { %v7881_v3 = vpop.permute.xlu0 %1723  ;;  %3845 = vrot.lane.b32.xlu1 %v7861_v61, %s7375_s30 }
  0xea   : > { %3839 = vrot.lane.b32.xlu0 %v7226_v53, %s7375_s30 }
  0xec   : > { %v7901_v11 = vpop.permute.xlu1 %1876 }
  0xed   : > { %v7888_v5 = vpop.permute.xlu0 %1733  ;;  %3939 = vrot.lane.b32.xlu1 %v7230_v55, %s7376_s29  ;;  %v7234_v55 = vld [vmem:[%s9085_s22 + $0x4] ss:$8 sps:$4 sm:$0xff]  }
  0xee   : > { %3843 = vrot.lane.b32.xlu0 %v7852_v58, %s7375_s30 }
  0xf0   : > { %v7908_v17 = vpop.permute.xlu1 %1909 }
  0xf1   : > { %v7895_v8 = vpop.permute.xlu0 %1758  ;;  %4037 = vperm.xlu1 %7211, %v2572_v15   ;;  %v9015_v15 = vsub.s32 0, %v7689_v31 }
  0xf2   : > { %3937 = vrot.lane.b32.xlu0 %v7226_v53, %s7376_s29 }
  0xf4   : > { %v7914_v23 = vpop.permute.xlu1 %1891 }
  0xf5   : > { %v7903_v12 = vpop.permute.xlu0 %1881  ;;  %4047 = vperm.xlu1 %7211, %v2574_v22   ;;  %v7235_v22 = vld [vmem:[%s9085_s22 + $0x14] ss:$8 sps:$4 sm:$0xff]  }
  0xf6   : > { %4032 = vperm.xlu0 %7210, %v2571_v10  }
  0xf8   : > { %v7920_v26 = vpop.permute.xlu1 %2029 }
  0xf9   : > { %v7910_v18 = vpop.permute.xlu0 %1886  ;;  %4352 = vrot.lane.b32.xlu1 %v7231_v25, %s7361_s13 }
  0xfa   : > { %4042 = vperm.xlu0 %7210, %v2573_v16  }
  0xfc   : > { %v7926_v28 = vpop.permute.xlu1 %2601 }
  0xfd   : > { %v7916_v24 = vpop.permute.xlu0 %1938  ;;  %9086 = vst [vmem:[#allocation13_spill] sm:$0xff] %v7926_v28  ;;  %4466 = vrot.lane.b32.xlu1 %v7231_v25, %s7362_s5 }
  0xfe   : > { %4350 = vrot.lane.b32.xlu0 %v7228_v19, %s7361_s13 }
 0x100   : > { %v7932_v33 = vpop.permute.xlu1 %2605 }
 0x101   : > { %v7922_v27 = vpop.permute.xlu0 %2599  ;;  %9088 = vst [vmem:[#allocation15_spill] sm:$0xff] %v7932_v33  ;;  %4529 = vrot.lane.b32.xlu1 %v7231_v25, %s7365_s25 }
 0x102   : > { %4464 = vrot.lane.b32.xlu0 %v7228_v19, %s7362_s5 }
 0x104   : > { %v7938_v35 = vpop.permute.xlu1 %2766  ;;  %v9174_v48 = vld [vmem:[#allocation13_spill] sm:$0xff] }
 0x105   : > { %v7928_v32 = vpop.permute.xlu0 %2603  ;;  %9090 = vst [vmem:[#allocation17_spill] sm:$0xff] %v7938_v35  ;;  %4592 = vrot.lane.b32.xlu1 %v7231_v25, %s7366_s8 }
 0x106   : > { %9087 = vst [vmem:[#allocation14_spill] sm:$0xff] %v7928_v32  ;;  %4527 = vrot.lane.b32.xlu0 %v7228_v19, %s7365_s25 }
 0x108   : > { %v7944_v38 = vpop.permute.xlu1 %2770 }
 0x109   : > { %v7934_v34 = vpop.permute.xlu0 %2764  ;;  %9092 = vst [vmem:[#allocation19_spill] sm:$0xff] %v7944_v38  ;;  %4655 = vrot.lane.b32.xlu1 %v7231_v25, %s7367_s10 }
 0x10a   : > { %9089 = vst [vmem:[#allocation16_spill] sm:$0xff] %v7934_v34  ;;  %4590 = vrot.lane.b32.xlu0 %v7228_v19, %s7366_s8  ;;  %s9125_s8 = sld [smem:[#allocation96_spill]] }
 0x10c   : > { %v7950_v40 = vpop.permute.xlu1 %2859 }
 0x10d   : > { %v7940_v37 = vpop.permute.xlu0 %2768  ;;  %9094 = vst [vmem:[#allocation21_spill] sm:$0xff] %v7950_v40  ;;  %4718 = vrot.lane.b32.xlu1 %v7231_v25, %s7368_s16 }
 0x10e   : > { %9091 = vst [vmem:[#allocation18_spill] sm:$0xff] %v7940_v37  ;;  %4653 = vrot.lane.b32.xlu0 %v7228_v19, %s7367_s10 }
 0x110   : > { %v7956_v42 = vpop.permute.xlu1 %2863 }
 0x111   : > { %v7946_v39 = vpop.permute.xlu0 %2857  ;;  %9096 = vst [vmem:[#allocation23_spill] sm:$0xff] %v7956_v42  ;;  %4781 = vrot.lane.b32.xlu1 %v7231_v25, %s7369_s0 }
 0x112   : > { %9093 = vst [vmem:[#allocation20_spill] sm:$0xff] %v7946_v39  ;;  %4716 = vrot.lane.b32.xlu0 %v7228_v19, %s7368_s16 }
 0x114   : > { %v7962_v44 = vpop.permute.xlu1 %2955 }
 0x115   : > { %v7952_v41 = vpop.permute.xlu0 %2861  ;;  %9098 = vst [vmem:[#allocation25_spill] sm:$0xff] %v7962_v44  ;;  %4846 = vrot.lane.b32.xlu1 %v7231_v25, %s7370_s24 }
 0x116   : > { %9095 = vst [vmem:[#allocation22_spill] sm:$0xff] %v7952_v41  ;;  %4779 = vrot.lane.b32.xlu0 %v7228_v19, %s7369_s0 }
 0x118   : > { %v7968_v46 = vpop.permute.xlu1 %2959 }
 0x119   : > { %v7958_v43 = vpop.permute.xlu0 %2953  ;;  %9100 = vst [vmem:[#allocation27_spill] sm:$0xff] %v7968_v46  ;;  %4909 = vrot.lane.b32.xlu1 %v7231_v25, %s7371_s23 }
 0x11a   : > { %9097 = vst [vmem:[#allocation24_spill] sm:$0xff] %v7958_v43  ;;  %4844 = vrot.lane.b32.xlu0 %v7228_v19, %s7370_s24 }
 0x11c   : > { %v7974_v53 = vpop.permute.xlu1 %3051 }
 0x11d   : > { %v7964_v45 = vpop.permute.xlu0 %2957  ;;  %9102 = vst [vmem:[#allocation29_spill] sm:$0xff] %v7974_v53  ;;  %4972 = vrot.lane.b32.xlu1 %v7231_v25, %s7372_s3 }
 0x11e   : > { %9099 = vst [vmem:[#allocation26_spill] sm:$0xff] %v7964_v45  ;;  %4907 = vrot.lane.b32.xlu0 %v7228_v19, %s7371_s23 }
 0x120   : > { %v7981_v10 = vpop.permute.xlu1 %3055 }
 0x121   : > { %v7970_v51 = vpop.permute.xlu0 %3049  ;;  %9104 = vst [vmem:[#allocation31_spill] sm:$0xff] %v7981_v10  ;;  %5041 = vrot.lane.b32.xlu1 %v7234_v55, %s7373_s20 }
 0x122   : > { %9101 = vst [vmem:[#allocation28_spill] sm:$0xff] %v7970_v51  ;;  %4970 = vrot.lane.b32.xlu0 %v7228_v19, %s7372_s3 }
 0x124   : > { %v7989_v7 = vpop.permute.xlu1 %3145 }
 0x125   : > { %v7976_v54 = vpop.permute.xlu0 %3053  ;;  %9106 = vst [vmem:[#allocation33_spill] sm:$0xff] %v7989_v7  ;;  %5045 = vrot.lane.b32.xlu1 %v7235_v22, %s7373_s20 }
 0x126   : > { %9103 = vst [vmem:[#allocation30_spill] sm:$0xff] %v7976_v54  ;;  %5039 = vrot.lane.b32.xlu0 %v7228_v19, %s7373_s20  ;;  %v1107_v54 = vrot.slane %v7829_v52, %v9015_v15 }
 0x127   : > { %v1146_v10 = vpop.f32.mrb[0].mxu0 }
 0x128   : > { %v6277_v7 = vpop.f32.mrb[1].mxu0  ;;  %v8006_v51 = vpop.permute.xlu1 %3149 }
 0x129   : > { %v7984_v16 = vpop.permute.xlu0 %3143  ;;  %v1149_v53 = vpop.f32.mrb[2].mxu0  ;;  %9110 = vst [vmem:[#allocation35_spill] sm:$0xff] %v8006_v51  ;;  %5110 = vrot.lane.b32.xlu1 %v7235_v22, %s7374_s4 }
 0x12a   : > { %9105 = vst [vmem:[#allocation32_spill] sm:$0xff] %v7984_v16  ;;  %5043 = vrot.lane.b32.xlu0 %v7231_v25, %s7373_s20  ;;  %v8002_v16 = vld [vmem:[%s9109_s26] sm:$0x1]  ;;  %v1147_v25 = vadd.f32 %v1146_v10, %v1107_v54  ;;  %v6278_v15 = vpop.f32.mrb[3].mxu0 }
 0x12c   : > { %v1152_v52 = vsel %vm1090_vm4, %v8002_v16, %v1147_v25  ;;  %5347 = vst [vmem:[%s1032_s9] sm:$0x1] %v1147_v25  ;;  %v8022_v53 = vpop.permute.xlu1 %3242 }
 0x12d   : > { %v7994_v19 = vpop.permute.xlu0 %3147  ;;  %v1157_v54 = vpack.c.bf16 %v1152_v52, %v1152_v52  ;;  %9113 = vst [vmem:[#allocation37_spill] sm:$0xff] %v8022_v53  ;;  %3943 = vrot.lane.b32.xlu1 %v7861_v61, %s7376_s29  ;;  %v2575_v61 = vld [vmem:[%s9084_s6 + $0x20] sm:$0xff]  ;;  %v8162_v53 = vld [vmem:[%s9125_s8 + $0x68] sm:$0xff]  }
 0x12e   : > { %9107 = vst [vmem:[#allocation34_spill] sm:$0xff] %v7994_v19  ;;  %5108 = vrot.lane.b32.xlu0 %v7234_v55, %s7374_s4 }
 0x12f   : > { %v1242_v7 = vand.u32 %v7766_v47, %v1157_v54 }
 0x130   : > { %v8030_v15 = vpop.permute.xlu1 %3246 }
 0x131   : > { %v8016_v19 = vpop.permute.xlu0 %3240  ;;  %6285 = vmatprep.subr.bf16.mxu1 %v1242_v7  ;;  %9115 = vst [vmem:[#allocation39_spill] sm:$0xff] %v8030_v15  ;;  %5173 = vrot.lane.b32.xlu1 %v7235_v22, %s7375_s30 }
 0x132   : > { %9112 = vst [vmem:[#allocation36_spill] sm:$0xff] %v8016_v19  ;;  %3941 = vrot.lane.b32.xlu0 %v7852_v58, %s7376_s29  ;;  %6286 = vmatpush3.bf16.msra.mxu1 %v1242_v7 }
 0x133   : > { %6291 = vmatprep.subr.bf16.mxu1 %v7632_v9 }
 0x134   : > { %v8043_v25 = vpop.permute.xlu1 %3340 }
 0x135   : > { %v8024_v10 = vpop.permute.xlu0 %3244  ;;  %6288 = vmatmul.mubr.msk.bf16.vlgmr.msra.gmra.mrb[0].mxu1 %vm1173_vm3, %v7644_v13  ;;  %9117 = vst [vmem:[#allocation41_spill] sm:$0xff] %v8043_v25  ;;  %5238 = vrot.lane.b32.xlu1 %v7235_v22, %s7376_s29  ;;  %v2576_v13 = vld [vmem:[%s9084_s6 + $0x28] sm:$0xff]  ;;  %v4336_v25 = vld [vmem:[%s7605_s19] sm:$0xff] }
 0x136   : > { %9114 = vst [vmem:[#allocation38_spill] sm:$0xff] %v8024_v10  ;;  %5171 = vrot.lane.b32.xlu0 %v7234_v55, %s7375_s30  ;;  %6292 = vmatpush3.bf16.msra.mxu1 %v7632_v9  ;;  %v4337_v22 = vld [vmem:[%s7605_s19 + $0x8] sm:$0xff] }
 0x137   : > { %6295 = vmatprep.mubr.msk.bf16.mxu1 %vm1108_vm1, %v7840_v56  ;;  %6293 = vmatprep.subr.bf16.mxu1 %v7647_v14  ;;  %v2578_v56 = vld [vmem:[%s9084_s6 + $0x38] sm:$0xff]  ;;  %v8157_v10 = vld [vmem:[%s9125_s8 + $0x28] sm:$0xff]  }
 0x138   : > { %v8051_v54 = vpop.permute.xlu1 %3344 }
 0x139   : > { %v8032_v58 = vpop.permute.xlu0 %3338  ;;  %9119 = vst [vmem:[#allocation43_spill] sm:$0xff] %v8051_v54  ;;  %4057 = vperm.xlu1 %7211, %v2576_v13   ;;  %v8072_v13 = vld [vmem:[%s9125_s8] sm:$0xff]  }
 0x13a   : > { %9116 = vst [vmem:[#allocation40_spill] sm:$0xff] %v8032_v58  ;;  %5236 = vrot.lane.b32.xlu0 %v7234_v55, %s7376_s29  ;;  %v2577_v55 = vld [vmem:[%s9084_s6 + $0x30] sm:$0xff]  ;;  %6294 = vmatpush3.bf16.msra.mxu1 %v7647_v14 }
 0x13b   : > { %6299 = vmatprep.subr.bf16.mxu0 %v8072_v13 }
 0x13c   : > { %v8057_v58 = vpop.permute.xlu1 %3433  ;;  %6300 = vmatpush3.bf16.msra.mxu0 %v8072_v13 }
 0x13d   : > { %v8045_v52 = vpop.permute.xlu0 %3342  ;;  %9121 = vst [vmem:[#allocation45_spill] sm:$0xff] %v8057_v58  ;;  %4067 = vperm.xlu1 %7211, %v2578_v56   ;;  %v8088_v56 = vld [vmem:[%s9125_s8 + $0x48] sm:$0xff]   ;;  %v8139_v58 = vld [vmem:[%s9125_s8 + $0x20] sm:$0xff]  }
 0x13e   : > { %9118 = vst [vmem:[#allocation42_spill] sm:$0xff] %v8045_v52  ;;  %4052 = vperm.xlu0 %7210, %v2575_v61   ;;  %v4338_v61 = vld [vmem:[%s7605_s19 + $0x10] sm:$0xff] }
 0x140   : > { %v8065_v15 = vpop.permute.xlu1 %3437 }
 0x141   : > { %v8053_v7 = vpop.permute.xlu0 %3431  ;;  %6296 = vmatmul.mubr.msk.bf16.vlgmr.msra.gmra.mrb[0].mxu1 %vm1108_vm1, %v7846_v57  ;;  %9123 = vst [vmem:[#allocation47_spill] sm:$0xff] %v8065_v15  ;;  %5306 = vperm.xlu1 %7211, %v4337_v22   ;;  %v8082_v57 = vld [vmem:[%s9125_s8 + $0x8] sm:$0xff]   ;;  %v8107_v15 = vld [vmem:[%s9125_s8 + $0x50] sm:$0xff]  }
 0x142   : > { %9120 = vst [vmem:[#allocation44_spill] sm:$0xff] %v8053_v7  ;;  %4062 = vperm.xlu0 %7210, %v2577_v55   ;;  %v8077_v55 = vld [vmem:[%s9125_s8 + $0x40] sm:$0xff]   ;;  %6301 = vmatprep.subr.bf16.mxu0 %v8082_v57 }
 0x143   : > { %6319 = vmatprep.subr.bf16.mxu1 %v8077_v55  ;;  %6302 = vmatpush3.bf16.msra.mxu0 %v8082_v57  ;;  %v8144_v7 = vld [vmem:[%s9125_s8 + $0x60] sm:$0xff]  }
 0x144   : > { %v8092_v22 = vpop.permute.xlu1 %3529  ;;  %6320 = vmatpush3.bf16.msra.mxu1 %v8077_v55 }
 0x145   : > { %v8059_v52 = vpop.permute.xlu0 %3435  ;;  %9126 = vst [vmem:[#allocation49_spill] sm:$0xff] %v8092_v22  ;;  %6321 = vmatprep.subr.bf16.mxu1 %v8088_v56 }
 0x146   : > { %9122 = vst [vmem:[#allocation46_spill] sm:$0xff] %v8059_v52  ;;  %5301 = vperm.xlu0 %7210, %v4336_v25   ;;  %v4339_v25 = vld [vmem:[%s7605_s19 + $0x18] sm:$0xff] }
 0x147   : > { %5316 = vperm.xlu1 %7211, %v4339_v25   ;;  %v8126_v52 = vld [vmem:[%s9125_s8 + $0x58] sm:$0xff]  }
 0x148   : > { %v8110_v22 = vpop.permute.xlu1 %3533  ;;  %6322 = vmatpush3.bf16.msra.mxu1 %v8088_v56 }
 0x149   : > { %v8067_v54 = vpop.permute.xlu0 %3527  ;;  %9128 = vst [vmem:[#allocation51_spill] sm:$0xff] %v8110_v22  ;;  %6323 = vmatprep.subr.bf16.mxu1 %v8107_v15 }
 0x14a   : > { %9124 = vst [vmem:[#allocation48_spill] sm:$0xff] %v8067_v54  ;;  %5311 = vperm.xlu0 %7210, %v4338_v61   ;;  %v8102_v61 = vld [vmem:[%s9125_s8 + $0x10] sm:$0xff]  }
 0x14b   : > { %6303 = vmatprep.subr.bf16.mxu0 %v8102_v61 }
 0x14c   : > { %v8128_v22 = vpop.permute.xlu1 %3637  ;;  %6304 = vmatpush3.bf16.msra.mxu0 %v8102_v61  ;;  %6324 = vmatpush3.bf16.msra.mxu1 %v8107_v15 }
 0x14d   : > { %v8096_v54 = vpop.permute.xlu0 %3531  ;;  %9130 = vst [vmem:[#allocation53_spill] sm:$0xff] %v8128_v22  ;;  %6325 = vmatprep.subr.bf16.mxu1 %v8126_v52 }
 0x14e   : > { %9127 = vst [vmem:[#allocation50_spill] sm:$0xff] %v8096_v54  ;;  %v8121_v54 = vld [vmem:[%s9125_s8 + $0x18] sm:$0xff]  }
 0x14f   : > { %6305 = vmatprep.subr.bf16.mxu0 %v8121_v54 }
 0x150   : > { %v8146_v22 = vpop.permute.xlu1 %3641  ;;  %6306 = vmatpush3.bf16.msra.mxu0 %v8121_v54  ;;  %6326 = vmatpush3.bf16.msra.mxu1 %v8126_v52 }
 0x151   : > { %v8114_v25 = vpop.permute.xlu0 %3635  ;;  %9132 = vst [vmem:[#allocation55_spill] sm:$0xff] %v8146_v22  ;;  %6307 = vmatprep.subr.bf16.mxu0 %v8139_v58  ;;  %6327 = vmatprep.subr.bf16.mxu1 %v8144_v7 }
 0x152   : > { %9129 = vst [vmem:[#allocation52_spill] sm:$0xff] %v8114_v25 }
 0x154   : > { %v8164_v22 = vpop.permute.xlu1 %3645  ;;  %6308 = vmatpush3.bf16.msra.mxu0 %v8139_v58  ;;  %6328 = vmatpush3.bf16.msra.mxu1 %v8144_v7 }
 0x155   : > { %v8132_v25 = vpop.permute.xlu0 %3639  ;;  %9134 = vst [vmem:[#allocation57_spill] sm:$0xff] %v8164_v22  ;;  %6309 = vmatprep.subr.bf16.mxu0 %v8157_v10  ;;  %6329 = vmatprep.subr.bf16.mxu1 %v8162_v53 }
 0x156   : > { %9131 = vst [vmem:[#allocation54_spill] sm:$0xff] %v8132_v25 }
 0x158   : > { %v8172_v19 = vpop.permute.xlu1 %3649  ;;  %6310 = vmatpush3.bf16.msra.mxu0 %v8157_v10  ;;  %6330 = vmatpush3.bf16.msra.mxu1 %v8162_v53 }
 0x159   : > { %v8150_v25 = vpop.permute.xlu0 %3643  ;;  %9136 = vst [vmem:[#allocation59_spill] sm:$0xff] %v8172_v19 }
 0x15a   : > { %9133 = vst [vmem:[#allocation56_spill] sm:$0xff] %v8150_v25 }
 0x15c   : > { %v8178_v46 = vpop.permute.xlu1 %3744 }
 0x15d   : > { %v8168_v25 = vpop.permute.xlu0 %3647  ;;  %9138 = vst [vmem:[#allocation61_spill] sm:$0xff] %v8178_v46 }
 0x15e   : > { %9135 = vst [vmem:[#allocation58_spill] sm:$0xff] %v8168_v25 }
 0x160   : > { %v8182_v45 = vpop.permute.xlu1 %3748 }
 0x161   : > { %v8176_v51 = vpop.permute.xlu0 %3742  ;;  %9140 = vst [vmem:[#allocation63_spill] sm:$0xff] %v8182_v45 }
 0x162   : > { %9137 = vst [vmem:[#allocation60_spill] sm:$0xff] %v8176_v51 }
 0x164   : > { %v8186_v25 = vpop.permute.xlu1 %3841 }
 0x165   : > { %v8180_v22 = vpop.permute.xlu0 %3746  ;;  %9142 = vst [vmem:[#allocation65_spill] sm:$0xff] %v8186_v25 }
 0x166   : > { %9139 = vst [vmem:[#allocation62_spill] sm:$0xff] %v8180_v22 }
 0x168   : > { %v8190_v42 = vpop.permute.xlu1 %3845 }
 0x169   : > { %v8184_v44 = vpop.permute.xlu0 %3839  ;;  %9144 = vst [vmem:[#allocation67_spill] sm:$0xff] %v8190_v42 }
 0x16a   : > { %9141 = vst [vmem:[#allocation64_spill] sm:$0xff] %v8184_v44 }
 0x16c   : > { %v8194_v41 = vpop.permute.xlu1 %3939 }
 0x16d   : > { %v8188_v43 = vpop.permute.xlu0 %3843  ;;  %9146 = vst [vmem:[#allocation69_spill] sm:$0xff] %v8194_v41 }
 0x16e   : > { %9143 = vst [vmem:[#allocation66_spill] sm:$0xff] %v8188_v43 }
 0x170   : > { %v8198_v51 = vpop.permute.xlu1 %4037 }
 0x171   : > { %v8192_v19 = vpop.permute.xlu0 %3937  ;;  %9148 = vst [vmem:[#allocation71_spill] sm:$0xff] %v8198_v51 }
 0x172   : > { %9145 = vst [vmem:[#allocation68_spill] sm:$0xff] %v8192_v19 }
 0x174   : > { %v8202_v22 = vpop.permute.xlu1 %4047 }
 0x175   : > { %v8196_v40 = vpop.permute.xlu0 %4032  ;;  %9150 = vst [vmem:[#allocation73_spill] sm:$0xff] %v8202_v22 }
 0x176   : > { %9147 = vst [vmem:[#allocation70_spill] sm:$0xff] %v8196_v40 }
 0x178   : > { %v8206_v44 = vpop.permute.xlu1 %4352 }
 0x179   : > { %v8200_v46 = vpop.permute.xlu0 %4042  ;;  %9152 = vst [vmem:[#allocation75_spill] sm:$0xff] %v8206_v44 }
 0x17a   : > { %9149 = vst [vmem:[#allocation72_spill] sm:$0xff] %v8200_v46 }
 0x17c   : > { %v8210_v43 = vpop.permute.xlu1 %4466 }
 0x17d   : > { %v8204_v45 = vpop.permute.xlu0 %4350  ;;  %9154 = vst [vmem:[#allocation77_spill] sm:$0xff] %v8210_v43 }
 0x17e   : > { %9151 = vst [vmem:[#allocation74_spill] sm:$0xff] %v8204_v45 }
 0x180   : > { %v8214_v19 = vpop.permute.xlu1 %4529 }
 0x181   : > { %v8208_v25 = vpop.permute.xlu0 %4464  ;;  %9156 = vst [vmem:[#allocation79_spill] sm:$0xff] %v8214_v19  ;;  %v8235_v19 = vld [vmem:[%s9125_s8 + $0x30] sm:$0xff]  }
 0x182   : > { %9153 = vst [vmem:[#allocation76_spill] sm:$0xff] %v8208_v25  ;;  %6311 = vmatprep.subr.bf16.mxu0 %v8235_v19 }
 0x183   : > { %6312 = vmatpush3.bf16.msra.mxu0 %v8235_v19 }
 0x184   : > { %v8218_v40 = vpop.permute.xlu1 %4592 }
 0x185   : > { %v8212_v42 = vpop.permute.xlu0 %4527  ;;  %9158 = vst [vmem:[#allocation81_spill] sm:$0xff] %v8218_v40  ;;  %v8240_v40 = vld [vmem:[%s9125_s8 + $0x70] sm:$0xff]  }
 0x186   : > { %9155 = vst [vmem:[#allocation78_spill] sm:$0xff] %v8212_v42  ;;  %6331 = vmatprep.subr.bf16.mxu1 %v8240_v40 }
 0x187   : > { %6332 = vmatpush3.bf16.msra.mxu1 %v8240_v40 }
 0x188   : > { %v8222_v46 = vpop.permute.xlu1 %4655 }
 0x189   : > { %v8216_v41 = vpop.permute.xlu0 %4590  ;;  %9160 = vst [vmem:[#allocation83_spill] sm:$0xff] %v8222_v46 }
 0x18a   : > { %9157 = vst [vmem:[#allocation80_spill] sm:$0xff] %v8216_v41 }
 0x18c   : > { %v8226_v45 = vpop.permute.xlu1 %4718 }
 0x18d   : > { %v8220_v51 = vpop.permute.xlu0 %4653  ;;  %9162 = vst [vmem:[#allocation85_spill] sm:$0xff] %v8226_v45  ;;  %v8258_v45 = vld [vmem:[%s9125_s8 + $0x78] sm:$0xff]  }
 0x18e   : > { %9159 = vst [vmem:[#allocation82_spill] sm:$0xff] %v8220_v51  ;;  %6333 = vmatprep.subr.bf16.mxu1 %v8258_v45 }
 0x18f   : > { %6334 = vmatpush3.bf16.msra.mxu1 %v8258_v45 }
 0x190   : > { %v8230_v25 = vpop.permute.xlu1 %4781 }
 0x191   : > { %v8224_v22 = vpop.permute.xlu0 %4716  ;;  %9164 = vst [vmem:[#allocation87_spill] sm:$0xff] %v8230_v25 }
 0x192   : > { %9161 = vst [vmem:[#allocation84_spill] sm:$0xff] %v8224_v22 }
 0x194   : > { %v8248_v25 = vpop.permute.xlu1 %4846 }
 0x195   : > { %v8228_v44 = vpop.permute.xlu0 %4779  ;;  %9166 = vst [vmem:[#allocation89_spill] sm:$0xff] %v8248_v25 }
 0x196   : > { %9163 = vst [vmem:[#allocation86_spill] sm:$0xff] %v8228_v44  ;;  %v8253_v44 = vld [vmem:[%s9125_s8 + $0x38] sm:$0xff]  }
 0x197   : > { %6313 = vmatprep.subr.bf16.mxu0 %v8253_v44 }
 0x198   : > { %6314 = vmatpush3.bf16.msra.mxu0 %v8253_v44  ;;  %v8266_v25 = vpop.permute.xlu1 %4909 }
 0x199   : > { %v8242_v51 = vpop.permute.xlu0 %4844  ;;  %9168 = vst [vmem:[#allocation91_spill] sm:$0xff] %v8266_v25 }
 0x19a   : > { %9165 = vst [vmem:[#allocation88_spill] sm:$0xff] %v8242_v51 }
 0x19c   : > { %v8270_v46 = vpop.permute.xlu1 %4972 }
 0x19d   : > { %v8260_v51 = vpop.permute.xlu0 %4907  ;;  %9170 = vst [vmem:[#allocation93_spill] sm:$0xff] %v8270_v46 }
 0x19e   : > { %9167 = vst [vmem:[#allocation90_spill] sm:$0xff] %v8260_v51 }
 0x1a0   : > { %v5042_v42 = vpop.permute.xlu1 %5041 }
 0x1a1   : > { %v8268_v22 = vpop.permute.xlu0 %4970 }
 0x1a2   : > { %9169 = vst [vmem:[#allocation92_spill] sm:$0xff] %v8268_v22 }
 0x1a4   : > { %v5046_v39 = vpop.permute.xlu1 %5045 }
 0x1a5   : > { %v5040_v41 = vpop.permute.xlu0 %5039 }
 0x1a6   : > { %v8273_v43 = vsel %vm3651_vm5, %v5040_v41, %v5042_v42 }
 0x1a9   : > { %v5044_v51 = vpop.permute.xlu0 %5043 }
 0x1aa   : > { %v8276_v38 = vsel %vm3651_vm5, %v5044_v51, %v5046_v39 }
 0x214   : > { %v6297_v37 = vpop.f32.mrb[0].mxu1 }
 0x215   : > { %v1337_v35 = vpop.f32.mrb[1].mxu1  ;;  %v1382_v25 = vadd.f32 %v6297_v37, %v7865_v62 }
 0x216   : > { %v6298_v34 = vpop.f32.mrb[2].mxu1  ;;  %v1380_v46 = vadd.f32 %v7854_v59, %v1337_v35 }
 0x217   : > { %v1383_v22 = vadd.f32 %v6298_v34, %v7867_v63  ;;  %v1340_v33 = vpop.f32.mrb[3].mxu1 }
 0x218   : > { %v1381_v32 = vadd.f32 %v7856_v60, %v1340_v33 }
 0x219   : > { %v1389_v28 = vpack.c.bf16 %v1383_v22, %v1382_v25 }
 0x21a   : > { %v1388_v41 = vpack.c.bf16 %v1381_v32, %v1380_v46 }
 0x21c   : > { %6315 = vmatprep.mubr.bf16.mxu0 %v1388_v41  ;;  %6335 = vmatprep.mubr.bf16.mxu1 %v1388_v41 }
 0x21d   : > { %6316 = vmatmul.mubr.bf16.vlgmr.msra.gmra.mrb[4].mxu0 %v1389_v28  ;;  %6336 = vmatmul.mubr.bf16.vlgmr.msra.gmra.mrb[4].mxu1 %v1389_v28 }
 0x21e   : > { %6343 = vmatprep.mubr.msk.bf16.mxu1 %vm1108_vm1, %v7872_v0  ;;  %6351 = vmatprep.mubr.msk.bf16.mxu0 %vm1108_vm1, %v7673_v21  ;;  %v9171_v21 = vmov 0.0  }
 0x2f0   : > { %v6317_v62 = vpop.f32.mrb[4].mxu0  ;;  %v6337_v37 = vpop.f32.mrb[4].mxu1 }
 0x2f1   : > { %v1472_v63 = vpop.f32.mrb[5].mxu0  ;;  %v1571_v34 = vpop.f32.mrb[5].mxu1 }
 0x2f2   : > { %v6318_v39 = vpop.f32.mrb[6].mxu0  ;;  %v6338_v59 = vpop.f32.mrb[6].mxu1 }
 0x2f3   : > { %v1488_v35 = vpack.c.bf16 %v6318_v39, %v6317_v62  ;;  %v1587_v60 = vpack.c.bf16 %v6338_v59, %v6337_v37  ;;  %v1475_v33 = vpop.f32.mrb[7].mxu0  ;;  %v1574_v32 = vpop.f32.mrb[7].mxu1 }
 0x2f4   : > { %v1487_v42 = vpack.c.bf16 %v1475_v33, %v1472_v63  ;;  %v1586_v46 = vpack.c.bf16 %v1574_v32, %v1571_v34 }
 0x2f6   : > { %6339 = vmatprep.subr.bf16.mxu1 %v1586_v46  ;;  %6347 = vmatprep.subr.bf16.mxu0 %v1487_v42 }
 0x2f7   : > { %6340 = vmatpush3.bf16.msra.mxu1 %v1586_v46  ;;  %6348 = vmatpush3.bf16.msra.mxu0 %v1487_v42 }
 0x2f8   : > { %6341 = vmatprep.subr.bf16.mxu1 %v1587_v60  ;;  %6349 = vmatprep.subr.bf16.mxu0 %v1488_v35 }
 0x2fb   : > { %6342 = vmatpush3.bf16.msra.mxu1 %v1587_v60  ;;  %6350 = vmatpush3.bf16.msra.mxu0 %v1488_v35 }
 0x2fc   : > { %6355 = vmatprep.subr.bf16.mxu1 %v7632_v9  ;;  %6371 = vmatprep.subr.bf16.mxu0 %v9171_v21 }
 0x2fe   : > { %6344 = vmatmul.mubr.msk.bf16.vlgmr.msra.gmra.mrb[8].mxu1 %vm1108_vm1, %v7874_v1  ;;  %6352 = vmatmul.mubr.msk.bf16.vlgmr.msra.gmra.mrb[8].mxu0 %vm1108_vm1, %v7670_v20 }
 0x2ff   : > { %6356 = vmatpush3.bf16.msra.mxu1 %v7632_v9  ;;  %6359 = vmatprep.mubr.msk.bf16.mxu1 %vm1108_vm1, %v7893_v6 }
 0x300   : > { %6357 = vmatprep.subr.bf16.mxu1 %v7647_v14  ;;  %6372 = vmatpush3.bf16.msra.mxu0 %v7632_v9 }
 0x301   : > { %6373 = vmatprep.subr.bf16.mxu0 %v9171_v21  ;;  %6375 = vmatprep.mubr.msk.bf16.mxu0 %vm7360_vm0, %v9171_v21 }
 0x303   : > { %6358 = vmatpush3.bf16.msra.mxu1 %v7647_v14 }
 0x304   : > { %6374 = vmatpush3.bf16.msra.mxu0 %v7647_v14 }
 0x305   : > { %6379 = vmatprep.subr.bf16.mxu0 %v9171_v21 }
 0x306   : > { %6360 = vmatmul.mubr.msk.bf16.vlgmr.msra.gmra.mrb[12].mxu1 %vm1108_vm1, %v7895_v8 }
 0x307   : > { %6367 = vmatprep.mubr.msk.bf16.mxu1 %vm1108_vm1, %v7684_v29  ;;  %6376 = vmatmul.mubr.msk.bf16.vlgmr.msra.gmra.mrb[12].mxu0 %vm1108_vm1, %v7916_v24 }
 0x308   : > { %6383 = vmatprep.mubr.msk.bf16.mxu0 %vm7360_vm0, %v9171_v21 }
 0x3d1   : > { %v6345_v20 = vpop.f32.mrb[8].mxu1  ;;  %v6353_v0 = vpop.f32.mrb[8].mxu0 }
 0x3d2   : > { %v1706_v1 = vadd.f32 %v6353_v0, %v6345_v20  ;;  %v1642_v6 = vpop.f32.mrb[9].mxu1  ;;  %v1697_v28 = vpop.f32.mrb[9].mxu0 }
 0x3d3   : > { %v1698_v51 = vadd.f32 %v1697_v28, %v1642_v6  ;;  %v6346_v22 = vpop.f32.mrb[10].mxu1  ;;  %v6354_v25 = vpop.f32.mrb[10].mxu0 }
 0x3d4   : > { %v1709_v41 = vadd.f32 %v6354_v25, %v6346_v22  ;;  %v1645_v62 = vpop.f32.mrb[11].mxu1  ;;  %v1700_v8 = vpop.f32.mrb[11].mxu0  ;;  %v1738_v29 = vadd.f32 %v7886_v4, %v1706_v1 }
 0x3d5   : > { %v1701_v37 = vadd.f32 %v1700_v8, %v1645_v62  ;;  %v1736_v24 = vadd.f32 %v7879_v2, %v1698_v51 }
 0x3d6   : > { %v1739_v63 = vadd.f32 %v7888_v5, %v1709_v41 }
 0x3d7   : > { %v1737_v34 = vadd.f32 %v7881_v3, %v1701_v37 }
 0x3d8   : > { %v1745_v39 = vpack.c.bf16 %v1739_v63, %v1738_v29 }
 0x3d9   : > { %v1744_v59 = vpack.c.bf16 %v1737_v34, %v1736_v24  ;;  %v7294_v34 = vld [vmem:[%s9075_s28 + $0x20] ss:$8 sps:$4 sm:$0xff]  }
 0x3db   : > { %6363 = vmatprep.subr.bf16.mxu1 %v1744_v59 }
 0x3dc   : > { %6364 = vmatpush3.bf16.msra.mxu1 %v1744_v59  ;;  %v9177_v59 = vld [vmem:[#allocation16_spill] sm:$0xff] }
 0x3dd   : > { %6365 = vmatprep.subr.bf16.mxu1 %v1745_v39 }
 0x3e0   : > { %6366 = vmatpush3.bf16.msra.mxu1 %v1745_v39  ;;  %v7295_v39 = vld [vmem:[%s9075_s28 + $0x30] ss:$8 sps:$4 sm:$0xff]  }
 0x3e1   : > { %6387 = vmatprep.subr.bf16.mxu1 %v9171_v21 }
 0x3e3   : > { %6368 = vmatmul.mubr.msk.bf16.vlgmr.msra.gmra.mrb[12].mxu1 %vm1108_vm1, %v7687_v30  ;;  %v1977_v30 = vpop.f32.mrb[12].mxu0 }
 0x3e4   : > { %6388 = vmatpush3.bf16.msra.mxu1 %v8072_v13  ;;  %6403 = vmatprep.mubr.msk.bf16.mxu1 %vm7360_vm0, %v9171_v21  ;;  %v6377_v2 = vpop.f32.mrb[13].mxu0 }
 0x3e5   : > { %6389 = vmatprep.subr.bf16.mxu1 %v9171_v21  ;;  %v1980_v3 = vpop.f32.mrb[14].mxu0  ;;  %v9179_v2 = vld [vmem:[#allocation18_spill] sm:$0xff] }
 0x3e6   : > { %v6378_v4 = vpop.f32.mrb[15].mxu0  ;;  %v9180_v3 = vld [vmem:[#allocation19_spill] sm:$0xff] }
 0x3e8   : > { %6390 = vmatpush3.bf16.msra.mxu1 %v8082_v57 }
 0x3e9   : > { %6391 = vmatprep.subr.bf16.mxu1 %v9171_v21 }
 0x3ec   : > { %6392 = vmatpush3.bf16.msra.mxu1 %v8102_v61 }
 0x3ed   : > { %6393 = vmatprep.subr.bf16.mxu1 %v9171_v21 }
 0x3f0   : > { %6394 = vmatpush3.bf16.msra.mxu1 %v8121_v54 }
 0x3f1   : > { %6395 = vmatprep.subr.bf16.mxu1 %v9171_v21 }
 0x3f4   : > { %6396 = vmatpush3.bf16.msra.mxu1 %v8139_v58 }
 0x3f5   : > { %6397 = vmatprep.subr.bf16.mxu1 %v9171_v21 }
 0x3f8   : > { %6398 = vmatpush3.bf16.msra.mxu1 %v8157_v10 }
 0x3f9   : > { %6399 = vmatprep.subr.bf16.mxu1 %v9171_v21 }
 0x3fc   : > { %6400 = vmatpush3.bf16.msra.mxu1 %v8235_v19 }
 0x3fd   : > { %6401 = vmatprep.subr.bf16.mxu1 %v9171_v21 }
 0x400   : > { %6402 = vmatpush3.bf16.msra.mxu1 %v8253_v44 }
 0x401   : > { %6427 = vmatprep.subr.bf16.mxu1 %v9171_v21 }
 0x4b6   : > { %v6369_v5 = vpop.f32.mrb[12].mxu1 }
 0x4b7   : > { %v1896_v35 = vadd.f32 %v6369_v5, %v7910_v18  ;;  %v1855_v60 = vpop.f32.mrb[13].mxu1 }
 0x4b8   : > { %v1894_v33 = vadd.f32 %v7901_v11, %v1855_v60  ;;  %v6370_v32 = vpop.f32.mrb[14].mxu1 }
 0x4b9   : > { %vm1901_vm6 = vcmp.ge.f32.partialorder %v1896_v35, 0.0  ;;  %v1914_v42 = vmul.f32 %v7908_v17, %v1896_v35  ;;  %v1897_v46 = vadd.f32 %v6370_v32, %v7914_v23  ;;  %v1858_v20 = vpop.f32.mrb[15].mxu1  ;;  %v9182_v32 = vld [vmem:[#allocation21_spill] sm:$0xff] }
 0x4ba   : > { %vm1899_vm7 = vcmp.ge.f32.partialorder %v1894_v33, 0.0  ;;  %v1912_v0 = vmul.f32 %v7908_v17, %v1894_v33  ;;  %v1895_v1 = vadd.f32 %v7903_v12, %v1858_v20  ;;  %v9172_v12 = vsub.s32 0, %v7689_v31  ;;  %v9185_v20 = vld [vmem:[#allocation24_spill] sm:$0xff] }
 0x4bb   : > { %v1918_v6 = vsel %vm1901_vm6, %v1896_v35, %v1914_v42  ;;  %vm1902_vm8 = vcmp.ge.f32.partialorder %v1897_v46, 0.0  ;;  %v1915_v18 = vmul.f32 %v7908_v17, %v1897_v46  ;;  %v9183_v42 = vld [vmem:[#allocation22_spill] sm:$0xff] }
 0x4bc   : > { %5351 = vst [vmem:[%s7621_s21 + $0x10] sm:$0xff] %v1918_v6  ;;  %v1916_v11 = vsel %vm1899_vm7, %v1894_v33, %v1912_v0  ;;  %vm1900_vm9 = vcmp.ge.f32.partialorder %v1895_v1, 0.0  ;;  %v1913_v28 = vmul.f32 %v7908_v17, %v1895_v1  ;;  %v2035_v17 = vrot.slane %v7920_v26, %v9172_v12  ;;  %v9176_v26 = vld [vmem:[#allocation15_spill] sm:$0xff]  ;;  %v9186_v12 = vld [vmem:[#allocation25_spill] sm:$0xff] }
 0x4bd   : > { %5349 = vst [vmem:[%s7621_s21] sm:$0xff] %v1916_v11  ;;  %v1919_v51 = vsel %vm1902_vm8, %v1897_v46, %v1915_v18  ;;  %v9184_v46 = vld [vmem:[#allocation23_spill] sm:$0xff] }
 0x4be   : > { %v1922_v22 = vpack.c.bf16 %v1919_v51, %v1918_v6  ;;  %5352 = vst [vmem:[%s7621_s21 + $0x18] sm:$0xff] %v1919_v51  ;;  %v1917_v23 = vsel %vm1900_vm9, %v1895_v1, %v1913_v28 }
 0x4bf   : > { %v1921_v25 = vpack.c.bf16 %v1917_v23, %v1916_v11  ;;  %5350 = vst [vmem:[%s7621_s21 + $0x8] sm:$0xff] %v1917_v23 }
 0x4c1   : > { %6380 = vmatpush3.bf16.msra.mxu0 %v1921_v25 }
 0x4c2   : > { %6381 = vmatprep.subr.bf16.mxu0 %v9171_v21 }
 0x4c5   : > { %6382 = vmatpush3.bf16.msra.mxu0 %v1922_v22 }
 0x4c6   : > { %6407 = vmatprep.subr.bf16.mxu0 %v9171_v21 }
 0x4c8   : > { %6384 = vmatmul.mubr.msk.bf16.vlgmr.msra.gmra.mrb[16].mxu0 %vm1108_vm1, %v7703_v36 }
 0x4c9   : > { %6408 = vmatpush3.bf16.msra.mxu0 %v8072_v13  ;;  %6423 = vmatprep.mubr.msk.bf16.mxu0 %vm7360_vm0, %v9171_v21 }
 0x4ca   : > { %6409 = vmatprep.subr.bf16.mxu0 %v9171_v21 }
 0x4cd   : > { %6410 = vmatpush3.bf16.msra.mxu0 %v8082_v57 }
 0x4ce   : > { %6411 = vmatprep.subr.bf16.mxu0 %v9171_v21 }
 0x4d1   : > { %6412 = vmatpush3.bf16.msra.mxu0 %v8102_v61 }
 0x4d2   : > { %6413 = vmatprep.subr.bf16.mxu0 %v9171_v21 }
 0x4d5   : > { %6414 = vmatpush3.bf16.msra.mxu0 %v8121_v54 }
 0x4d6   : > { %6415 = vmatprep.subr.bf16.mxu0 %v9171_v21 }
 0x4d9   : > { %6416 = vmatpush3.bf16.msra.mxu0 %v8139_v58 }
 0x4da   : > { %6417 = vmatprep.subr.bf16.mxu0 %v9171_v21 }
 0x4dd   : > { %6418 = vmatpush3.bf16.msra.mxu0 %v8157_v10 }
 0x4de   : > { %6419 = vmatprep.subr.bf16.mxu0 %v9171_v21 }
 0x4e1   : > { %6420 = vmatpush3.bf16.msra.mxu0 %v8235_v19 }
 0x4e2   : > { %6421 = vmatprep.subr.bf16.mxu0 %v9171_v21 }
 0x4e5   : > { %6422 = vmatpush3.bf16.msra.mxu0 %v8253_v44 }
 0x4e6   : > { %6447 = vmatprep.subr.bf16.mxu0 %v9171_v21 }
 0x59b   : > { %v2020_v36 = vpop.f32.mrb[16].mxu0 }
 0x59c   : > { %v2021_v41 = vadd.f32 %v2020_v36, %v1977_v30  ;;  %v6385_v62 = vpop.f32.mrb[17].mxu0  ;;  %v9178_v30 = vld [vmem:[#allocation17_spill] sm:$0xff] }
 0x59d   : > { %v2023_v8 = vpop.f32.mrb[18].mxu0  ;;  %v9189_v62 = vld [vmem:[#allocation28_spill] sm:$0xff] }
 0x59e   : > { %v2036_v37 = vadd.f32 %v2035_v17, %v2021_v41  ;;  %v6386_v29 = vpop.f32.mrb[19].mxu0  ;;  %v9187_v17 = vld [vmem:[#allocation26_spill] sm:$0xff]  ;;  %v9188_v41 = vld [vmem:[#allocation27_spill] sm:$0xff] }
 0x5a0   : > { %v2037_v63 = vsel %vm1090_vm4, %v8002_v16, %v2036_v37  ;;  %5348 = vst [vmem:[%s1025_s2] sm:$0x1] %v2036_v37  ;;  %v7292_v16 = vld [vmem:[%s9075_s28] ss:$8 sps:$4 sm:$0xff]  }
 0x5a1   : > { %v8381_v24 = vpack.c.bf16 %v2037_v63, %v2037_v63 }
 0x5a3   : > { %6404 = vmatmul.mubr.bf16.vlgmr.msra.gmra.mrb[16].mxu1 %v8381_v24  ;;  %v8479_v31 = vand.u32 %v8381_v24, %v7766_v47 }
 0x5a4   : > { %6428 = vmatpush3.bf16.msra.mxu1 %v8077_v55  ;;  %6443 = vmatprep.mubr.msk.bf16.mxu1 %vm7360_vm0, %v9171_v21 }
 0x5a5   : > { %6429 = vmatprep.subr.bf16.mxu1 %v9171_v21 }
 0x5a8   : > { %6430 = vmatpush3.bf16.msra.mxu1 %v8088_v56 }
 0x5a9   : > { %6431 = vmatprep.subr.bf16.mxu1 %v9171_v21 }
 0x5ac   : > { %6432 = vmatpush3.bf16.msra.mxu1 %v8107_v15 }
 0x5ad   : > { %6433 = vmatprep.subr.bf16.mxu1 %v9171_v21 }
 0x5b0   : > { %6434 = vmatpush3.bf16.msra.mxu1 %v8126_v52 }
 0x5b1   : > { %6435 = vmatprep.subr.bf16.mxu1 %v9171_v21 }
 0x5b4   : > { %6436 = vmatpush3.bf16.msra.mxu1 %v8144_v7 }
 0x5b5   : > { %6437 = vmatprep.subr.bf16.mxu1 %v9171_v21 }
 0x5b8   : > { %6438 = vmatpush3.bf16.msra.mxu1 %v8162_v53 }
 0x5b9   : > { %6439 = vmatprep.subr.bf16.mxu1 %v9171_v21 }
 0x5bc   : > { %6440 = vmatpush3.bf16.msra.mxu1 %v8240_v40 }
 0x5bd   : > { %6441 = vmatprep.subr.bf16.mxu1 %v9171_v21 }
 0x5c0   : > { %6442 = vmatpush3.bf16.msra.mxu1 %v8258_v45 }
 0x5c1   : > { %6467 = vmatprep.subr.bf16.mxu1 %v9171_v21 }
 0x5c3   : > { %6444 = vmatmul.mubr.bf16.vlgmr.msra.gmra.mrb[20].mxu1 %v8381_v24 }
 0x5c4   : > { %6468 = vmatpush3.bf16.msra.mxu1 %v8072_v13  ;;  %6483 = vmatprep.mubr.msk.bf16.mxu1 %vm7360_vm0, %v9171_v21 }
 0x5c5   : > { %6469 = vmatprep.subr.bf16.mxu1 %v9171_v21 }
 0x5c8   : > { %6470 = vmatpush3.bf16.msra.mxu1 %v8082_v57 }
 0x5c9   : > { %6471 = vmatprep.subr.bf16.mxu1 %v9171_v21 }
 0x5cc   : > { %6472 = vmatpush3.bf16.msra.mxu1 %v8102_v61 }
 0x5cd   : > { %6473 = vmatprep.subr.bf16.mxu1 %v9171_v21 }
 0x5d0   : > { %6474 = vmatpush3.bf16.msra.mxu1 %v8121_v54 }
 0x5d1   : > { %6475 = vmatprep.subr.bf16.mxu1 %v9171_v21 }
 0x5d4   : > { %6476 = vmatpush3.bf16.msra.mxu1 %v8139_v58 }
 0x5d5   : > { %6477 = vmatprep.subr.bf16.mxu1 %v9171_v21 }
 0x5d8   : > { %6478 = vmatpush3.bf16.msra.mxu1 %v8157_v10 }
 0x5d9   : > { %6479 = vmatprep.subr.bf16.mxu1 %v9171_v21 }
 0x5dc   : > { %6480 = vmatpush3.bf16.msra.mxu1 %v8235_v19 }
 0x5dd   : > { %6481 = vmatprep.subr.bf16.mxu1 %v9171_v21 }
 0x5e0   : > { %6482 = vmatpush3.bf16.msra.mxu1 %v8253_v44 }
 0x5e1   : > { %6507 = vmatprep.subr.bf16.mxu1 %v9171_v21 }
 0x5e3   : > { %6484 = vmatmul.mubr.bf16.vlgmr.msra.gmra.mrb[24].mxu1 %v7781_v49 }
 0x5e4   : > { %6508 = vmatpush3.bf16.msra.mxu1 %v8077_v55  ;;  %6523 = vmatprep.mubr.msk.bf16.mxu1 %vm7360_vm0, %v9171_v21 }
 0x5e5   : > { %6509 = vmatprep.subr.bf16.mxu1 %v9171_v21 }
 0x5e8   : > { %6510 = vmatpush3.bf16.msra.mxu1 %v8088_v56 }
 0x5e9   : > { %6511 = vmatprep.subr.bf16.mxu1 %v9171_v21 }
 0x5ec   : > { %6512 = vmatpush3.bf16.msra.mxu1 %v8107_v15 }
 0x5ed   : > { %6513 = vmatprep.subr.bf16.mxu1 %v9171_v21 }
 0x5f0   : > { %6514 = vmatpush3.bf16.msra.mxu1 %v8126_v52 }
 0x5f1   : > { %6515 = vmatprep.subr.bf16.mxu1 %v9171_v21 }
 0x5f4   : > { %6516 = vmatpush3.bf16.msra.mxu1 %v8144_v7 }
 0x5f5   : > { %6517 = vmatprep.subr.bf16.mxu1 %v9171_v21 }
 0x5f8   : > { %6518 = vmatpush3.bf16.msra.mxu1 %v8162_v53 }
 0x5f9   : > { %6519 = vmatprep.subr.bf16.mxu1 %v9171_v21 }
 0x5fc   : > { %6520 = vmatpush3.bf16.msra.mxu1 %v8240_v40 }
 0x5fd   : > { %6521 = vmatprep.subr.bf16.mxu1 %v9171_v21 }
 0x600   : > { %6522 = vmatpush3.bf16.msra.mxu1 %v8258_v45 }
 0x601   : > { %6547 = vmatprep.subr.bf16.mxu1 %v8072_v13 }
 0x603   : > { %6524 = vmatmul.mubr.bf16.vlgmr.msra.gmra.mrb[28].mxu1 %v7781_v49  ;;  %v9175_v49 = vld [vmem:[#allocation14_spill] sm:$0xff] }
 0x604   : > { %6548 = vmatpush3.bf16.msra.mxu1 %v8072_v13  ;;  %6563 = vmatprep.mubr.bf16.mxu1 %v7632_v9 }
 0x605   : > { %6549 = vmatprep.subr.bf16.mxu1 %v8082_v57 }
 0x608   : > { %6550 = vmatpush3.bf16.msra.mxu1 %v8082_v57 }
 0x609   : > { %6551 = vmatprep.subr.bf16.mxu1 %v8102_v61 }
 0x60c   : > { %6552 = vmatpush3.bf16.msra.mxu1 %v8102_v61 }
 0x60d   : > { %6553 = vmatprep.subr.bf16.mxu1 %v8121_v54 }
 0x610   : > { %6554 = vmatpush3.bf16.msra.mxu1 %v8121_v54 }
 0x611   : > { %6555 = vmatprep.subr.bf16.mxu1 %v8139_v58 }
 0x614   : > { %6556 = vmatpush3.bf16.msra.mxu1 %v8139_v58 }
 0x615   : > { %6557 = vmatprep.subr.bf16.mxu1 %v8157_v10 }
 0x618   : > { %6558 = vmatpush3.bf16.msra.mxu1 %v8157_v10 }
 0x619   : > { %6559 = vmatprep.subr.bf16.mxu1 %v8235_v19 }
 0x61c   : > { %6560 = vmatpush3.bf16.msra.mxu1 %v8235_v19 }
 0x61d   : > { %6561 = vmatprep.subr.bf16.mxu1 %v8253_v44 }
 0x620   : > { %6562 = vmatpush3.bf16.msra.mxu1 %v8253_v44 }
 0x621   : > { %6587 = vmatprep.subr.bf16.mxu1 %v8077_v55 }
 0x623   : > { %6564 = vmatmul.mubr.bf16.vlgmr.msra.gmra.mrb[32].mxu1 %v7647_v14 }
 0x624   : > { %6588 = vmatpush3.bf16.msra.mxu1 %v8077_v55  ;;  %6603 = vmatprep.mubr.bf16.mxu1 %v7632_v9 }
 0x625   : > { %6589 = vmatprep.subr.bf16.mxu1 %v8088_v56 }
 0x628   : > { %6590 = vmatpush3.bf16.msra.mxu1 %v8088_v56 }
 0x629   : > { %6591 = vmatprep.subr.bf16.mxu1 %v8107_v15 }
 0x62c   : > { %6592 = vmatpush3.bf16.msra.mxu1 %v8107_v15 }
 0x62d   : > { %6593 = vmatprep.subr.bf16.mxu1 %v8126_v52 }
 0x630   : > { %6594 = vmatpush3.bf16.msra.mxu1 %v8126_v52 }
 0x631   : > { %6595 = vmatprep.subr.bf16.mxu1 %v8144_v7 }
 0x634   : > { %6596 = vmatpush3.bf16.msra.mxu1 %v8144_v7 }
 0x635   : > { %6597 = vmatprep.subr.bf16.mxu1 %v8162_v53 }
 0x638   : > { %6598 = vmatpush3.bf16.msra.mxu1 %v8162_v53 }
 0x639   : > { %6599 = vmatprep.subr.bf16.mxu1 %v8240_v40 }
 0x63c   : > { %6600 = vmatpush3.bf16.msra.mxu1 %v8240_v40 }
 0x63d   : > { %6601 = vmatprep.subr.bf16.mxu1 %v8258_v45 }
 0x640   : > { %6602 = vmatpush3.bf16.msra.mxu1 %v8258_v45 }
 0x641   : > { %6627 = vmatprep.subr.bf16.mxu1 %v7785_v50 }
 0x643   : > { %6604 = vmatmul.mubr.bf16.vlgmr.msra.gmra.mrb[36].mxu1 %v7647_v14 }
 0x644   : > { %6628 = vmatpush3.bf16.msra.mxu1 %v7785_v50  ;;  %6629 = vmatprep.mubr.msk.bf16.mxu1 %vm1173_vm3, %v7922_v27  ;;  %v7293_v27 = vld [vmem:[%s9075_s28 + $0x10] ss:$8 sps:$4 sm:$0xff]  }
 0x645   : > { %6637 = vmatprep.subr.bf16.mxu1 %v8479_v31 }
 0x64b   : > { %6630 = vmatmul.mubr.msk.bf16.vlgmr.msra.gmra.mrb[40].mxu1 %vm1173_vm3, %v9174_v48 }
 0x64c   : > { %6638 = vmatpush3.bf16.msra.mxu1 %v8479_v31  ;;  %6633 = vmatprep.mubr.msk.bf16.mxu1 %vm1173_vm3, %v9175_v49 }
 0x64d   : > { %6647 = vmatprep.subr.bf16.mxu1 %v7632_v9 }
 0x653   : > { %6634 = vmatmul.mubr.msk.bf16.gmra.mrb[44].mxu1 %vm1173_vm3, %v9176_v26 }
 0x654   : > { %6639 = vmatprep.mubr.msk.bf16.mxu1 %vm1173_vm3, %v7292_v16  ;;  %v9190_v16 = vld [vmem:[#allocation29_spill] sm:$0xff] }
 0x65b   : > { %6640 = vmatmul.mubr.msk.bf16.vlgmr.msra.gmra.mrb[40].mxu1 %vm1173_vm3, %v7293_v27  ;;  %v9191_v27 = vld [vmem:[#allocation30_spill] sm:$0xff] }
 0x65c   : > { %6643 = vmatprep.mubr.msk.bf16.mxu1 %vm1173_vm3, %v7294_v34  ;;  %6648 = vmatpush3.bf16.msra.mxu1 %v7632_v9  ;;  %v9181_v9 = vld [vmem:[#allocation20_spill] sm:$0xff] }
 0x65d   : > { %6649 = vmatprep.subr.bf16.mxu1 %v7647_v14 }
 0x660   : > { %6650 = vmatpush3.bf16.msra.mxu1 %v7647_v14 }
 0x663   : > { %6644 = vmatmul.mubr.msk.bf16.gmra.mrb[44].mxu1 %vm1173_vm3, %v7295_v39 }
 0x664   : > { %6651 = vmatprep.mubr.msk.bf16.mxu1 %vm1108_vm1, %v9177_v59 }
 0x66b   : > { %6652 = vmatmul.mubr.msk.bf16.vlgmr.msra.gmra.mrb[40].mxu1 %vm1108_vm1, %v9178_v30 }
 0x66c   : > { %6655 = vmatprep.mubr.msk.bf16.mxu1 %vm1108_vm1, %v9179_v2 }
 0x673   : > { %6656 = vmatmul.mubr.msk.bf16.gmra.mrb[44].mxu1 %vm1108_vm1, %v9180_v3  ;;  %v9197_v3 = vld [vmem:[#allocation36_spill] sm:$0xff] }
 0x674   : > { %6661 = vmatprep.mubr.msk.bf16.mxu1 %vm1173_vm3, %v9181_v9 }
 0x676   : > { %v2073_v4 = vpop.f32.mrb[16].mxu1 }
 0x677   : > { %v2079_v14 = vpack.c.bf16 %v2073_v4, %v2073_v4  ;;  %v6405_v5 = vpop.f32.mrb[17].mxu1 }
 0x678   : > { %v2076_v35 = vpop.f32.mrb[18].mxu1 }
 0x679   : > { %v8515_v60 = vand.u32 %v2079_v14, %v7766_v47  ;;  %v6406_v33 = vpop.f32.mrb[19].mxu1  ;;  %6424 = vmatmul.mubr.bf16.vlgmr.msra.gmra.mrb[20].mxu0 %v2079_v14 }
 0x67a   : > { %6448 = vmatpush3.bf16.msra.mxu0 %v8077_v55  ;;  %6463 = vmatprep.mubr.msk.bf16.mxu0 %vm7360_vm0, %v9171_v21 }
 0x67b   : > { %6659 = vmatprep.subr.bf16.mxu1 %v8515_v60  ;;  %6449 = vmatprep.subr.bf16.mxu0 %v9171_v21 }
 0x67c   : > { %6660 = vmatpush3.bf16.msra.mxu1 %v8515_v60 }
 0x67e   : > { %6450 = vmatpush3.bf16.msra.mxu0 %v8088_v56 }
 0x67f   : > { %6451 = vmatprep.subr.bf16.mxu0 %v9171_v21  ;;  %6662 = vmatmul.mubr.msk.bf16.vlgmr.msra.gmra.mrb[40].mxu1 %vm1173_vm3, %v9182_v32 }
 0x680   : > { %6665 = vmatprep.mubr.msk.bf16.mxu1 %vm1173_vm3, %v9183_v42 }
 0x682   : > { %6452 = vmatpush3.bf16.msra.mxu0 %v8107_v15 }
 0x683   : > { %6453 = vmatprep.subr.bf16.mxu0 %v9171_v21 }
 0x686   : > { %6454 = vmatpush3.bf16.msra.mxu0 %v8126_v52 }
 0x687   : > { %6455 = vmatprep.subr.bf16.mxu0 %v9171_v21  ;;  %6666 = vmatmul.mubr.msk.bf16.gmra.mrb[44].mxu1 %vm1173_vm3, %v9184_v46 }
 0x688   : > { %6671 = vmatprep.mubr.msk.bf16.mxu1 %vm1173_vm3, %v9185_v20 }
 0x68a   : > { %6456 = vmatpush3.bf16.msra.mxu0 %v8144_v7 }
 0x68b   : > { %6457 = vmatprep.subr.bf16.mxu0 %v9171_v21 }
 0x68e   : > { %6458 = vmatpush3.bf16.msra.mxu0 %v8162_v53 }
 0x68f   : > { %6459 = vmatprep.subr.bf16.mxu0 %v9171_v21 }
 0x692   : > { %6460 = vmatpush3.bf16.msra.mxu0 %v8240_v40 }
 0x693   : > { %6461 = vmatprep.subr.bf16.mxu0 %v9171_v21 }
 0x696   : > { %v2154_v0 = vpop.f32.mrb[20].mxu1  ;;  %6462 = vmatpush3.bf16.msra.mxu0 %v8258_v45 }
 0x697   : > { %v8544_v1 = vpack.c.bf16 %v2154_v0, %v2154_v0  ;;  %v6445_v6 = vpop.f32.mrb[21].mxu1  ;;  %6487 = vmatprep.subr.bf16.mxu0 %v9171_v21  ;;  %v9198_v0 = vld [vmem:[#allocation37_spill] sm:$0xff] }
 0x698   : > { %v2157_v18 = vpop.f32.mrb[22].mxu1  ;;  %v9199_v6 = vld [vmem:[#allocation38_spill] sm:$0xff] }
 0x699   : > { %v6446_v11 = vpop.f32.mrb[23].mxu1  ;;  %6464 = vmatmul.mubr.bf16.vlgmr.msra.gmra.mrb[24].mxu0 %v8544_v1  ;;  %v9200_v18 = vld [vmem:[#allocation39_spill] sm:$0xff] }
 0x69a   : > { %6488 = vmatpush3.bf16.msra.mxu0 %v8072_v13  ;;  %6503 = vmatprep.mubr.msk.bf16.mxu0 %vm7360_vm0, %v9171_v21  ;;  %v9201_v11 = vld [vmem:[#allocation40_spill] sm:$0xff] }
 0x69b   : > { %6489 = vmatprep.subr.bf16.mxu0 %v9171_v21 }
 0x69e   : > { %6490 = vmatpush3.bf16.msra.mxu0 %v8082_v57 }
 0x69f   : > { %6491 = vmatprep.subr.bf16.mxu0 %v9171_v21 }
 0x6a2   : > { %6492 = vmatpush3.bf16.msra.mxu0 %v8102_v61 }
 0x6a3   : > { %6493 = vmatprep.subr.bf16.mxu0 %v9171_v21 }
 0x6a6   : > { %6494 = vmatpush3.bf16.msra.mxu0 %v8121_v54 }
 0x6a7   : > { %6495 = vmatprep.subr.bf16.mxu0 %v9171_v21 }
 0x6aa   : > { %6496 = vmatpush3.bf16.msra.mxu0 %v8139_v58 }
 0x6ab   : > { %6497 = vmatprep.subr.bf16.mxu0 %v9171_v21 }
 0x6ae   : > { %6498 = vmatpush3.bf16.msra.mxu0 %v8157_v10 }
 0x6af   : > { %6499 = vmatprep.subr.bf16.mxu0 %v9171_v21 }
 0x6b2   : > { %6500 = vmatpush3.bf16.msra.mxu0 %v8235_v19 }
 0x6b3   : > { %6501 = vmatprep.subr.bf16.mxu0 %v9171_v21 }
 0x6b6   : > { %v2235_v28 = vpop.f32.mrb[24].mxu1  ;;  %6502 = vmatpush3.bf16.msra.mxu0 %v8253_v44 }
 0x6b7   : > { %v2241_v51 = vpack.c.bf16 %v2235_v28, %v2235_v28  ;;  %v6485_v22 = vpop.f32.mrb[25].mxu1  ;;  %6527 = vmatprep.subr.bf16.mxu0 %v9171_v21 }
 0x6b8   : > { %v2238_v23 = vpop.f32.mrb[26].mxu1 }
 0x6b9   : > { %v8567_v25 = vand.u32 %v2241_v51, %v7766_v47  ;;  %v6486_v36 = vpop.f32.mrb[27].mxu1  ;;  %6504 = vmatmul.mubr.bf16.vlgmr.msra.gmra.mrb[28].mxu0 %v2241_v51 }
 0x6ba   : > { %6528 = vmatpush3.bf16.msra.mxu0 %v8077_v55  ;;  %6543 = vmatprep.mubr.msk.bf16.mxu0 %vm7360_vm0, %v9171_v21 }
 0x6bb   : > { %6669 = vmatprep.subr.bf16.mxu1 %v8567_v25  ;;  %6529 = vmatprep.subr.bf16.mxu0 %v9171_v21 }
 0x6bc   : > { %6670 = vmatpush3.bf16.msra.mxu1 %v8567_v25 }
 0x6be   : > { %6530 = vmatpush3.bf16.msra.mxu0 %v8088_v56 }
 0x6bf   : > { %6531 = vmatprep.subr.bf16.mxu0 %v9171_v21  ;;  %6672 = vmatmul.mubr.msk.bf16.vlgmr.msra.gmra.mrb[40].mxu1 %vm1173_vm3, %v9186_v12 }
 0x6c0   : > { %6675 = vmatprep.mubr.msk.bf16.mxu1 %vm1173_vm3, %v9187_v17 }
 0x6c2   : > { %6532 = vmatpush3.bf16.msra.mxu0 %v8107_v15 }
 0x6c3   : > { %6533 = vmatprep.subr.bf16.mxu0 %v9171_v21 }
 0x6c6   : > { %6534 = vmatpush3.bf16.msra.mxu0 %v8126_v52 }
 0x6c7   : > { %6535 = vmatprep.subr.bf16.mxu0 %v9171_v21  ;;  %6676 = vmatmul.mubr.msk.bf16.gmra.mrb[44].mxu1 %vm1173_vm3, %v9188_v41 }
 0x6c8   : > { %6683 = vmatprep.mubr.msk.bf16.mxu1 %vm1108_vm1, %v9189_v62 }
 0x6ca   : > { %6536 = vmatpush3.bf16.msra.mxu0 %v8144_v7 }
 0x6cb   : > { %6537 = vmatprep.subr.bf16.mxu0 %v9171_v21 }
 0x6ce   : > { %6538 = vmatpush3.bf16.msra.mxu0 %v8162_v53 }
 0x6cf   : > { %6539 = vmatprep.subr.bf16.mxu0 %v9171_v21 }
 0x6d2   : > { %6540 = vmatpush3.bf16.msra.mxu0 %v8240_v40 }
 0x6d3   : > { %6541 = vmatprep.subr.bf16.mxu0 %v9171_v21 }
 0x6d6   : > { %v2316_v8 = vpop.f32.mrb[28].mxu1  ;;  %6542 = vmatpush3.bf16.msra.mxu0 %v8258_v45 }
 0x6d7   : > { %v8596_v37 = vpack.c.bf16 %v2316_v8, %v2316_v8  ;;  %v6525_v29 = vpop.f32.mrb[29].mxu1  ;;  %6567 = vmatprep.subr.bf16.mxu0 %v8072_v13 }
 0x6d8   : > { %v2319_v63 = vpop.f32.mrb[30].mxu1  ;;  %v8700_v29 = vand.u32 %v8544_v1, %v7766_v47  ;;  %v9205_v1 = vld [vmem:[#allocation44_spill] sm:$0xff] }
 0x6d9   : > { %v6526_v24 = vpop.f32.mrb[31].mxu1  ;;  %6544 = vmatmul.mubr.bf16.vlgmr.msra.gmra.mrb[32].mxu0 %v8596_v37  ;;  %v8705_v63 = vand.u32 %v8596_v37, %v7766_v47  ;;  %v9207_v37 = vld [vmem:[#allocation46_spill] sm:$0xff] }
 0x6da   : > { %6568 = vmatpush3.bf16.msra.mxu0 %v8072_v13  ;;  %v9202_v24 = vld [vmem:[#allocation41_spill] sm:$0xff] }
 0x6db   : > { %6569 = vmatprep.subr.bf16.mxu0 %v8082_v57 }
 0x6de   : > { %6570 = vmatpush3.bf16.msra.mxu0 %v8082_v57 }
 0x6df   : > { %6571 = vmatprep.subr.bf16.mxu0 %v8102_v61 }
 0x6e2   : > { %6572 = vmatpush3.bf16.msra.mxu0 %v8102_v61 }
 0x6e3   : > { %6573 = vmatprep.subr.bf16.mxu0 %v8121_v54 }
 0x6e6   : > { %6574 = vmatpush3.bf16.msra.mxu0 %v8121_v54 }
 0x6e7   : > { %6575 = vmatprep.subr.bf16.mxu0 %v8139_v58 }
 0x6ea   : > { %6576 = vmatpush3.bf16.msra.mxu0 %v8139_v58 }
 0x6eb   : > { %6577 = vmatprep.subr.bf16.mxu0 %v8157_v10 }
 0x6ee   : > { %6578 = vmatpush3.bf16.msra.mxu0 %v8157_v10 }
 0x6ef   : > { %6579 = vmatprep.subr.bf16.mxu0 %v8235_v19 }
 0x6f2   : > { %6580 = vmatpush3.bf16.msra.mxu0 %v8235_v19 }
 0x6f3   : > { %6581 = vmatprep.subr.bf16.mxu0 %v8253_v44 }
 0x6f6   : > { %v6565_v13 = vpop.f32.mrb[32].mxu1  ;;  %6582 = vmatpush3.bf16.msra.mxu0 %v8253_v44 }
 0x6f7   : > { %v2397_v57 = vpop.f32.mrb[33].mxu1  ;;  %6607 = vmatprep.subr.bf16.mxu0 %v8077_v55 }
 0x6f8   : > { %v6566_v21 = vpop.f32.mrb[34].mxu1 }
 0x6f9   : > { %v2413_v48 = vpack.c.bf16 %v6566_v21, %v6565_v13  ;;  %v2400_v49 = vpop.f32.mrb[35].mxu1  ;;  %v9203_v13 = vld [vmem:[#allocation42_spill] sm:$0xff]  ;;  %v9206_v21 = vld [vmem:[#allocation45_spill] sm:$0xff] }
 0x6fa   : > { %v2412_v26 = vpack.c.bf16 %v2400_v49, %v2397_v57  ;;  %v9204_v57 = vld [vmem:[#allocation43_spill] sm:$0xff] }
 0x6fc   : > { %6583 = vmatprep.mubr.bf16.mxu0 %v2412_v26  ;;  %6679 = vmatprep.subr.bf16.mxu1 %v2412_v26 }
 0x6fd   : > { %6584 = vmatmul.mubr.bf16.vlgmr.msra.gmra.mrb[36].mxu0 %v2413_v48  ;;  %6680 = vmatpush3.bf16.msra.mxu1 %v2412_v26 }
 0x6fe   : > { %6681 = vmatprep.subr.bf16.mxu1 %v2413_v48  ;;  %6608 = vmatpush3.bf16.msra.mxu0 %v8077_v55  ;;  %v9192_v55 = vld [vmem:[#allocation31_spill] sm:$0xff] }
 0x6ff   : > { %6609 = vmatprep.subr.bf16.mxu0 %v8088_v56 }
 0x701   : > { %6682 = vmatpush3.bf16.msra.mxu1 %v2413_v48 }
 0x702   : > { %6610 = vmatpush3.bf16.msra.mxu0 %v8088_v56  ;;  %v9193_v56 = vld [vmem:[#allocation32_spill] sm:$0xff] }
 0x703   : > { %6611 = vmatprep.subr.bf16.mxu0 %v8107_v15 }
 0x704   : > { %6684 = vmatmul.mubr.msk.bf16.vlgmr.msra.gmra.mrb[40].mxu1 %vm1108_vm1, %v9190_v16 }
 0x705   : > { %6687 = vmatprep.mubr.msk.bf16.mxu1 %vm1108_vm1, %v9191_v27 }
 0x706   : > { %6612 = vmatpush3.bf16.msra.mxu0 %v8107_v15 }
 0x707   : > { %6613 = vmatprep.subr.bf16.mxu0 %v8126_v52 }
 0x70a   : > { %6614 = vmatpush3.bf16.msra.mxu0 %v8126_v52 }
 0x70b   : > { %6615 = vmatprep.subr.bf16.mxu0 %v8144_v7 }
 0x70c   : > { %6688 = vmatmul.mubr.msk.bf16.gmra.mrb[44].mxu1 %vm1108_vm1, %v9192_v55 }
 0x70d   : > { %6693 = vmatprep.mubr.msk.bf16.mxu1 %vm1173_vm3, %v9193_v56  ;;  %v9208_v56 = vld [vmem:[#allocation47_spill] sm:$0xff] }
 0x70e   : > { %6616 = vmatpush3.bf16.msra.mxu0 %v8144_v7 }
 0x70f   : > { %6617 = vmatprep.subr.bf16.mxu0 %v8162_v53 }
 0x712   : > { %6618 = vmatpush3.bf16.msra.mxu0 %v8162_v53  ;;  %v8646_v53 = vld [vmem:[%s9125_s8] sm:$0xff]  }
 0x713   : > { %6619 = vmatprep.subr.bf16.mxu0 %v8240_v40 }
 0x716   : > { %v6605_v15 = vpop.f32.mrb[36].mxu1  ;;  %6620 = vmatpush3.bf16.msra.mxu0 %v8240_v40  ;;  %v8655_v40 = vld [vmem:[%s9125_s8 + $0x8] sm:$0xff]  }
 0x717   : > { %v2497_v52 = vpop.f32.mrb[37].mxu1  ;;  %6621 = vmatprep.subr.bf16.mxu0 %v8258_v45 }
 0x718   : > { %v6606_v34 = vpop.f32.mrb[38].mxu1 }
 0x719   : > { %v8638_v39 = vpack.c.bf16 %v6606_v34, %v6605_v15  ;;  %v2500_v59 = vpop.f32.mrb[39].mxu1  ;;  %v9209_v15 = vld [vmem:[#allocation48_spill] sm:$0xff]  ;;  %v9210_v34 = vld [vmem:[#allocation49_spill] sm:$0xff] }
 0x71a   : > { %v8640_v30 = vpack.c.bf16 %v2500_v59, %v2497_v52  ;;  %6622 = vmatpush3.bf16.msra.mxu0 %v8258_v45  ;;  %v9211_v59 = vld [vmem:[#allocation50_spill] sm:$0xff] }
 0x71b   : > { %6787 = vmatprep.subr.bf16.mxu0 %v8646_v53 }
 0x71c   : > { %6623 = vmatprep.mubr.bf16.mxu0 %v8640_v30 }
 0x71d   : > { %6624 = vmatmul.mubr.bf16.vlgmr.msra.gmra.mrb[40].mxu0 %v8638_v39 }
 0x71e   : > { %6788 = vmatpush3.bf16.msra.mxu0 %v8646_v53 }
 0x71f   : > { %6789 = vmatprep.subr.bf16.mxu0 %v8655_v40 }
 0x722   : > { %6790 = vmatpush3.bf16.msra.mxu0 %v8655_v40 }
 0x723   : > { %6791 = vmatprep.subr.bf16.mxu0 %v8102_v61 }
 0x726   : > { %6792 = vmatpush3.bf16.msra.mxu0 %v8102_v61 }
 0x727   : > { %6793 = vmatprep.subr.bf16.mxu0 %v8121_v54 }
 0x72a   : > { %6794 = vmatpush3.bf16.msra.mxu0 %v8121_v54 }
 0x72b   : > { %6795 = vmatprep.subr.bf16.mxu0 %v8139_v58 }
 0x72e   : > { %6796 = vmatpush3.bf16.msra.mxu0 %v8139_v58 }
 0x72f   : > { %6797 = vmatprep.subr.bf16.mxu0 %v8157_v10 }
 0x732   : > { %6798 = vmatpush3.bf16.msra.mxu0 %v8157_v10  ;;  %v9194_v10 = vld [vmem:[#allocation33_spill] sm:$0xff] }
 0x733   : > { %6799 = vmatprep.subr.bf16.mxu0 %v8235_v19 }
 0x736   : > { %6800 = vmatpush3.bf16.msra.mxu0 %v8235_v19  ;;  %v9195_v19 = vld [vmem:[#allocation34_spill] sm:$0xff] }
 0x737   : > { %6801 = vmatprep.subr.bf16.mxu0 %v8253_v44 }
 0x73a   : > { %6802 = vmatpush3.bf16.msra.mxu0 %v8253_v44  ;;  %v9196_v44 = vld [vmem:[#allocation35_spill] sm:$0xff] }
 0x73b   : > { %6807 = vmatprep.subr.bf16.mxu0 %v8646_v53 }
 0x74c   : > { %v2114_v45 = vpop.f32.mrb[20].mxu0 }
 0x74d   : > { %v3142_v54 = vpack.c.bf16 %v2114_v45, %v2114_v45  ;;  %v6425_v7 = vpop.f32.mrb[21].mxu0 }
 0x74e   : > { %v2117_v61 = vpop.f32.mrb[22].mxu0  ;;  %v9213_v7 = vld [vmem:[#allocation52_spill] sm:$0xff] }
 0x74f   : > { %v8673_v58 = vand.u32 %v3142_v54, %v7766_v47  ;;  %v6426_v2 = vpop.f32.mrb[23].mxu0  ;;  %v9212_v54 = vld [vmem:[#allocation53_spill] sm:$0xff] }
 0x750   : > { %v3652_v61 = vsel %vm3651_vm5, %v9213_v7, %v9212_v54  ;;  %v9214_v2 = vld [vmem:[#allocation51_spill] sm:$0xff] }
 0x751   : > { %6691 = vmatprep.subr.bf16.mxu1 %v8673_v58 }
 0x752   : > { %6692 = vmatpush3.bf16.msra.mxu1 %v8673_v58 }
 0x755   : > { %6694 = vmatmul.mubr.msk.bf16.vlgmr.msra.gmra.mrb[40].mxu1 %vm1173_vm3, %v9194_v10  ;;  %v9215_v10 = vld [vmem:[#allocation55_spill] sm:$0xff] }
 0x756   : > { %6697 = vmatprep.mubr.msk.bf16.mxu1 %vm1173_vm3, %v9195_v19  ;;  %v9216_v19 = vld [vmem:[#allocation54_spill] sm:$0xff] }
 0x75d   : > { %6698 = vmatmul.mubr.msk.bf16.gmra.mrb[44].mxu1 %vm1173_vm3, %v9196_v44  ;;  %v3653_v44 = vsel %vm3651_vm5, %v9216_v19, %v9215_v10 }
 0x75e   : > { %6703 = vmatprep.mubr.msk.bf16.mxu1 %vm1173_vm3, %v9197_v3  ;;  %v9217_v3 = vld [vmem:[#allocation57_spill] sm:$0xff] }
 0x76c   : > { %v2195_v9 = vpop.f32.mrb[24].mxu0 }
 0x76d   : > { %v6465_v4 = vpop.f32.mrb[25].mxu0  ;;  %v3741_v52 = vpack.c.bf16 %v2195_v9, %v2195_v9  ;;  %v9218_v9 = vld [vmem:[#allocation56_spill] sm:$0xff] }
 0x76e   : > { %v2198_v14 = vpop.f32.mrb[26].mxu0 }
 0x76f   : > { %v6466_v5 = vpop.f32.mrb[27].mxu0  ;;  %v8734_v45 = vand.u32 %v3741_v52, %v7766_v47  ;;  %v9219_v14 = vld [vmem:[#allocation59_spill] sm:$0xff] }
 0x770   : > { %v9220_v5 = vld [vmem:[#allocation58_spill] sm:$0xff] }
 0x78c   : > { %v2276_v35 = vpop.f32.mrb[28].mxu0 }
 0x78d   : > { %v3239_v33 = vpack.c.bf16 %v2276_v35, %v2276_v35  ;;  %v6505_v32 = vpop.f32.mrb[29].mxu0  ;;  %v3655_v35 = vsel %vm3651_vm5, %v9220_v5, %v9219_v14  ;;  %v8805_v5 = vld [vmem:[%s7621_s21 + $0x38] sm:$0xff] }
 0x78e   : > { %v2279_v42 = vpop.f32.mrb[30].mxu0  ;;  %v9222_v32 = vld [vmem:[#allocation61_spill] sm:$0xff] }
 0x78f   : > { %v8686_v46 = vand.u32 %v3239_v33, %v7766_v47  ;;  %v6506_v20 = vpop.f32.mrb[31].mxu0  ;;  %v9221_v33 = vld [vmem:[#allocation60_spill] sm:$0xff]  ;;  %v9224_v42 = vld [vmem:[#allocation63_spill] sm:$0xff] }
 0x790   : > { %v9225_v20 = vld [vmem:[#allocation64_spill] sm:$0xff] }
 0x791   : > { %6701 = vmatprep.subr.bf16.mxu1 %v8686_v46 }
 0x792   : > { %6702 = vmatpush3.bf16.msra.mxu1 %v8686_v46 }
 0x795   : > { %6704 = vmatmul.mubr.msk.bf16.vlgmr.msra.gmra.mrb[40].mxu1 %vm1173_vm3, %v9198_v0  ;;  %v9226_v0 = vld [vmem:[#allocation65_spill] sm:$0xff] }
 0x796   : > { %6707 = vmatprep.mubr.msk.bf16.mxu1 %vm1173_vm3, %v9199_v6  ;;  %v9227_v6 = vld [vmem:[#allocation66_spill] sm:$0xff] }
 0x79d   : > { %6708 = vmatmul.mubr.msk.bf16.gmra.mrb[44].mxu1 %vm1173_vm3, %v9200_v18  ;;  %v9228_v18 = vld [vmem:[#allocation67_spill] sm:$0xff] }
 0x79e   : > { %6715 = vmatprep.mubr.msk.bf16.mxu1 %vm1108_vm1, %v9201_v11  ;;  %v9229_v11 = vld [vmem:[#allocation68_spill] sm:$0xff] }
 0x7ac   : > { %v2357_v28 = vpop.f32.mrb[32].mxu0 }
 0x7ad   : > { %v6545_v51 = vpop.f32.mrb[33].mxu0 }
 0x7ae   : > { %v2360_v22 = vpop.f32.mrb[34].mxu0 }
 0x7af   : > { %v6546_v23 = vpop.f32.mrb[35].mxu0  ;;  %v9230_v22 = vld [vmem:[#allocation69_spill] sm:$0xff] }
 0x7b0   : > { %v8784_v23 = vpop.permute.xlu1 %5110 }
 0x7d0   : > { %v6585_v36 = vpop.f32.mrb[36].mxu0 }
 0x7d1   : > { %v2448_v12 = vpop.f32.mrb[37].mxu0 }
 0x7d2   : > { %v6586_v17 = vpop.f32.mrb[38].mxu0 }
 0x7d3   : > { %v3337_v41 = vpack.c.bf16 %v6586_v17, %v6585_v36  ;;  %v2451_v62 = vpop.f32.mrb[39].mxu0  ;;  %v3944_v36 = vpop.permute.xlu1 %3943  ;;  %v9231_v17 = vld [vmem:[#allocation72_spill] sm:$0xff] }
 0x7d4   : > { %v3336_v8 = vpack.c.bf16 %v2451_v62, %v2448_v12 }
 0x7d6   : > { %6711 = vmatprep.subr.bf16.mxu1 %v3336_v8 }
 0x7d7   : > { %6712 = vmatpush3.bf16.msra.mxu1 %v3336_v8  ;;  %v9232_v8 = vld [vmem:[#allocation70_spill] sm:$0xff] }
 0x7d8   : > { %6713 = vmatprep.subr.bf16.mxu1 %v3337_v41 }
 0x7db   : > { %6714 = vmatpush3.bf16.msra.mxu1 %v3337_v41 }
 0x7dc   : > { %6723 = vmatprep.subr.bf16.mxu1 %v8700_v29 }
 0x7de   : > { %6716 = vmatmul.mubr.msk.bf16.vlgmr.msra.gmra.mrb[40].mxu1 %vm1108_vm1, %v9202_v24 }
 0x7df   : > { %6724 = vmatpush3.bf16.msra.mxu1 %v8700_v29  ;;  %6719 = vmatprep.mubr.msk.bf16.mxu1 %vm1108_vm1, %v9203_v13 }
 0x7e0   : > { %6733 = vmatprep.subr.bf16.mxu1 %v8705_v63 }
 0x7e6   : > { %6720 = vmatmul.mubr.msk.bf16.gmra.mrb[44].mxu1 %vm1108_vm1, %v9204_v57 }
 0x7e7   : > { %6725 = vmatprep.mubr.msk.bf16.mxu1 %vm1173_vm3, %v9205_v1  ;;  %v9233_v1 = vld [vmem:[#allocation73_spill] sm:$0xff] }
 0x7ee   : > { %6726 = vmatmul.mubr.msk.bf16.vlgmr.msra.gmra.mrb[40].mxu1 %vm1173_vm3, %v9206_v21 }
 0x7ef   : > { %6734 = vmatpush3.bf16.msra.mxu1 %v8705_v63  ;;  %6729 = vmatprep.mubr.msk.bf16.mxu1 %vm1173_vm3, %v9207_v37 }
 0x7f0   : > { %6743 = vmatprep.subr.bf16.mxu1 %v8640_v30  ;;  %v6625_v48 = vpop.f32.mrb[40].mxu0 }
 0x7f1   : > { %v2548_v49 = vpop.f32.mrb[41].mxu0 }
 0x7f2   : > { %v6626_v26 = vpop.f32.mrb[42].mxu0 }
 0x7f3   : > { %v3936_v16 = vpack.c.bf16 %v6626_v26, %v6625_v48  ;;  %v2551_v27 = vpop.f32.mrb[43].mxu0 }
 0x7f4   : > { %v3935_v55 = vpack.c.bf16 %v2551_v27, %v2548_v49  ;;  %v9234_v49 = vld [vmem:[#allocation71_spill] sm:$0xff] }
 0x7f6   : > { %6730 = vmatmul.mubr.msk.bf16.gmra.mrb[44].mxu1 %vm1173_vm3, %v9208_v56 }
 0x7f7   : > { %6735 = vmatprep.mubr.msk.bf16.mxu1 %vm1173_vm3, %v9209_v15 }
 0x7fe   : > { %6736 = vmatmul.mubr.msk.bf16.vlgmr.msra.gmra.mrb[40].mxu1 %vm1173_vm3, %v9210_v34 }
 0x7ff   : > { %6744 = vmatpush3.bf16.msra.mxu1 %v8640_v30  ;;  %6739 = vmatprep.mubr.msk.bf16.mxu1 %vm1173_vm3, %v9211_v59  ;;  %v3838_v30 = vpack.c.bf16 %v2357_v28, %v2357_v28  ;;  %v8780_v28 = vpop.permute.xlu0 %5108 }
 0x800   : > { %6745 = vmatprep.subr.bf16.mxu1 %v8638_v39 }
 0x801   : > { %v8751_v4 = vand.u32 %v3838_v30, %v7766_v47  ;;  %v9223_v47 = vld [vmem:[#allocation62_spill] sm:$0xff] }
 0x803   : > { %6746 = vmatpush3.bf16.msra.mxu1 %v8638_v39  ;;  %v3654_v39 = vsel %vm3651_vm5, %v9218_v9, %v9217_v3  ;;  %v3942_v51 = vpop.permute.xlu0 %3941 }
 0x804   : > { %6755 = vmatprep.subr.bf16.mxu1 %v8734_v45 }
 0x806   : > { %6740 = vmatmul.mubr.msk.bf16.gmra.mrb[44].mxu1 %vm1173_vm3, %v9214_v2 }
 0x807   : > { %6747 = vmatprep.mubr.msk.bf16.mxu1 %vm1108_vm1, %v3652_v61 }
 0x80e   : > { %6748 = vmatmul.mubr.msk.bf16.vlgmr.msra.gmra.mrb[40].mxu1 %vm1108_vm1, %v3653_v44 }
 0x80f   : > { %6756 = vmatpush3.bf16.msra.mxu1 %v8734_v45  ;;  %6751 = vmatprep.mubr.msk.bf16.mxu1 %vm1108_vm1, %v3654_v39  ;;  %v8801_v39 = vld [vmem:[%s7621_s21 + $0x30] sm:$0xff] }
 0x810   : > { %6765 = vmatprep.subr.bf16.mxu1 %v8751_v4 }
 0x816   : > { %6752 = vmatmul.mubr.msk.bf16.gmra.mrb[44].mxu1 %vm1108_vm1, %v3655_v35 }
 0x817   : > { %6757 = vmatprep.mubr.msk.bf16.mxu1 %vm1173_vm3, %v9221_v33  ;;  %v8809_v33 = vld [vmem:[%s7621_s21 + $0x20] sm:$0xff] }
 0x81e   : > { %6758 = vmatmul.mubr.msk.bf16.vlgmr.msra.gmra.mrb[40].mxu1 %vm1173_vm3, %v9222_v32 }
 0x81f   : > { %6766 = vmatpush3.bf16.msra.mxu1 %v8751_v4  ;;  %6761 = vmatprep.mubr.msk.bf16.mxu1 %vm1173_vm3, %v9223_v47  ;;  %v8813_v47 = vld [vmem:[%s7621_s21 + $0x28] sm:$0xff] }
 0x820   : > { %6775 = vmatprep.subr.bf16.mxu1 %v3935_v55 }
 0x826   : > { %6762 = vmatmul.mubr.msk.bf16.gmra.mrb[44].mxu1 %vm1173_vm3, %v9224_v42 }
 0x827   : > { %6767 = vmatprep.mubr.msk.bf16.mxu1 %vm1173_vm3, %v9225_v20 }
 0x82e   : > { %6768 = vmatmul.mubr.msk.bf16.vlgmr.msra.gmra.mrb[40].mxu1 %vm1173_vm3, %v9226_v0 }
 0x82f   : > { %6776 = vmatpush3.bf16.msra.mxu1 %v3935_v55  ;;  %6771 = vmatprep.mubr.msk.bf16.mxu1 %vm1173_vm3, %v9227_v6  ;;  %v7302_v6 = vld [vmem:[%s9125_s8 + $0x10] sm:$0xff]  }
 0x830   : > { %6777 = vmatprep.subr.bf16.mxu1 %v3936_v16 }
 0x833   : > { %6778 = vmatpush3.bf16.msra.mxu1 %v3936_v16 }
 0x836   : > { %6772 = vmatmul.mubr.msk.bf16.gmra.mrb[44].mxu1 %vm1173_vm3, %v9228_v18  ;;  %v7303_v18 = vld [vmem:[%s9125_s8 + $0x18] sm:$0xff]  }
 0x837   : > { %6779 = vmatprep.mubr.msk.bf16.mxu1 %vm1108_vm1, %v9229_v11  ;;  %v7306_v11 = vld [vmem:[%s9125_s8 + $0x30] sm:$0xff]  }
 0x83e   : > { %6780 = vmatmul.mubr.msk.bf16.vlgmr.msra.gmra.mrb[40].mxu1 %vm1108_vm1, %v9230_v22  ;;  %v7308_v22 = vld [vmem:[%s9125_s8 + $0x40] sm:$0xff]  }
 0x83f   : > { %6783 = vmatprep.mubr.msk.bf16.mxu1 %vm1108_vm1, %v3942_v51  ;;  %v7307_v51 = vld [vmem:[%s9125_s8 + $0x38] sm:$0xff]  }
 0x846   : > { %6784 = vmatmul.mubr.msk.bf16.gmra.mrb[44].mxu1 %vm1108_vm1, %v3944_v36 }
 0x911   : > { %v6781_v12 = vpop.f32.mrb[40].mxu1 }
 0x912   : > { %v4072_v41 = vadd.f32 %v6781_v12, %v9231_v17  ;;  %v3991_v62 = vpop.f32.mrb[41].mxu1 }
 0x913   : > { %v4070_v24 = vadd.f32 %v9232_v8, %v3991_v62  ;;  %v6782_v13 = vpop.f32.mrb[42].mxu1 }
 0x914   : > { %v5881_v57 = vmul.f32 -1.442695, %v4072_v41  ;;  %v4073_v21 = vadd.f32 %v6782_v13, %v9233_v1  ;;  %v3994_v37 = vpop.f32.mrb[43].mxu1  ;;  %v7310_v13 = vld [vmem:[%s9125_s8 + $0x50] sm:$0xff]   ;;  %v7312_v1 = vld [vmem:[%s9125_s8 + $0x60] sm:$0xff]  }
 0x915   : > { %v5879_v48 = vmul.f32 -1.442695, %v4070_v24  ;;  %v4071_v26 = vadd.f32 %v9234_v49, %v3994_v37  ;;  %v7309_v24 = vld [vmem:[%s9125_s8 + $0x48] sm:$0xff]   ;;  %v7314_v37 = vld [vmem:[%s9125_s8 + $0x70] sm:$0xff]  }
 0x916   : > { %7252 = vpow2.f32 %v5881_v57  ;;  %v5882_v16 = vmul.f32 -1.442695, %v4073_v21  ;;  %v7311_v57 = vld [vmem:[%s9125_s8 + $0x58] sm:$0xff]   ;;  %v7313_v21 = vld [vmem:[%s9125_s8 + $0x68] sm:$0xff]  }
 0x917   : > { %7254 = vpow2.f32 %v5879_v48  ;;  %v5880_v27 = vmul.f32 -1.442695, %v4071_v26  ;;  %v7315_v48 = vld [vmem:[%s9125_s8 + $0x78] sm:$0xff]  }
 0x918   : > { %7256 = vpow2.f32 %v5882_v16 }
 0x919   : > { %7258 = vpow2.f32 %v5880_v27  ;;  %v8792_v55 = vpop.f32.mrb[44].mxu1 }
 0x91a   : > { %v8794_v56 = vpop.f32.mrb[45].mxu1 }
 0x91b   : > { %v8796_v15 = vpop.f32.mrb[46].mxu1 }
 0x91c   : > { %v8798_v52 = vpop.f32.mrb[47].mxu1 }
 0x920   : > { %v7253_v34 = vpop.eup %7252 }
 0x921   : > { %v7255_v59 = vpop.eup %7254  ;;  %v4104_v54 = vadd.f32 1.0, %v7253_v34 }
 0x922   : > { %v7257_v7 = vpop.eup %7256  ;;  %v4102_v61 = vadd.f32 1.0, %v7255_v59 }
 0x923   : > { %v7259_v2 = vpop.eup %7258  ;;  %7260 = vrcp.f32 %v4104_v54  ;;  %v4105_v30 = vadd.f32 1.0, %v7257_v7 }
 0x924   : > { %7262 = vrcp.f32 %v4102_v61  ;;  %v4103_v10 = vadd.f32 1.0, %v7259_v2 }
 0x925   : > { %7264 = vrcp.f32 %v4105_v30 }
 0x926   : > { %7266 = vrcp.f32 %v4103_v10 }
 0x92d   : > { %v7261_v19 = vpop.eup %7260 }
 0x92e   : > { %v7263_v44 = vpop.eup %7262  ;;  %v4128_v14 = vmul.f32 %v8801_v39, %v7261_v19  ;;  %v9235_v19 = vld [vmem:[#allocation74_spill] sm:$0xff] }
 0x92f   : > { %v7265_v3 = vpop.eup %7264  ;;  %v4126_v32 = vmul.f32 %v8809_v33, %v7263_v44  ;;  %v9236_v44 = vld [vmem:[#allocation75_spill] sm:$0xff] }
 0x930   : > { %v7267_v9 = vpop.eup %7266  ;;  %v4129_v35 = vmul.f32 %v8805_v5, %v7265_v3  ;;  %v7316_v3 = vld [vmem:[%s9085_s22] ss:$8 sps:$4 sm:$0xff]  }
 0x931   : > { %v4127_v42 = vmul.f32 %v8813_v47, %v7267_v9  ;;  %v7317_v9 = vld [vmem:[%s9085_s22 + $0x10] ss:$8 sps:$4 sm:$0xff]  }
 0x932   : > { %v8816_v20 = vpack.c.bf16 %v4129_v35, %v4128_v14  ;;  %v9239_v14 = vld [vmem:[#allocation78_spill] sm:$0xff]  ;;  %v9240_v35 = vld [vmem:[#allocation79_spill] sm:$0xff] }
 0x933   : > { %v8818_v0 = vpack.c.bf16 %v4127_v42, %v4126_v32  ;;  %v9241_v32 = vld [vmem:[#allocation80_spill] sm:$0xff]  ;;  %v9242_v42 = vld [vmem:[#allocation81_spill] sm:$0xff] }
 0x935   : > { %6803 = vmatprep.mubr.bf16.mxu0 %v8818_v0 }
 0x936   : > { %6804 = vmatmul.mubr.bf16.vlgmr.msra.gmra.mrb[44].mxu0 %v8816_v20 }
 0x937   : > { %6808 = vmatpush3.bf16.msra.mxu0 %v8646_v53  ;;  %v7304_v53 = vld [vmem:[%s9125_s8 + $0x20] sm:$0xff]  }
 0x938   : > { %6809 = vmatprep.subr.bf16.mxu0 %v8655_v40 }
 0x93b   : > { %6810 = vmatpush3.bf16.msra.mxu0 %v8655_v40  ;;  %v7305_v40 = vld [vmem:[%s9125_s8 + $0x28] sm:$0xff]  }
 0x93c   : > { %6811 = vmatprep.subr.bf16.mxu0 %v7302_v6 }
 0x93f   : > { %6812 = vmatpush3.bf16.msra.mxu0 %v7302_v6  ;;  %v9247_v6 = vld [vmem:[#allocation86_spill] sm:$0xff] }
 0x940   : > { %6813 = vmatprep.subr.bf16.mxu0 %v7303_v18 }
 0x943   : > { %6814 = vmatpush3.bf16.msra.mxu0 %v7303_v18  ;;  %v9248_v18 = vld [vmem:[#allocation87_spill] sm:$0xff] }
 0x944   : > { %6815 = vmatprep.subr.bf16.mxu0 %v7304_v53 }
 0x947   : > { %6816 = vmatpush3.bf16.msra.mxu0 %v7304_v53  ;;  %v9249_v53 = vld [vmem:[#allocation88_spill] sm:$0xff] }
 0x948   : > { %6817 = vmatprep.subr.bf16.mxu0 %v7305_v40 }
 0x94b   : > { %6818 = vmatpush3.bf16.msra.mxu0 %v7305_v40  ;;  %v9252_v40 = vld [vmem:[#allocation91_spill] sm:$0xff] }
 0x94c   : > { %6819 = vmatprep.subr.bf16.mxu0 %v7306_v11 }
 0x94f   : > { %6820 = vmatpush3.bf16.msra.mxu0 %v7306_v11  ;;  %v9253_v11 = vld [vmem:[#allocation92_spill] sm:$0xff] }
 0x950   : > { %6821 = vmatprep.subr.bf16.mxu0 %v7307_v51 }
 0x953   : > { %6822 = vmatpush3.bf16.msra.mxu0 %v7307_v51  ;;  %v9254_v51 = vld [vmem:[#allocation93_spill] sm:$0xff] }
 0x954   : > { %6827 = vmatprep.subr.bf16.mxu0 %v7308_v22 }
 0xa09   : > { %v6805_v36 = vpop.f32.mrb[44].mxu0 }
 0xa0a   : > { %v4166_v12 = vpop.f32.mrb[45].mxu0 }
 0xa0b   : > { %v6806_v17 = vpop.f32.mrb[46].mxu0 }
 0xa0c   : > { %v8846_v41 = vpack.c.bf16 %v6806_v17, %v6805_v36  ;;  %v4169_v62 = vpop.f32.mrb[47].mxu0 }
 0xa0d   : > { %v8848_v8 = vpack.c.bf16 %v4169_v62, %v4166_v12 }
 0xa0f   : > { %6823 = vmatprep.mubr.bf16.mxu0 %v8848_v8 }
 0xa10   : > { %6824 = vmatmul.mubr.bf16.vlgmr.msra.gmra.mrb[48].mxu0 %v8846_v41 }
 0xa11   : > { %6828 = vmatpush3.bf16.msra.mxu0 %v7308_v22  ;;  %6843 = vmatprep.mubr.bf16.mxu0 %v8818_v0 }
 0xa12   : > { %6829 = vmatprep.subr.bf16.mxu0 %v7309_v24 }
 0xa15   : > { %6830 = vmatpush3.bf16.msra.mxu0 %v7309_v24 }
 0xa16   : > { %6831 = vmatprep.subr.bf16.mxu0 %v7310_v13 }
 0xa19   : > { %6832 = vmatpush3.bf16.msra.mxu0 %v7310_v13 }
 0xa1a   : > { %6833 = vmatprep.subr.bf16.mxu0 %v7311_v57 }
 0xa1d   : > { %6834 = vmatpush3.bf16.msra.mxu0 %v7311_v57 }
 0xa1e   : > { %6835 = vmatprep.subr.bf16.mxu0 %v7312_v1 }
 0xa21   : > { %6836 = vmatpush3.bf16.msra.mxu0 %v7312_v1 }
 0xa22   : > { %6837 = vmatprep.subr.bf16.mxu0 %v7313_v21 }
 0xa25   : > { %6838 = vmatpush3.bf16.msra.mxu0 %v7313_v21 }
 0xa26   : > { %6839 = vmatprep.subr.bf16.mxu0 %v7314_v37 }
 0xa29   : > { %6840 = vmatpush3.bf16.msra.mxu0 %v7314_v37 }
 0xa2a   : > { %6841 = vmatprep.subr.bf16.mxu0 %v7315_v48 }
 0xa2d   : > { %6842 = vmatpush3.bf16.msra.mxu0 %v7315_v48 }
 0xa2e   : > { %6847 = vmatprep.subr.bf16.mxu0 %v7308_v22 }
 0xa30   : > { %6844 = vmatmul.mubr.bf16.vlgmr.msra.gmra.mrb[52].mxu0 %v8816_v20 }
 0xa31   : > { %6848 = vmatpush3.bf16.msra.mxu0 %v7308_v22 }
 0xa32   : > { %6849 = vmatprep.subr.bf16.mxu0 %v7309_v24 }
 0xa35   : > { %6850 = vmatpush3.bf16.msra.mxu0 %v7309_v24 }
 0xa36   : > { %6851 = vmatprep.subr.bf16.mxu0 %v7310_v13 }
 0xa39   : > { %6852 = vmatpush3.bf16.msra.mxu0 %v7310_v13 }
 0xa3a   : > { %6853 = vmatprep.subr.bf16.mxu0 %v7311_v57 }
 0xa3d   : > { %6854 = vmatpush3.bf16.msra.mxu0 %v7311_v57 }
 0xa3e   : > { %6855 = vmatprep.subr.bf16.mxu0 %v7312_v1 }
 0xa41   : > { %6856 = vmatpush3.bf16.msra.mxu0 %v7312_v1 }
 0xa42   : > { %6857 = vmatprep.subr.bf16.mxu0 %v7313_v21 }
 0xa45   : > { %6858 = vmatpush3.bf16.msra.mxu0 %v7313_v21 }
 0xa46   : > { %6859 = vmatprep.subr.bf16.mxu0 %v7314_v37 }
 0xa49   : > { %6860 = vmatpush3.bf16.msra.mxu0 %v7314_v37 }
 0xa4a   : > { %6861 = vmatprep.subr.bf16.mxu0 %v7315_v48 }
 0xa4d   : > { %6862 = vmatpush3.bf16.msra.mxu0 %v7315_v48 }
 0xa4e   : > { %6867 = vmatprep.subr.bf16.mxu0 %v7785_v50 }
 0xae3   : > { %v6825_v49 = vpop.f32.mrb[48].mxu0 }
 0xae4   : > { %v4217_v26 = vpop.f32.mrb[49].mxu0 }
 0xae5   : > { %v6826_v16 = vpop.f32.mrb[50].mxu0 }
 0xae6   : > { %v4843_v27 = vpack.c.bf16 %v6826_v16, %v6825_v49  ;;  %v4220_v34 = vpop.f32.mrb[51].mxu0 }
 0xae7   : > { %v4842_v59 = vpack.c.bf16 %v4220_v34, %v4217_v26 }
 0xb03   : > { %v6845_v54 = vpop.f32.mrb[52].mxu0 }
 0xb04   : > { %v4266_v7 = vpop.f32.mrb[53].mxu0 }
 0xb05   : > { %v6846_v61 = vpop.f32.mrb[54].mxu0 }
 0xb06   : > { %v4282_v2 = vpack.c.bf16 %v6846_v61, %v6845_v54  ;;  %v4269_v30 = vpop.f32.mrb[55].mxu0 }
 0xb07   : > { %v4281_v10 = vpack.c.bf16 %v4269_v30, %v4266_v7 }
 0xb09   : > { %6863 = vmatprep.mubr.bf16.mxu0 %v4281_v10 }
 0xb0a   : > { %6864 = vmatmul.mubr.bf16.vlgmr.msra.gmra.mrb[56].mxu0 %v4282_v2 }
 0xb0b   : > { %6868 = vmatpush3.bf16.msra.mxu0 %v7785_v50  ;;  %6869 = vmatprep.mubr.msk.bf16.mxu0 %vm1173_vm3, %v9235_v19  ;;  %v9237_v50 = vld [vmem:[#allocation76_spill] sm:$0xff] }
 0xb0c   : > { %6873 = vmatprep.subr.bf16.mxu0 %v8479_v31 }
 0xb12   : > { %6870 = vmatmul.mubr.msk.bf16.vlgmr.msra.gmra.mrb[60].mxu0 %vm1173_vm3, %v9236_v44 }
 0xb13   : > { %6874 = vmatpush3.bf16.msra.mxu0 %v8479_v31  ;;  %6875 = vmatprep.mubr.msk.bf16.mxu0 %vm1173_vm3, %v7316_v3  ;;  %v9238_v31 = vld [vmem:[#allocation77_spill] sm:$0xff] }
 0xb14   : > { %6879 = vmatprep.subr.bf16.mxu0 %v8818_v0 }
 0xb1e   : > { %6876 = vmatmul.mubr.msk.bf16.vlgmr.msra.gmra.mrb[60].mxu0 %vm1173_vm3, %v7317_v9 }
 0xb1f   : > { %6880 = vmatpush3.bf16.msra.mxu0 %v8818_v0  ;;  %6883 = vmatprep.mubr.msk.bf16.mxu0 %vm1108_vm1, %v9237_v50  ;;  %v9246_v0 = vld [vmem:[#allocation85_spill] sm:$0xff] }
 0xb20   : > { %6881 = vmatprep.subr.bf16.mxu0 %v8816_v20 }
 0xb23   : > { %6882 = vmatpush3.bf16.msra.mxu0 %v8816_v20  ;;  %v9245_v20 = vld [vmem:[#allocation84_spill] sm:$0xff] }
 0xb24   : > { %6887 = vmatprep.subr.bf16.mxu0 %v8515_v60 }
 0xb2a   : > { %6884 = vmatmul.mubr.msk.bf16.vlgmr.msra.gmra.mrb[60].mxu0 %vm1108_vm1, %v9238_v31 }
 0xb2b   : > { %6888 = vmatpush3.bf16.msra.mxu0 %v8515_v60  ;;  %6889 = vmatprep.mubr.msk.bf16.mxu0 %vm1173_vm3, %v9239_v14  ;;  %v9243_v60 = vld [vmem:[#allocation82_spill] sm:$0xff] }
 0xb2c   : > { %6893 = vmatprep.subr.bf16.mxu0 %v8567_v25 }
 0xb36   : > { %6890 = vmatmul.mubr.msk.bf16.vlgmr.msra.gmra.mrb[60].mxu0 %vm1173_vm3, %v9240_v35 }
 0xb37   : > { %6894 = vmatpush3.bf16.msra.mxu0 %v8567_v25  ;;  %6895 = vmatprep.mubr.msk.bf16.mxu0 %vm1173_vm3, %v9241_v32  ;;  %v9244_v25 = vld [vmem:[#allocation83_spill] sm:$0xff] }
 0xb38   : > { %6899 = vmatprep.subr.bf16.mxu0 %v8848_v8 }
 0xb42   : > { %6896 = vmatmul.mubr.msk.bf16.vlgmr.msra.gmra.mrb[60].mxu0 %vm1173_vm3, %v9242_v42 }
 0xb43   : > { %6900 = vmatpush3.bf16.msra.mxu0 %v8848_v8  ;;  %6903 = vmatprep.mubr.msk.bf16.mxu0 %vm1108_vm1, %v9243_v60 }
 0xb44   : > { %6901 = vmatprep.subr.bf16.mxu0 %v8846_v41 }
 0xb47   : > { %6902 = vmatpush3.bf16.msra.mxu0 %v8846_v41 }
 0xb48   : > { %6907 = vmatprep.subr.bf16.mxu0 %v8673_v58 }
 0xb4e   : > { %6904 = vmatmul.mubr.msk.bf16.vlgmr.msra.gmra.mrb[60].mxu0 %vm1108_vm1, %v9244_v25 }
 0xb4f   : > { %6908 = vmatpush3.bf16.msra.mxu0 %v8673_v58  ;;  %6909 = vmatprep.mubr.msk.bf16.mxu0 %vm1173_vm3, %v9245_v20  ;;  %v9250_v58 = vld [vmem:[#allocation89_spill] sm:$0xff] }
 0xb50   : > { %6913 = vmatprep.subr.bf16.mxu0 %v8686_v46 }
 0xb5a   : > { %6910 = vmatmul.mubr.msk.bf16.vlgmr.msra.gmra.mrb[60].mxu0 %vm1173_vm3, %v9246_v0 }
 0xb5b   : > { %6914 = vmatpush3.bf16.msra.mxu0 %v8686_v46  ;;  %6915 = vmatprep.mubr.msk.bf16.mxu0 %vm1173_vm3, %v9247_v6  ;;  %v9251_v46 = vld [vmem:[#allocation90_spill] sm:$0xff] }
 0xb5c   : > { %6919 = vmatprep.subr.bf16.mxu0 %v4842_v59 }
 0xb66   : > { %6916 = vmatmul.mubr.msk.bf16.vlgmr.msra.gmra.mrb[60].mxu0 %vm1173_vm3, %v9248_v18 }
 0xb67   : > { %6920 = vmatpush3.bf16.msra.mxu0 %v4842_v59  ;;  %6923 = vmatprep.mubr.msk.bf16.mxu0 %vm1108_vm1, %v9249_v53 }
 0xb68   : > { %6921 = vmatprep.subr.bf16.mxu0 %v4843_v27 }
 0xb6b   : > { %6922 = vmatpush3.bf16.msra.mxu0 %v4843_v27 }
 0xb6c   : > { %6927 = vmatprep.subr.bf16.mxu0 %v8700_v29 }
 0xb72   : > { %6924 = vmatmul.mubr.msk.bf16.vlgmr.msra.gmra.mrb[60].mxu0 %vm1108_vm1, %v9250_v58 }
 0xb73   : > { %6928 = vmatpush3.bf16.msra.mxu0 %v8700_v29  ;;  %6929 = vmatprep.mubr.msk.bf16.mxu0 %vm1173_vm3, %v9251_v46  ;;  %v5172_v29 = vpop.permute.xlu0 %5171 }
 0xb74   : > { %6933 = vmatprep.subr.bf16.mxu0 %v8705_v63 }
 0xb7e   : > { %6930 = vmatmul.mubr.msk.bf16.vlgmr.msra.gmra.mrb[60].mxu0 %vm1173_vm3, %v9252_v40 }
 0xb7f   : > { %6934 = vmatpush3.bf16.msra.mxu0 %v8705_v63  ;;  %6935 = vmatprep.mubr.msk.bf16.mxu0 %vm1173_vm3, %v9253_v11  ;;  %v5237_v63 = vpop.permute.xlu0 %5236 }
 0xb80   : > { %6939 = vmatprep.subr.bf16.mxu0 %v4281_v10 }
 0xb8a   : > { %6936 = vmatmul.mubr.msk.bf16.vlgmr.msra.gmra.mrb[60].mxu0 %vm1173_vm3, %v9254_v51 }
 0xb8b   : > { %6940 = vmatpush3.bf16.msra.mxu0 %v4281_v10  ;;  %6943 = vmatprep.mubr.msk.bf16.mxu0 %vm1108_vm1, %v8273_v43  ;;  %v5174_v43 = vpop.permute.xlu1 %5173 }
 0xb8c   : > { %6941 = vmatprep.subr.bf16.mxu0 %v4282_v2 }
 0xb8f   : > { %6942 = vmatpush3.bf16.msra.mxu0 %v4282_v2 }
 0xb90   : > { %6947 = vmatprep.subr.bf16.mxu0 %v8734_v45 }
 0xb96   : > { %6944 = vmatmul.mubr.msk.bf16.vlgmr.msra.gmra.mrb[60].mxu0 %vm1108_vm1, %v8276_v38 }
 0xb97   : > { %6948 = vmatpush3.bf16.msra.mxu0 %v8734_v45  ;;  %6949 = vmatprep.mubr.msk.bf16.mxu0 %vm1173_vm3, %v8780_v28 }
 0xb98   : > { %6953 = vmatprep.subr.bf16.mxu0 %v8751_v4 }
 0xba2   : > { %6950 = vmatmul.mubr.msk.bf16.vlgmr.msra.gmra.mrb[60].mxu0 %vm1173_vm3, %v8784_v23  ;;  %v5239_v23 = vpop.permute.xlu1 %5238 }
 0xba3   : > { %6954 = vmatpush3.bf16.msra.mxu0 %v8751_v4  ;;  %6955 = vmatprep.mubr.msk.bf16.mxu0 %vm1173_vm3, %v5172_v29  ;;  %v4053_v4 = vpop.permute.xlu0 %4052 }
 0xba4   : > { %v4074_v24 = vadd.f32 %v4053_v4, %v8794_v56 }
 0xba6   : > { %v4058_v17 = vpop.permute.xlu1 %4057  ;;  %v5883_v21 = vmul.f32 -1.442695, %v4074_v24 }
 0xba7   : > { %v4063_v41 = vpop.permute.xlu0 %4062  ;;  %v4075_v57 = vadd.f32 %v4058_v17, %v8798_v52 }
 0xba8   : > { %v4076_v62 = vadd.f32 %v8792_v55, %v4063_v41 }
 0xba9   : > { %v5884_v48 = vmul.f32 -1.442695, %v4075_v57 }
 0xbaa   : > { %v4068_v8 = vpop.permute.xlu1 %4067  ;;  %v5885_v1 = vmul.f32 -1.442695, %v4076_v62 }
 0xbab   : > { %v4077_v13 = vadd.f32 %v8796_v15, %v4068_v8  ;;  %v5302_v27 = vpop.permute.xlu0 %5301 }
 0xbac   : > { %7268 = vpow2.f32 %v5885_v1 }
 0xbad   : > { %v5886_v37 = vmul.f32 -1.442695, %v4077_v13  ;;  %7270 = vpow2.f32 %v5883_v21 }
 0xbae   : > { %6956 = vmatmul.mubr.msk.bf16.vlgmr.msra.gmra.mrb[60].mxu0 %vm1173_vm3, %v5174_v43  ;;  %v5307_v59 = vpop.permute.xlu1 %5306 }
 0xbaf   : > { %6963 = vmatprep.mubr.msk.bf16.mxu0 %vm1108_vm1, %v5237_v63  ;;  %7272 = vpow2.f32 %v5886_v37  ;;  %v5312_v52 = vpop.permute.xlu0 %5311 }
 0xbb0   : > { %7274 = vpow2.f32 %v5884_v48 }
 0xbb2   : > { %v5317_v30 = vpop.permute.xlu1 %5316 }
 0xbb6   : > { %v7269_v49 = vpop.eup %7268 }
 0xbb7   : > { %v7271_v26 = vpop.eup %7270  ;;  %v4108_v34 = vadd.f32 1.0, %v7269_v49 }
 0xbb8   : > { %v4106_v56 = vadd.f32 1.0, %v7271_v26 }
 0xbb9   : > { %v7273_v16 = vpop.eup %7272  ;;  %7276 = vrcp.f32 %v4108_v34 }
 0xbba   : > { %v7275_v55 = vpop.eup %7274  ;;  %v4109_v54 = vadd.f32 1.0, %v7273_v16  ;;  %7278 = vrcp.f32 %v4106_v56 }
 0xbbb   : > { %v4107_v15 = vadd.f32 1.0, %v7275_v55 }
 0xbbc   : > { %7280 = vrcp.f32 %v4109_v54 }
 0xbbd   : > { %7282 = vrcp.f32 %v4107_v15 }
 0xbc3   : > { %v7277_v50 = vpop.eup %7276 }
 0xbc4   : > { %v7279_v31 = vpop.eup %7278  ;;  %v5333_v32 = vsub.f32 1.0, %v7277_v50  ;;  %v5329_v20 = vmul.f32 %v8801_v39, %v7277_v50 }
 0xbc5   : > { %v5331_v60 = vsub.f32 1.0, %v7279_v31  ;;  %v5327_v53 = vmul.f32 %v8809_v33, %v7279_v31 }
 0xbc6   : > { %v7281_v14 = vpop.eup %7280 }
 0xbc7   : > { %v7283_v35 = vpop.eup %7282  ;;  %v5334_v6 = vsub.f32 1.0, %v7281_v14  ;;  %v5330_v11 = vmul.f32 %v8805_v5, %v7281_v14 }
 0xbc8   : > { %v5332_v46 = vsub.f32 1.0, %v7283_v35  ;;  %v5328_v43 = vmul.f32 %v8813_v47, %v7283_v35 }
 0xbdd   : > { %v6865_v38 = vpop.f32.mrb[56].mxu0 }
 0xbde   : > { %v4317_v45 = vpop.f32.mrb[57].mxu0 }
 0xbdf   : > { %v6866_v22 = vpop.f32.mrb[58].mxu0 }
 0xbe0   : > { %v5235_v28 = vpack.c.bf16 %v6866_v22, %v6865_v38  ;;  %v4320_v36 = vpop.f32.mrb[59].mxu0 }
 0xbe1   : > { %v5234_v12 = vpack.c.bf16 %v4320_v36, %v4317_v45 }
 0xbe3   : > { %6959 = vmatprep.subr.bf16.mxu0 %v5234_v12 }
 0xbe4   : > { %6960 = vmatpush3.bf16.msra.mxu0 %v5234_v12 }
 0xbe5   : > { %6961 = vmatprep.subr.bf16.mxu0 %v5235_v28 }
 0xbe8   : > { %6962 = vmatpush3.bf16.msra.mxu0 %v5235_v28 }
 0xbeb   : > { %6964 = vmatmul.mubr.msk.bf16.vlgmr.msra.gmra.mrb[60].mxu0 %vm1108_vm1, %v5239_v23 }
 0xcbe   : > { %v6965_v7 = vpop.f32.mrb[60].mxu0 }
 0xcbf   : > { %v5321_v61 = vadd.f32 %v6965_v7, %v5312_v52  ;;  %v5280_v2 = vpop.f32.mrb[61].mxu0 }
 0xcc0   : > { %v5319_v10 = vadd.f32 %v5302_v27, %v5280_v2  ;;  %v6966_v19 = vpop.f32.mrb[62].mxu0 }
 0xcc1   : > { %7284 = vtanh.f32 %v5321_v61  ;;  %v5322_v44 = vadd.f32 %v6966_v19, %v5317_v30  ;;  %v5283_v3 = vpop.f32.mrb[63].mxu0 }
 0xcc2   : > { %7286 = vtanh.f32 %v5319_v10  ;;  %v5320_v9 = vadd.f32 %v5307_v59, %v5283_v3 }
 0xcc3   : > { %7288 = vtanh.f32 %v5322_v44 }
 0xcc4   : > { %7290 = vtanh.f32 %v5320_v9 }
 0xccb   : > { %v7285_v42 = vpop.eup %7284 }
 0xccc   : > { %v7287_v25 = vpop.eup %7286  ;;  %v5337_v0 = vmul.f32 %v7285_v42, %v5333_v32 }
 0xccd   : > { %v7289_v18 = vpop.eup %7288  ;;  %v5335_v58 = vmul.f32 %v7287_v25, %v5331_v60 }
 0xcce   : > { %v7291_v40 = vpop.eup %7290  ;;  %v5341_v51 = vadd.f32 %v5337_v0, %v5329_v20  ;;  %v5338_v29 = vmul.f32 %v7289_v18, %v5334_v6 }
 0xccf   : > { %v5339_v63 = vadd.f32 %v5335_v58, %v5327_v53  ;;  %v5336_v38 = vmul.f32 %v7291_v40, %v5332_v46 }
 0xcd0   : > { %5345 = vst [vmem:[#allocation2 + $0x10] sm:$0xff] %v5341_v51  ;;  %v5342_v45 = vadd.f32 %v5338_v29, %v5330_v11 }
 0xcd1   : > { %5343 = vst [vmem:[#allocation2] sm:$0xff] %v5339_v63  ;;  %v5340_v39 = vadd.f32 %v5336_v38, %v5328_v43 }
 0xcd2   : > { %5346 = vst [vmem:[#allocation2 + $0x18] sm:$0xff] %v5342_v45 }
 0xcd3   : > { %5344 = vst [vmem:[#allocation2 + $0x8] sm:$0xff] %v5340_v39 }
 0xcd4 PF: > { %s9255_s22 = sld [smem:[#allocation6_spill]]  ;;  %s9256_s2 = sld [smem:[#allocation4_spill]] }
 0xcd5   : > { %s9257_s25 = sld [smem:[#allocation5_spill]]  ;;  %s9258_s26 = sld [smem:[#allocation7_spill]] }
 0xcd6   : > { %s9259_s27 = sld [smem:[#allocation8_spill]] }
 0xcda   : > { %s32_s3 = sadd.s32 1, %s9255_s22  }
 0xcdb   : > { %p29_p8 = scmp.ge.s32.totalorder %s32_s3, 18  }
 0xcdd   :  { %31 = sbr.rel (!%p29_p8) target bundleno = 23 (0x17), region = 206 }

</bundles_post_ra>
